<compile_context>
chip_gen: v5e
topology: v5e:2x2
jax: 0.10.0
libtpu: 0.0.40
codegen_flags: <defaults>
</compile_context>

<pallas_src>
import jax
import jax.numpy as jnp
from jax.experimental import pallas as pl
from jax.experimental.pallas import tpu as pltpu

EPS = 1e-5


def _layernorm(x, gamma, beta):
    mu = jnp.mean(x, axis=-1, keepdims=True)
    var = jnp.mean(jnp.square(x - mu), axis=-1, keepdims=True)
    return (x - mu) * jax.lax.rsqrt(var + EPS) * gamma + beta


def _gelu(x):
    # TODO(synk): PyTorch nn.GELU default is erf-exact; tanh approximation kept
    # here (EUP tanh) for robust Mosaic lowering. Deviation vs PyTorch ~1e-3.
    c = jnp.float32(0.7978845608028654)  # sqrt(2/pi)
    return 0.5 * x * (1.0 + jnp.tanh(c * (x + 0.044715 * x * x * x)))


# --------------------------------------------------------------------------- #
# Kernel: whole MixingBlock on a (block_b, N*D) lane-packed batch block.
# --------------------------------------------------------------------------- #
def mixing_block_kernel(
    x_ref,                 # (Bt, N*D)   f32, lane index = n*D + d
    p_ref,                 # (N*D, N*D)  f32 grouped-mean matrix (block-diag 1/D)
    gtt_ref, btt_ref,      # (1, N*D)    token LayerNorm gamma/beta, pre-tiled
    t1_ref, tb1_ref,       # (N*D, L*D) bf16 / (1, L*D) f32   token layer 1
    t2_ref, tb2_ref,       # (L*D, N*D) bf16 / (1, N*D) f32   token layer 2
    c1_ref, cb1_ref,       # (N*D, N*L) bf16 / (1, N*L) f32   channel layer 1 (LN affine folded)
    c2_ref, cb2_ref,       # (N*L, N*D) bf16 / (1, N*D) f32   channel layer 2
    o_ref,                 # (Bt, N*D)   f32
):
    x = x_ref[...]                                   # f32, kept f32 for LN + residuals
    P = p_ref[...]

    def group_normalize(v):
        # per-(b, n) LayerNorm over the D-wide lane groups, all in f32.
        mu = jnp.dot(v, P, preferred_element_type=jnp.float32)
        vc = v - mu
        var = jnp.dot(vc * vc, P, preferred_element_type=jnp.float32)
        return vc * jax.lax.rsqrt(var + EPS)

    # ---- token branch (pre-norm) -------------------------------------------
    t = group_normalize(x) * gtt_ref[...] + btt_ref[...]
    h = _gelu(jnp.dot(t.astype(jnp.bfloat16), t1_ref[...],
                      preferred_element_type=jnp.float32) + tb1_ref[...])
    tm = jnp.dot(h.astype(jnp.bfloat16), t2_ref[...],
                 preferred_element_type=jnp.float32) + tb2_ref[...]
    net = x + tm                                     # residual (f32)

    # ---- channel branch (pre-norm; LN affine folded into c1/cb1) -----------
    c = group_normalize(net)
    h2 = _gelu(jnp.dot(c.astype(jnp.bfloat16), c1_ref[...],
                       preferred_element_type=jnp.float32) + cb1_ref[...])
    cm = jnp.dot(h2.astype(jnp.bfloat16), c2_ref[...],
                 preferred_element_type=jnp.float32) + cb2_ref[...]
    o_ref[...] = net + cm                            # residual (f32), lane-dense store


# --------------------------------------------------------------------------- #
# Host-side parameter packing (Kronecker expansion, bias tiling, LN folding).
# --------------------------------------------------------------------------- #
def pack_params(p, N, D, L, *, mxu_dtype=jnp.bfloat16):
    f32 = jnp.float32
    eye_d = jnp.eye(D, dtype=f32)
    eye_n = jnp.eye(N, dtype=f32)

    # (x @ P)[b, n*D+d] == mean over d' of x[b, n*D+d']
    P = jnp.kron(eye_n, jnp.full((D, D), 1.0 / D, f32))                 # (ND, ND)

    gtt = jnp.tile(p["gt"].astype(f32), N)[None, :]                     # (1, ND)
    btt = jnp.tile(p["bt"].astype(f32), N)[None, :]                     # (1, ND)

    # Token MLP, hidden packed as lane index l*D + d.
    T1 = jnp.kron(p["w1t"].astype(f32).T, eye_d)                        # (ND, LD)
    tb1 = jnp.repeat(p["b1t"].astype(f32), D)[None, :]                  # (1, LD)
    T2 = jnp.kron(p["w2t"].astype(f32).T, eye_d)                        # (LD, ND)
    tb2 = jnp.repeat(p["b2t"].astype(f32), D)[None, :]                  # (1, ND)

    # Channel FF with the channel-LayerNorm affine folded into layer 1.
    w1 = p["gc"].astype(f32)[:, None] * p["w1c"].astype(f32).T          # (D, L)
    b1 = p["b1c"].astype(f32) + p["bc"].astype(f32) @ p["w1c"].astype(f32).T
    C1 = jnp.kron(eye_n, w1)                                            # (ND, NL)
    cb1 = jnp.tile(b1, N)[None, :]                                      # (1, NL)
    C2 = jnp.kron(eye_n, p["w2c"].astype(f32).T)                        # (NL, ND)
    cb2 = jnp.tile(p["b2c"].astype(f32), N)[None, :]                    # (1, ND)

    return (P, gtt, btt,
            T1.astype(mxu_dtype), tb1, T2.astype(mxu_dtype), tb2,
            C1.astype(mxu_dtype), cb1, C2.astype(mxu_dtype), cb2)


# --------------------------------------------------------------------------- #
# Wrapper.
# --------------------------------------------------------------------------- #
def mixing_block(x, params, *, block_b=None):
    B, N, D = x.shape
    L = params["w1t"].shape[0]
    ND = N * D

    if block_b is None:
        block_b = B if B <= 512 else 512
    if block_b != B and block_b % 8 != 0:
        block_b = B  # keep second-minor block dim (8,128)-legal

    packed = pack_params(params, N, D, L)
    x2 = x.reshape(B, ND)                      # free HBM reshape -> lane-dense I/O

    in_specs = [pl.BlockSpec((block_b, ND), lambda i: (i, 0))]
    args = [x2]
    for arr in packed:                         # full-array, grid-invariant params
        in_specs.append(pl.BlockSpec(arr.shape, lambda i: (0, 0)))
        args.append(arr)

    out = pl.pallas_call(
        mixing_block_kernel,
        out_shape=jax.ShapeDtypeStruct((B, ND), jnp.float32),
        grid=(pl.cdiv(B, block_b),),
        in_specs=in_specs,
        out_specs=pl.BlockSpec((block_b, ND), lambda i: (i, 0)),
        # "parallel" batch-block axis -> v7x megacore can split grid steps.
        # (For much larger block_b, raise vmem_limit_bytes via CompilerParams;
        #  current footprint is ~6 MiB, well under every generation's default.)
        compiler_params=pltpu.CompilerParams(dimension_semantics=("parallel",)),
    )(*args)
    return out.reshape(B, N, D)


# --------------------------------------------------------------------------- #
# Pure-JAX reference mirroring the PyTorch forward (weights in PyTorch layout).
# --------------------------------------------------------------------------- #
def mixing_block_reference(x, p):
    t = _layernorm(x, p["gt"], p["bt"])
    tt = jnp.swapaxes(t, 1, 2)                               # (B, D, N)
    h = _gelu(tt @ p["w1t"].T + p["b1t"])                    # (B, D, L)
    tm = jnp.swapaxes(h @ p["w2t"].T + p["b2t"], 1, 2)       # (B, N, D)
    net = x + tm
    c = _layernorm(net, p["gc"], p["bc"])
    h2 = _gelu(c @ p["w1c"].T + p["b1c"])                    # (B, N, L)
    cm = h2 @ p["w2c"].T + p["b2c"]                          # (B, N, D)
    return net + cm


def make_params(key, num_tokens, in_dim, latent_dim):
    N, D, L = num_tokens, in_dim, latent_dim
    ks = jax.random.split(key, 12)
    s = 0.05
    f32 = jnp.float32
    return {
        # LayerNorms (affine), PyTorch layout: (D,)
        "gt": 1.0 + s * jax.random.normal(ks[0], (D,), f32),
        "bt": s * jax.random.normal(ks[1], (D,), f32),
        "gc": 1.0 + s * jax.random.normal(ks[2], (D,), f32),
        "bc": s * jax.random.normal(ks[3], (D,), f32),
        # Token MLP, PyTorch Linear layout (out, in) / (out,)
        "w1t": s * jax.random.normal(ks[4], (L, N), f32),
        "b1t": s * jax.random.normal(ks[5], (L,), f32),
        "w2t": s * jax.random.normal(ks[6], (N, L), f32),
        "b2t": s * jax.random.normal(ks[7], (N,), f32),
        # Channel FF, PyTorch Linear layout
        "w1c": s * jax.random.normal(ks[8], (L, D), f32),
        "b1c": s * jax.random.normal(ks[9], (L,), f32),
        "w2c": s * jax.random.normal(ks[10], (D, L), f32),
        "b2c": s * jax.random.normal(ks[11], (D,), f32),
    }


if __name__ == "__main__":
    B, N, D, L = 16, 8, 32, 64   # batch, num_tokens, in_dim, latent_dim

    key = jax.random.PRNGKey(0)
    kx, kp = jax.random.split(key)
    x = jax.random.normal(kx, (B, N, D), jnp.float32)
    params = make_params(kp, N, D, L)

    # block_b=8 -> grid=(2,) parallel batch blocks (feeds both v7x TensorCores),
    # each block batch-folded into the matmul M dimension.
    out = mixing_block(x, params, block_b=8)
    out = jax.block_until_ready(out)

    ref = mixing_block_reference(x, params)
    assert out.shape == (B, N, D), out.shape
    err = float(jnp.max(jnp.abs(out - ref)))
    # bf16 MXU weights/activations vs. f32 reference => relaxed tolerance.
    assert err < 2e-2, err

    print("KERNEL_OK")
</pallas_src>

<mosaic_0001>
module attributes {stable_mosaic.version = 11 : i64} {
  func.func @mixing_block_kernel(%arg0: i32, %arg1: memref<8x256xf32, #tpu.memory_space<vmem>>, %arg2: memref<256x256xf32, #tpu.memory_space<vmem>>, %arg3: memref<1x256xf32, #tpu.memory_space<vmem>>, %arg4: memref<1x256xf32, #tpu.memory_space<vmem>>, %arg5: memref<256x2048xbf16, #tpu.memory_space<vmem>>, %arg6: memref<1x2048xf32, #tpu.memory_space<vmem>>, %arg7: memref<2048x256xbf16, #tpu.memory_space<vmem>>, %arg8: memref<1x256xf32, #tpu.memory_space<vmem>>, %arg9: memref<256x512xbf16, #tpu.memory_space<vmem>>, %arg10: memref<1x512xf32, #tpu.memory_space<vmem>>, %arg11: memref<512x256xbf16, #tpu.memory_space<vmem>>, %arg12: memref<1x256xf32, #tpu.memory_space<vmem>>, %arg13: memref<8x256xf32, #tpu.memory_space<vmem>>) attributes {dimension_semantics = [#tpu.dimension_semantics<parallel>], iteration_bounds = array<i64: 2>, scalar_prefetch = 0 : i64, scratch_operands = 0 : i64, tpu.core_type = #tpu.core_type<tc>, window_params = [{transform_indices = @transform_0, window_bounds = array<i64: 8, 256>}, {pipeline_mode = #tpu.pipeline_mode<synchronous>, transform_indices = @transform_1, window_bounds = array<i64: 256, 256>}, {pipeline_mode = #tpu.pipeline_mode<synchronous>, transform_indices = @transform_2, window_bounds = array<i64: 1, 256>}, {pipeline_mode = #tpu.pipeline_mode<synchronous>, transform_indices = @transform_3, window_bounds = array<i64: 1, 256>}, {pipeline_mode = #tpu.pipeline_mode<synchronous>, transform_indices = @transform_4, window_bounds = array<i64: 256, 2048>}, {pipeline_mode = #tpu.pipeline_mode<synchronous>, transform_indices = @transform_5, window_bounds = array<i64: 1, 2048>}, {pipeline_mode = #tpu.pipeline_mode<synchronous>, transform_indices = @transform_6, window_bounds = array<i64: 2048, 256>}, {pipeline_mode = #tpu.pipeline_mode<synchronous>, transform_indices = @transform_7, window_bounds = array<i64: 1, 256>}, {pipeline_mode = #tpu.pipeline_mode<synchronous>, transform_indices = @transform_8, window_bounds = array<i64: 256, 512>}, {pipeline_mode = #tpu.pipeline_mode<synchronous>, transform_indices = @transform_9, window_bounds = array<i64: 1, 512>}, {pipeline_mode = #tpu.pipeline_mode<synchronous>, transform_indices = @transform_10, window_bounds = array<i64: 512, 256>}, {pipeline_mode = #tpu.pipeline_mode<synchronous>, transform_indices = @transform_11, window_bounds = array<i64: 1, 256>}, {transform_indices = @transform_12, window_bounds = array<i64: 8, 256>}]} {
    %c0 = arith.constant 0 : index
    %c0_0 = arith.constant 0 : index
    %0 = vector.load %arg1[%c0, %c0_0] : memref<8x256xf32, #tpu.memory_space<vmem>>, vector<8x256xf32>
    %c0_1 = arith.constant 0 : index
    %c0_2 = arith.constant 0 : index
    %1 = vector.load %arg2[%c0_1, %c0_2] : memref<256x256xf32, #tpu.memory_space<vmem>>, vector<256x256xf32>
    %cst = arith.constant dense<0.000000e+00> : vector<8x256xf32>
    %2 = tpu.matmul %0, %1, %cst {dimension_numbers = #tpu.dot_dimension_numbers<[1], [0], [0], [1], [0, 0, 1, 1], [], []>} : vector<8x256xf32>, vector<256x256xf32>, vector<8x256xf32> -> vector<8x256xf32>
    %3 = arith.subf %0, %2 : vector<8x256xf32>
    %4 = arith.mulf %3, %3 : vector<8x256xf32>
    %cst_3 = arith.constant dense<0.000000e+00> : vector<8x256xf32>
    %5 = tpu.matmul %4, %1, %cst_3 {dimension_numbers = #tpu.dot_dimension_numbers<[1], [0], [0], [1], [0, 0, 1, 1], [], []>} : vector<8x256xf32>, vector<256x256xf32>, vector<8x256xf32> -> vector<8x256xf32>
    %cst_4 = arith.constant 9.99999974E-6 : f32
    %6 = vector.broadcast %cst_4 : f32 to vector<8x256xf32>
    %7 = arith.addf %5, %6 : vector<8x256xf32>
    %8 = math.rsqrt %7 : vector<8x256xf32>
    %9 = arith.mulf %3, %8 : vector<8x256xf32>
    %c0_5 = arith.constant 0 : index
    %c0_6 = arith.constant 0 : index
    %10 = vector.load %arg3[%c0_5, %c0_6] : memref<1x256xf32, #tpu.memory_space<vmem>>, vector<1x256xf32>
    %11 = vector.broadcast %10 : vector<1x256xf32> to vector<8x256xf32>
    %12 = arith.mulf %9, %11 : vector<8x256xf32>
    %c0_7 = arith.constant 0 : index
    %c0_8 = arith.constant 0 : index
    %13 = vector.load %arg4[%c0_7, %c0_8] : memref<1x256xf32, #tpu.memory_space<vmem>>, vector<1x256xf32>
    %14 = vector.broadcast %13 : vector<1x256xf32> to vector<8x256xf32>
    %15 = arith.addf %12, %14 : vector<8x256xf32>
    %16 = arith.truncf %15 : vector<8x256xf32> to vector<8x256xbf16>
    %c0_9 = arith.constant 0 : index
    %c0_10 = arith.constant 0 : index
    %17 = vector.load %arg5[%c0_9, %c0_10] : memref<256x2048xbf16, #tpu.memory_space<vmem>>, vector<256x2048xbf16>
    %cst_11 = arith.constant dense<0.000000e+00> : vector<8x2048xf32>
    %18 = tpu.matmul %16, %17, %cst_11 {dimension_numbers = #tpu.dot_dimension_numbers<[1], [0], [0], [1], [0, 0, 1, 1], [], []>} : vector<8x256xbf16>, vector<256x2048xbf16>, vector<8x2048xf32> -> vector<8x2048xf32>
    %c0_12 = arith.constant 0 : index
    %c0_13 = arith.constant 0 : index
    %19 = vector.load %arg6[%c0_12, %c0_13] : memref<1x2048xf32, #tpu.memory_space<vmem>>, vector<1x2048xf32>
    %20 = vector.broadcast %19 : vector<1x2048xf32> to vector<8x2048xf32>
    %21 = arith.addf %18, %20 : vector<8x2048xf32>
    %cst_14 = arith.constant 5.000000e-01 : f32
    %22 = vector.broadcast %cst_14 : f32 to vector<8x2048xf32>
    %23 = arith.mulf %22, %21 : vector<8x2048xf32>
    %cst_15 = arith.constant 4.471500e-02 : f32
    %24 = vector.broadcast %cst_15 : f32 to vector<8x2048xf32>
    %25 = arith.mulf %24, %21 : vector<8x2048xf32>
    %26 = arith.mulf %25, %21 : vector<8x2048xf32>
    %27 = arith.mulf %26, %21 : vector<8x2048xf32>
    %28 = arith.addf %21, %27 : vector<8x2048xf32>
    %cst_16 = arith.constant 0.797884583 : f32
    %29 = vector.broadcast %cst_16 : f32 to vector<8x2048xf32>
    %30 = arith.mulf %29, %28 : vector<8x2048xf32>
    %31 = math.tanh %30 : vector<8x2048xf32>
    %cst_17 = arith.constant 1.000000e+00 : f32
    %32 = vector.broadcast %cst_17 : f32 to vector<8x2048xf32>
    %33 = arith.addf %32, %31 : vector<8x2048xf32>
    %34 = arith.mulf %23, %33 : vector<8x2048xf32>
    %35 = arith.truncf %34 : vector<8x2048xf32> to vector<8x2048xbf16>
    %c0_18 = arith.constant 0 : index
    %c0_19 = arith.constant 0 : index
    %36 = vector.load %arg7[%c0_18, %c0_19] : memref<2048x256xbf16, #tpu.memory_space<vmem>>, vector<2048x256xbf16>
    %cst_20 = arith.constant dense<0.000000e+00> : vector<8x256xf32>
    %37 = tpu.matmul %35, %36, %cst_20 {dimension_numbers = #tpu.dot_dimension_numbers<[1], [0], [0], [1], [0, 0, 1, 1], [], []>} : vector<8x2048xbf16>, vector<2048x256xbf16>, vector<8x256xf32> -> vector<8x256xf32>
    %c0_21 = arith.constant 0 : index
    %c0_22 = arith.constant 0 : index
    %38 = vector.load %arg8[%c0_21, %c0_22] : memref<1x256xf32, #tpu.memory_space<vmem>>, vector<1x256xf32>
    %39 = vector.broadcast %38 : vector<1x256xf32> to vector<8x256xf32>
    %40 = arith.addf %37, %39 : vector<8x256xf32>
    %41 = arith.addf %0, %40 : vector<8x256xf32>
    %cst_23 = arith.constant dense<0.000000e+00> : vector<8x256xf32>
    %42 = tpu.matmul %41, %1, %cst_23 {dimension_numbers = #tpu.dot_dimension_numbers<[1], [0], [0], [1], [0, 0, 1, 1], [], []>} : vector<8x256xf32>, vector<256x256xf32>, vector<8x256xf32> -> vector<8x256xf32>
    %43 = arith.subf %41, %42 : vector<8x256xf32>
    %44 = arith.mulf %43, %43 : vector<8x256xf32>
    %cst_24 = arith.constant dense<0.000000e+00> : vector<8x256xf32>
    %45 = tpu.matmul %44, %1, %cst_24 {dimension_numbers = #tpu.dot_dimension_numbers<[1], [0], [0], [1], [0, 0, 1, 1], [], []>} : vector<8x256xf32>, vector<256x256xf32>, vector<8x256xf32> -> vector<8x256xf32>
    %cst_25 = arith.constant 9.99999974E-6 : f32
    %46 = vector.broadcast %cst_25 : f32 to vector<8x256xf32>
    %47 = arith.addf %45, %46 : vector<8x256xf32>
    %48 = math.rsqrt %47 : vector<8x256xf32>
    %49 = arith.mulf %43, %48 : vector<8x256xf32>
    %50 = arith.truncf %49 : vector<8x256xf32> to vector<8x256xbf16>
    %c0_26 = arith.constant 0 : index
    %c0_27 = arith.constant 0 : index
    %51 = vector.load %arg9[%c0_26, %c0_27] : memref<256x512xbf16, #tpu.memory_space<vmem>>, vector<256x512xbf16>
    %cst_28 = arith.constant dense<0.000000e+00> : vector<8x512xf32>
    %52 = tpu.matmul %50, %51, %cst_28 {dimension_numbers = #tpu.dot_dimension_numbers<[1], [0], [0], [1], [0, 0, 1, 1], [], []>} : vector<8x256xbf16>, vector<256x512xbf16>, vector<8x512xf32> -> vector<8x512xf32>
    %c0_29 = arith.constant 0 : index
    %c0_30 = arith.constant 0 : index
    %53 = vector.load %arg10[%c0_29, %c0_30] : memref<1x512xf32, #tpu.memory_space<vmem>>, vector<1x512xf32>
    %54 = vector.broadcast %53 : vector<1x512xf32> to vector<8x512xf32>
    %55 = arith.addf %52, %54 : vector<8x512xf32>
    %cst_31 = arith.constant 5.000000e-01 : f32
    %56 = vector.broadcast %cst_31 : f32 to vector<8x512xf32>
    %57 = arith.mulf %56, %55 : vector<8x512xf32>
    %cst_32 = arith.constant 4.471500e-02 : f32
    %58 = vector.broadcast %cst_32 : f32 to vector<8x512xf32>
    %59 = arith.mulf %58, %55 : vector<8x512xf32>
    %60 = arith.mulf %59, %55 : vector<8x512xf32>
    %61 = arith.mulf %60, %55 : vector<8x512xf32>
    %62 = arith.addf %55, %61 : vector<8x512xf32>
    %cst_33 = arith.constant 0.797884583 : f32
    %63 = vector.broadcast %cst_33 : f32 to vector<8x512xf32>
    %64 = arith.mulf %63, %62 : vector<8x512xf32>
    %65 = math.tanh %64 : vector<8x512xf32>
    %cst_34 = arith.constant 1.000000e+00 : f32
    %66 = vector.broadcast %cst_34 : f32 to vector<8x512xf32>
    %67 = arith.addf %66, %65 : vector<8x512xf32>
    %68 = arith.mulf %57, %67 : vector<8x512xf32>
    %69 = arith.truncf %68 : vector<8x512xf32> to vector<8x512xbf16>
    %c0_35 = arith.constant 0 : index
    %c0_36 = arith.constant 0 : index
    %70 = vector.load %arg11[%c0_35, %c0_36] : memref<512x256xbf16, #tpu.memory_space<vmem>>, vector<512x256xbf16>
    %cst_37 = arith.constant dense<0.000000e+00> : vector<8x256xf32>
    %71 = tpu.matmul %69, %70, %cst_37 {dimension_numbers = #tpu.dot_dimension_numbers<[1], [0], [0], [1], [0, 0, 1, 1], [], []>} : vector<8x512xbf16>, vector<512x256xbf16>, vector<8x256xf32> -> vector<8x256xf32>
    %c0_38 = arith.constant 0 : index
    %c0_39 = arith.constant 0 : index
    %72 = vector.load %arg12[%c0_38, %c0_39] : memref<1x256xf32, #tpu.memory_space<vmem>>, vector<1x256xf32>
    %73 = vector.broadcast %72 : vector<1x256xf32> to vector<8x256xf32>
    %74 = arith.addf %71, %73 : vector<8x256xf32>
    %75 = arith.addf %41, %74 : vector<8x256xf32>
    %c0_40 = arith.constant 0 : index
    %c0_41 = arith.constant 0 : index
    %76 = vector.load %arg13[%c0_40, %c0_41] : memref<8x256xf32, #tpu.memory_space<vmem>>, vector<8x256xf32>
    tpu.vector_store %arg13[%c0_40, %c0_41], %75 {strides = array<i32>} : memref<8x256xf32, #tpu.memory_space<vmem>>, vector<8x256xf32>,
    return
  }
  func.func @transform_0(%arg0: i32) -> (i32, i32) {
    %c0_i32 = arith.constant 0 : i32
    %c0_i32_0 = arith.constant 0 : i32
    return %arg0, %c0_i32 : i32, i32
  }
  func.func @transform_1(%arg0: i32) -> (i32, i32) {
    %c0_i32 = arith.constant 0 : i32
    %c0_i32_0 = arith.constant 0 : i32
    %c0_i32_1 = arith.constant 0 : i32
    return %c0_i32, %c0_i32_0 : i32, i32
  }
  func.func @transform_2(%arg0: i32) -> (i32, i32) {
    %c0_i32 = arith.constant 0 : i32
    %c0_i32_0 = arith.constant 0 : i32
    %c0_i32_1 = arith.constant 0 : i32
    return %c0_i32, %c0_i32_0 : i32, i32
  }
  func.func @transform_3(%arg0: i32) -> (i32, i32) {
    %c0_i32 = arith.constant 0 : i32
    %c0_i32_0 = arith.constant 0 : i32
    %c0_i32_1 = arith.constant 0 : i32
    return %c0_i32, %c0_i32_0 : i32, i32
  }
  func.func @transform_4(%arg0: i32) -> (i32, i32) {
    %c0_i32 = arith.constant 0 : i32
    %c0_i32_0 = arith.constant 0 : i32
    %c0_i32_1 = arith.constant 0 : i32
    return %c0_i32, %c0_i32_0 : i32, i32
  }
  func.func @transform_5(%arg0: i32) -> (i32, i32) {
    %c0_i32 = arith.constant 0 : i32
    %c0_i32_0 = arith.constant 0 : i32
    %c0_i32_1 = arith.constant 0 : i32
    return %c0_i32, %c0_i32_0 : i32, i32
  }
  func.func @transform_6(%arg0: i32) -> (i32, i32) {
    %c0_i32 = arith.constant 0 : i32
    %c0_i32_0 = arith.constant 0 : i32
    %c0_i32_1 = arith.constant 0 : i32
    return %c0_i32, %c0_i32_0 : i32, i32
  }
  func.func @transform_7(%arg0: i32) -> (i32, i32) {
    %c0_i32 = arith.constant 0 : i32
    %c0_i32_0 = arith.constant 0 : i32
    %c0_i32_1 = arith.constant 0 : i32
    return %c0_i32, %c0_i32_0 : i32, i32
  }
  func.func @transform_8(%arg0: i32) -> (i32, i32) {
    %c0_i32 = arith.constant 0 : i32
    %c0_i32_0 = arith.constant 0 : i32
    %c0_i32_1 = arith.constant 0 : i32
    return %c0_i32, %c0_i32_0 : i32, i32
  }
  func.func @transform_9(%arg0: i32) -> (i32, i32) {
    %c0_i32 = arith.constant 0 : i32
    %c0_i32_0 = arith.constant 0 : i32
    %c0_i32_1 = arith.constant 0 : i32
    return %c0_i32, %c0_i32_0 : i32, i32
  }
  func.func @transform_10(%arg0: i32) -> (i32, i32) {
    %c0_i32 = arith.constant 0 : i32
    %c0_i32_0 = arith.constant 0 : i32
    %c0_i32_1 = arith.constant 0 : i32
    return %c0_i32, %c0_i32_0 : i32, i32
  }
  func.func @transform_11(%arg0: i32) -> (i32, i32) {
    %c0_i32 = arith.constant 0 : i32
    %c0_i32_0 = arith.constant 0 : i32
    %c0_i32_1 = arith.constant 0 : i32
    return %c0_i32, %c0_i32_0 : i32, i32
  }
  func.func @transform_12(%arg0: i32) -> (i32, i32) {
    %c0_i32 = arith.constant 0 : i32
    %c0_i32_0 = arith.constant 0 : i32
    return %arg0, %c0_i32 : i32, i32
  }
}

</mosaic_0001>

<bundles_post_ra>
// kernel: tpu_custom_call.1
= control target key start
LH: loop header
LB: loop body
LE: loop exit
PB: predicated region body
PF: predicated region fallthrough
CT: control target
= control target key end

     0   :  { %s11345_s0 = inlined_call_operand.hbm [shape: f32[16,256], index: 0, kind: input, shape index: {}]   ;;  %s11346_s1 = inlined_call_operand.hbm [shape: f32[256,256], index: 1, kind: input, shape index: {}]   ;;  %s11347_s2 = inlined_call_operand.hbm [shape: f32[1,256], index: 2, kind: input, shape index: {}]   ;;  %s11348_s3 = inlined_call_operand.vmem [shape: f32[1,256], index: 3, kind: input, shape index: {}]   ;;  %s11349_s4 = inlined_call_operand.hbm [shape: bf16[256,2048], index: 4, kind: input, shape index: {}]   ;;  %s11350_s5 = inlined_call_operand.hbm [shape: f32[1,2048], index: 5, kind: input, shape index: {}]   ;;  %s11351_s6 = inlined_call_operand.hbm [shape: bf16[2048,256], index: 6, kind: input, shape index: {}]   ;;  %s11352_s7 = inlined_call_operand.hbm [shape: f32[1,256], index: 7, kind: input, shape index: {}]   ;;  %s11353_s8 = inlined_call_operand.hbm [shape: bf16[256,512], index: 8, kind: input, shape index: {}]   ;;  %s11354_s9 = inlined_call_operand.vmem [shape: f32[1,512], index: 9, kind: input, shape index: {}]   ;;  %s11355_s10 = inlined_call_operand.hbm [shape: bf16[512,256], index: 10, kind: input, shape index: {}]   ;;  %s11356_s11 = inlined_call_operand.vmem [shape: f32[1,256], index: 11, kind: input, shape index: {}]   ;;  %s11357_s12 = inlined_call_operand.hbm [shape: f32[16,256], index: 12, kind: output, shape index: {}]  }
   0x1   :  { %11363 = sst [smem:[#allocation26_spill]] %s11346_s1 }
   0x2   :  { %11364 = sst [smem:[#allocation27_spill]] %s11347_s2 }
   0x3   :  { %11365 = sst [smem:[#allocation28_spill]] %s11349_s4 }
   0x4   :  { %11366 = sst [smem:[#allocation29_spill]] %s11351_s6 }
   0x5   :  { %11367 = sst [smem:[#allocation30_spill]] %s11354_s9 }
   0x6   :  { %11368 = sst [smem:[#allocation31_spill]] %s11356_s11 }
   0x7   :  { %11369 = sst [smem:[#allocation32_spill]] %s11357_s12 }
   0x8   :  { %17 = vsyncpa [#allocation3], 0 }
   0x9   :  { %19 = vsyncpa [#allocation3 + $0x1], 0 }
   0xa   :  { %20 = vsyncpa [#allocation6], 0 }
   0xb   :  { %21 = vsyncpa [#allocation9], 0 }
   0xc   :  { %22 = vsyncpa [#allocation12], 0 }
   0xd   :  { %23 = vsyncpa [#allocation15], 0 }
   0xe   :  { %24 = vsyncpa [#allocation4], 0 }
   0xf   :  { %26 = vsyncpa [#allocation4 + $0x1], 0  ;;  %s10236_s21 = smov 0   ;;  %s10238_s22 = smov 0  }
  0x10   :  { %s10240_s23 = smov 0   ;;  %s10242_s24 = smov 0  }
  0x11 LB: > { %s11370_s1 = sld [smem:[#allocation26_spill]]  ;;  %s10260_s28 = sadd.s32 4294967295, %s10155_s24   ;;  %s10155_s24 = sphi %s10242_s24, %s11396_s24   ;;  %s10151_s23 = sphi %s10240_s23, %s11395_s23   ;;  %s10147_s22 = sphi %s10238_s22, %s11394_s22   ;;  %s10143_s21 = sphi %s10236_s21, %s11393_s21  }
  0x12   : > { %p6324_p0 = scmp.ge.s32.totalorder %s10155_s24, 1  ;;  %p53_p1 = scmp.eq.s32.totalorder %s10260_s28, 0 }
  0x13   : > { %p320_p2 = scmp.lt.s32.totalorder %s10155_s24, 3  ;;  %s10157_s30 = smov [#allocation5]  }
  0x14   : > { %s333_s13 = sshll.u32 %s10157_s30, 4  ;;  %s11372_s4 = sld [smem:[#allocation28_spill]]  ;;  %s334_s13 = int_to_ptr.vmem [resolvable:$true] %s333_s13 }
  0x15   : > { %p10265_p3 = pnand %p6324_p0, %p320_p2  ;;  %s10158_s18 = smov [#allocation8]  }
  0x16   : > { %s362_s19 = sshll.u32 %s10158_s18, 4  ;;  %s10159_s20 = smov 256   ;;  %s363_s19 = int_to_ptr.vmem [resolvable:$true] %s362_s19 }
  0x17   : > { %s331_s27 = sshll.u32 %s11370_s1, 4  ;;  %p9591_p4 = pneg %p10265_p3  ;;  %s332_s27 = int_to_ptr.hbm [resolvable:$true] %s331_s27 }
  0x18   : > { %s10160_s25 = smov 16   ;;  %s10161_s26 = smov 1024  }
  0x19   : > { %p10277_p6 = pnand %p9591_p4, %p53_p1  ;;  %s10162_s30 = smov 64  }
  0x1a   : > { %s360_s16 = sshll.u32 %s11372_s4, 4  ;;  %s11374_s6 = sld [smem:[#allocation29_spill]]  ;;  %s361_s16 = int_to_ptr.hbm [resolvable:$true] %s360_s16 }
  0x1b   : > { %9594 = dma.hbm_to_vmem [thread:$0]  (!%p10277_p6), %s332_s27, 8192, %s334_s13, [#allocation6], %s10159_s20, %s10159_s20, %s10160_s25  }
  0x1c   : > { %9600 = dma.hbm_to_vmem [thread:$0]  (!%p10277_p6), %s361_s16, 32768, %s363_s19, [#allocation9], %s10161_s26, %s10161_s26, %s10162_s30  }
  0x1d   : > { %s10163_s4 = smov [#allocation11]   ;;  %s412_s9 = sshll.u32 %s11353_s8, 4  ;;  %s413_s9 = int_to_ptr.hbm [resolvable:$true] %s412_s9 }
  0x1e   : > { %s388_s12 = sshll.u32 %s10163_s4, 4  ;;  %s10164_s27 = smov 128   ;;  %s389_s12 = int_to_ptr.vmem [resolvable:$true] %s388_s12 }
  0x1f   : > { %s10165_s13 = smov 8   ;;  %s10166_s16 = smov [#allocation14]  }
  0x20   : > { %s386_s1 = sshll.u32 %s11374_s6, 4  ;;  %s414_s19 = sshll.u32 %s10166_s16, 4  ;;  %s387_s1 = int_to_ptr.hbm [resolvable:$true] %s386_s1  ;;  %s415_s19 = int_to_ptr.vmem [resolvable:$true] %s414_s19 }
  0x21   : > { %9606 = dma.hbm_to_vmem [thread:$0]  (!%p10277_p6), %s387_s1, 32768, %s389_s12, [#allocation12], %s10164_s27, %s10164_s27, %s10165_s13  }
  0x22   : > { %s11375_s2 = sld [smem:[#allocation27_spill]]  ;;  %s375_s15 = sshll.u32 %s11350_s5, 4  ;;  %s376_s15 = int_to_ptr.hbm [resolvable:$true] %s375_s15 }
  0x23   : > { %9612 = dma.hbm_to_vmem [thread:$0]  (!%p10277_p6), %s413_s9, 8192, %s415_s19, [#allocation15], %s10159_s20, %s10159_s20, %s10160_s25  }
  0x24   : > { %s10167_s18 = smov [#allocation7]   ;;  %s10168_s1 = smov [#allocation10]  }
  0x25   : > { %s348_s6 = sshll.u32 %s10167_s18, 4  ;;  %s377_s12 = sshll.u32 %s10168_s1, 4  ;;  %s349_s6 = int_to_ptr.vmem [resolvable:$true] %s348_s6  ;;  %s378_s12 = int_to_ptr.vmem [resolvable:$true] %s377_s12 }
  0x26   : > { %s401_s9 = sshll.u32 %s11352_s7, 4  ;;  %s10169_s19 = smov [#allocation13]   ;;  %s402_s9 = int_to_ptr.hbm [resolvable:$true] %s401_s9 }
  0x27   : > { %9603 = dma.hbm_to_vmem [thread:$0]  (!%p10277_p6), %s376_s15, 256, %s378_s12, [#allocation9]  }
  0x28   : > { %s346_s4 = sshll.u32 %s11375_s2, 4  ;;  %s403_s30 = sshll.u32 %s10169_s19, 4  ;;  %s347_s4 = int_to_ptr.hbm [resolvable:$true] %s346_s4  ;;  %s404_s30 = int_to_ptr.vmem [resolvable:$true] %s403_s30 }
  0x29   : > { %9597 = dma.hbm_to_vmem [thread:$0]  (!%p10277_p6), %s347_s4, 32, %s349_s6, [#allocation6]  }
  0x2a   : > { %s429_s6 = sshll.u32 %s11355_s10, 4  ;;  %s10170_s4 = smov [#allocation16]   ;;  %s430_s6 = int_to_ptr.hbm [resolvable:$true] %s429_s6 }
  0x2b   : > { %9609 = dma.hbm_to_vmem [thread:$0]  (!%p10277_p6), %s402_s9, 32, %s404_s30, [#allocation12]  }
  0x2c   : > { %s431_s11 = sshll.u32 %s10170_s4, 4  ;;  %s6323_s14 = sadd.s32 4294967294, %s10155_s24   ;;  %s432_s11 = int_to_ptr.vmem [resolvable:$true] %s431_s11 }
  0x2d   : > { %9615 = dma.hbm_to_vmem [thread:$0]  (!%p10277_p6), %s430_s6, 8192, %s432_s11, [#allocation15], %s10164_s27, %s10164_s27, %s10165_s13  }
  0x2e   : > { %s10323_s15 = sadd.s32 1, %s10155_s24   ;;  %s39_s1 = sadd.s32 1, %s10151_s23 }
  0x2f   : > { %s36_s18 = ssub.s32 %s10155_s24, %s10323_s15  ;;  %p46_p8 = scmp.ne.s32.totalorder %s10151_s23, %s10147_s22 }
  0x30   : > { %p37_p7 = scmp.eq.s32.totalorder %s36_s18, 0  ;;  %p47_p9 = scmp.eq.s32.totalorder %s10155_s24, 0 }
  0x31   : > { %p52_p10 = scmp.ne.s32.totalorder %s10147_s22, %s10143_s21  ;;  %p307_p13 = scmp.eq.s32.totalorder %s10260_s28, 1 }
  0x32   : > { %s10334_s12 = scalar_select %p37_p7, %s10151_s23, %s39_s1  }
  0x33   : > { %p10336_p11 = por %p47_p9, %p46_p8  ;;  %p10342_p12 = por %p53_p1, %p52_p10 }
  0x34   : > { %p313_p0 = scmp.eq.s32.totalorder %s6323_s14, 1  ;;  %p9632_p2 = scmp.lt.s32.totalorder %s10155_s24, 2 }
  0x35   : > { %s448_s13 = sand.u32 1, %s10151_s23   ;;  %p10349_p4 = por %p307_p13, %p46_p8 }
  0x36   : > { %p10353_p6 = por %p313_p0, %p52_p10  ;;  %s6334_s9 = sshll.u32 %s448_s13, 4 }
  0x37   : > { %s8913_s20 = sshll.u32 %s10155_s24, 4  ;;  %s452_s30 = scalar_lea.vmem [#allocation2], %s6334_s9 }
  0x38   : > { %s457_s19 = scalar_lea.hbm %s11345_s0, %s8913_s20  ;;  %s461_s4 = sshll.u32 %s452_s30, 4  ;;  %s462_s4 = int_to_ptr.vmem [resolvable:$true] %s461_s4 }
  0x39   : > { %s459_s11 = sshll.u32 %s457_s19, 4  ;;  %p10363_p7 = pnand %p9632_p2, %p10336_p11  ;;  %s460_s11 = int_to_ptr.hbm [resolvable:$true] %s459_s11 }
  0x3a   : > { %s449_s18 = scalar_lea.sflag [#allocation3], %s448_s13  ;;  %s10043_s1 = sshra.s32 %s460_s11, 4  ;;  %s10044_s1 = int_to_ptr.hbm [resolvable:$true] %s10043_s1 }
  0x3b   : > { %s10045_s2 = scalar_lea.hbm %s10044_s1, 16  ;;  %p10047_p9 = pneg %p10363_p7 }
  0x3c   : > { %p10046_p8 = scmp.ne.s32.totalorder %s10044_s1, %s10045_s2  ;;  %s10050_s25 = scalar_lea.hbm %s11345_s0, 32 }
  0x3d   : > { %p10051_p11 = scmp.lt.s32.totalorder %s10044_s1, %s11345_s0  ;;  %p10052_p0 = scmp.lt.s32.totalorder %s10050_s25, %s10045_s2 }
  0x3e   : > { %p10048_p10 = pnand %p10047_p9, %p10046_p8 }
  0x3f   : > { %p10053_p2 = por %p10052_p0, %p10051_p11 }
  0x40   : > { %p10049_p13 = pneg %p10048_p10 }
  0x42   : > { %p10054_p5 = pnand %p10053_p2, %p10049_p13 }
  0x44   : > { %10057 = shalt.err (!%p10054_p5)
}
  0x45   : > { %9619 = dma.hbm_to_vmem [thread:$0]  (!%p10363_p7), %s460_s11, 256, %s462_s4, %s449_s18  }
  0x46   : > { %470 = sbr.rel (%p10265_p3) target bundleno = 1637 (0x665), region = 68 }
  0x4b   : > { %s10380_s13 = sand.u32 1, %s10147_s22  }
  0x4c   : > { %s6338_s19 = sshll.u32 %s10380_s13, 4  ;;  %s473_s30 = scalar_lea.sflag [#allocation3], %s10380_s13 }
  0x4d   : > { %s10386_s2 = scalar_lea.vmem [#allocation2], %s6338_s19 }
  0x4e   : > { %10118 = dma.done.wait (%p10342_p12), %s473_s30, 256  }
  0x4f   : > { %10120 = vsyncadd (%p10342_p12), %s473_s30, 4294967040 }
  0x50   : > { %10122 = dma.done.wait (%p53_p1), [#allocation6], 8224  }
  0x51   : > { %10124 = vsyncadd (%p53_p1), [#allocation6], 4294959072 }
  0x52   : > { %10126 = dma.done.wait (%p53_p1), [#allocation9], 33024  }
  0x53   : > { %10128 = vsyncadd (%p53_p1), [#allocation9], 4294934272 }
  0x54   : > { %10130 = dma.done.wait (%p53_p1), [#allocation12], 32800  }
  0x55   : > { %10132 = vsyncadd (%p53_p1), [#allocation12], 4294934496 }
  0x56   : > { %10134 = dma.done.wait (%p53_p1), [#allocation15], 16384  }
  0x57   : > { %10136 = vsyncadd (%p53_p1), [#allocation15], 4294950912  ;;  %v10408_v0 = vld [vmem:[#allocation5 + $0xf8] sm:$0xff]  ;;  %v10412_v2 = vld [vmem:[#allocation5 + $0xe8] sm:$0xff]  ;;  %s11389_s14 = sld [smem:[#allocation30_spill]]  ;;  %s557_s20 = scalar_lea.vmem [#allocation17], %s6338_s19 }
  0x58   : > { %v10410_v1 = vld [vmem:[#allocation5 + $0x1f8] sm:$0xff]  ;;  %664 = vmatpush.msra.mxu2 %v10408_v0  ;;  %v10416_v3 = vld [vmem:[#allocation5 + $0x1e8] sm:$0xff]  ;;  %v10418_v4 = vld [vmem:[#allocation5 + $0xf0] sm:$0xff]  ;;  %s11390_s9 = sld [smem:[#allocation31_spill]]  ;;  %s9554_s25 = sshll.u32 %s10260_s28, 4 }
  0x59   : > { %684 = vmatpush.msra.mxu3 %v10410_v1  ;;  %v10420_v5 = vld [vmem:[#allocation5 + $0x1f0] sm:$0xff]  ;;  %624 = vmatpush.msra.mxu0 %v10418_v4  ;;  %v10424_v6 = vld [vmem:[#allocation5 + $0xd8] sm:$0xff]  ;;  %v10428_v8 = vld [vmem:[#allocation5 + $0xe0] sm:$0xff]  ;;  %s11391_s30 = sld [smem:[#allocation32_spill]]  ;;  %s6174_s29 = sshll.u32 %s557_s20, 4  ;;  %s6175_s29 = int_to_ptr.vmem [resolvable:$true] %s6174_s29 }
  0x5a   : > { %644 = vmatpush.msra.mxu1 %v10420_v5  ;;  %v10426_v7 = vld [vmem:[#allocation5 + $0x1d8] sm:$0xff]  ;;  %665 = vmatpush.msra.mxu2 %v10412_v2  ;;  %v10432_v9 = vld [vmem:[#allocation5 + $0x1e0] sm:$0xff]  ;;  %v10434_v10 = vld [vmem:[#allocation5 + $0xc8] sm:$0xff]  ;;  %s6161_s19 = scalar_lea.sflag [#allocation4], %s10380_s13 }
  0x5b   : > { %685 = vmatpush.msra.mxu3 %v10416_v3  ;;  %625 = vmatpush.msra.mxu0 %v10428_v8  ;;  %v10438_v11 = vld [vmem:[#allocation5 + $0x1c8] sm:$0xff]  ;;  %v10440_v12 = vld [vmem:[#allocation5 + $0xd0] sm:$0xff]  ;;  %v10446_v14 = vld [vmem:[#allocation5 + $0xc0] sm:$0xff] }
  0x5c   : > { %645 = vmatpush.msra.mxu1 %v10432_v9  ;;  %v10442_v13 = vld [vmem:[#allocation5 + $0x1d0] sm:$0xff]  ;;  %666 = vmatpush.msra.mxu2 %v10424_v6  ;;  %v10448_v15 = vld [vmem:[#allocation5 + $0x1c0] sm:$0xff]  ;;  %v10452_v16 = vld [vmem:[#allocation5 + $0xb8] sm:$0xff] }
  0x5d   : > { %686 = vmatpush.msra.mxu3 %v10426_v7  ;;  %626 = vmatpush.msra.mxu0 %v10440_v12  ;;  %v10454_v17 = vld [vmem:[#allocation5 + $0x1b8] sm:$0xff]  ;;  %v10458_v18 = vld [vmem:[#allocation5 + $0xb0] sm:$0xff]  ;;  %v10464_v20 = vld [vmem:[#allocation5 + $0xa8] sm:$0xff] }
  0x5e   : > { %646 = vmatpush.msra.mxu1 %v10442_v13  ;;  %667 = vmatpush.msra.mxu2 %v10434_v10  ;;  %v10460_v19 = vld [vmem:[#allocation5 + $0x1b0] sm:$0xff]  ;;  %v10466_v21 = vld [vmem:[#allocation5 + $0x1a8] sm:$0xff]  ;;  %v10470_v22 = vld [vmem:[#allocation5 + $0xa0] sm:$0xff] }
  0x5f   : > { %687 = vmatpush.msra.mxu3 %v10438_v11  ;;  %627 = vmatpush.msra.mxu0 %v10446_v14  ;;  %v10472_v23 = vld [vmem:[#allocation5 + $0x1a0] sm:$0xff]  ;;  %v10476_v24 = vld [vmem:[#allocation5 + $0x98] sm:$0xff]  ;;  %v10482_v26 = vld [vmem:[#allocation5 + $0x90] sm:$0xff]  ;;  %s10093_s18 = scalar_lea.hbm %s11391_s30, 32 }
  0x60   : > { %647 = vmatpush.msra.mxu1 %v10448_v15  ;;  %668 = vmatpush.msra.mxu2 %v10452_v16  ;;  %v10478_v25 = vld [vmem:[#allocation5 + $0x198] sm:$0xff]  ;;  %v10484_v27 = vld [vmem:[#allocation5 + $0x190] sm:$0xff]  ;;  %v10488_v28 = vld [vmem:[#allocation5 + $0x88] sm:$0xff] }
  0x61   : > { %688 = vmatpush.msra.mxu3 %v10454_v17  ;;  %628 = vmatpush.msra.mxu0 %v10458_v18  ;;  %v10490_v29 = vld [vmem:[#allocation5 + $0x188] sm:$0xff]  ;;  %v10494_v30 = vld [vmem:[#allocation5 + $0x80] sm:$0xff]  ;;  %v10500_v32 = vld [vmem:[#allocation5 + $0x78] sm:$0xff] }
  0x62   : > { %648 = vmatpush.msra.mxu1 %v10460_v19  ;;  %669 = vmatpush.msra.mxu2 %v10464_v20  ;;  %v10496_v31 = vld [vmem:[#allocation5 + $0x180] sm:$0xff]  ;;  %v10502_v33 = vld [vmem:[#allocation5 + $0x178] sm:$0xff]  ;;  %v10506_v34 = vld [vmem:[#allocation5 + $0x70] sm:$0xff] }
  0x63   : > { %689 = vmatpush.msra.mxu3 %v10466_v21  ;;  %629 = vmatpush.msra.mxu0 %v10470_v22  ;;  %v10508_v35 = vld [vmem:[#allocation5 + $0x170] sm:$0xff]  ;;  %v10512_v36 = vld [vmem:[#allocation5 + $0x68] sm:$0xff]  ;;  %v10518_v38 = vld [vmem:[#allocation5 + $0x60] sm:$0xff] }
  0x64   : > { %649 = vmatpush.msra.mxu1 %v10472_v23  ;;  %670 = vmatpush.msra.mxu2 %v10476_v24  ;;  %v10514_v37 = vld [vmem:[#allocation5 + $0x168] sm:$0xff]  ;;  %v10520_v39 = vld [vmem:[#allocation5 + $0x160] sm:$0xff]  ;;  %v10524_v40 = vld [vmem:[#allocation5 + $0x58] sm:$0xff] }
  0x65   : > { %690 = vmatpush.msra.mxu3 %v10478_v25  ;;  %630 = vmatpush.msra.mxu0 %v10482_v26  ;;  %v10526_v41 = vld [vmem:[#allocation5 + $0x158] sm:$0xff]  ;;  %v10530_v42 = vld [vmem:[#allocation5 + $0x50] sm:$0xff]  ;;  %v10536_v44 = vld [vmem:[#allocation5 + $0x48] sm:$0xff] }
  0x66   : > { %650 = vmatpush.msra.mxu1 %v10484_v27  ;;  %671 = vmatpush.msra.mxu2 %v10488_v28  ;;  %v10532_v43 = vld [vmem:[#allocation5 + $0x150] sm:$0xff]  ;;  %v10538_v45 = vld [vmem:[#allocation5 + $0x148] sm:$0xff]  ;;  %v10542_v46 = vld [vmem:[#allocation5 + $0x40] sm:$0xff] }
  0x67   : > { %691 = vmatpush.msra.mxu3 %v10490_v29  ;;  %631 = vmatpush.msra.mxu0 %v10494_v30  ;;  %v10544_v47 = vld [vmem:[#allocation5 + $0x140] sm:$0xff]  ;;  %v10548_v48 = vld [vmem:[#allocation5 + $0x38] sm:$0xff]  ;;  %v10554_v50 = vld [vmem:[#allocation5 + $0x30] sm:$0xff] }
  0x68   : > { %651 = vmatpush.msra.mxu1 %v10496_v31  ;;  %672 = vmatpush.msra.mxu2 %v10500_v32  ;;  %v10550_v49 = vld [vmem:[#allocation5 + $0x138] sm:$0xff]  ;;  %v10556_v51 = vld [vmem:[#allocation5 + $0x130] sm:$0xff]  ;;  %v10560_v52 = vld [vmem:[#allocation5 + $0x28] sm:$0xff] }
  0x69   : > { %692 = vmatpush.msra.mxu3 %v10502_v33  ;;  %632 = vmatpush.msra.mxu0 %v10506_v34  ;;  %11381 = vst [vmem:[#allocation24_spill] sm:$0xff] %v10560_v52  ;;  %v10562_v53 = vld [vmem:[#allocation5 + $0x128] sm:$0xff]  ;;  %v10566_v54 = vld [vmem:[#allocation5 + $0x20] sm:$0xff]  ;;  %v10572_v56 = vld [vmem:[#allocation5 + $0x18] sm:$0xff] }
  0x6a   : > { %652 = vmatpush.msra.mxu1 %v10508_v35  ;;  %673 = vmatpush.msra.mxu2 %v10512_v36  ;;  %11382 = vst [vmem:[#allocation25_spill] sm:$0xff] %v10562_v53  ;;  %v10568_v55 = vld [vmem:[#allocation5 + $0x120] sm:$0xff]  ;;  %v10574_v57 = vld [vmem:[#allocation5 + $0x118] sm:$0xff]  ;;  %v10578_v58 = vld [vmem:[#allocation5 + $0x10] sm:$0xff] }
  0x6b   : > { %693 = vmatpush.msra.mxu3 %v10514_v37  ;;  %633 = vmatpush.msra.mxu0 %v10518_v38  ;;  %v10580_v59 = vld [vmem:[#allocation5 + $0x110] sm:$0xff]  ;;  %v10584_v60 = vld [vmem:[#allocation5 + $0x8] sm:$0xff] }
  0x6c   : > { %653 = vmatpush.msra.mxu1 %v10520_v39  ;;  %674 = vmatpush.msra.mxu2 %v10524_v40  ;;  %v10586_v61 = vld [vmem:[#allocation5 + $0x108] sm:$0xff]  ;;  %v10591_v62 = vld [vmem:[%s10386_s2] sm:$0xff] }
  0x6d   : > { %694 = vmatpush.msra.mxu3 %v10526_v41  ;;  %634 = vmatpush.msra.mxu0 %v10530_v42  ;;  %v10594_v63 = vld [vmem:[%s10386_s2 + $0x8] sm:$0xff] }
  0x6e   : > { %654 = vmatpush.msra.mxu1 %v10532_v43  ;;  %675 = vmatpush.msra.mxu2 %v10536_v44 }
  0x6f   : > { %695 = vmatpush.msra.mxu3 %v10538_v45  ;;  %635 = vmatpush.msra.mxu0 %v10542_v46 }
  0x70   : > { %655 = vmatpush.msra.mxu1 %v10544_v47  ;;  %676 = vmatpush.msra.mxu2 %v10548_v48 }
  0x71   : > { %696 = vmatpush.msra.mxu3 %v10550_v49  ;;  %636 = vmatpush.msra.mxu0 %v10554_v50 }
  0x72   : > { %656 = vmatpush.msra.mxu1 %v10556_v51  ;;  %677 = vmatpush.msra.mxu2 %v10560_v52  ;;  %v10600_v52 = vld [vmem:[#allocation5 + $0x100] sm:$0xff] }
  0x73   : > { %697 = vmatpush.msra.mxu3 %v10562_v53  ;;  %637 = vmatpush.msra.mxu0 %v10566_v54  ;;  %v10598_v53 = vld [vmem:[#allocation5] sm:$0xff] }
  0x74   : > { %657 = vmatpush.msra.mxu1 %v10568_v55  ;;  %678 = vmatpush.msra.mxu2 %v10572_v56 }
  0x75   : > { %698 = vmatpush.msra.mxu3 %v10574_v57  ;;  %638 = vmatpush.msra.mxu0 %v10578_v58 }
  0x76   : > { %658 = vmatpush.msra.mxu1 %v10580_v59  ;;  %679 = vmatpush.msra.mxu2 %v10584_v60 }
  0x77   : > { %699 = vmatpush.msra.mxu3 %v10586_v61  ;;  %680 = vmatmul.f32.vlgmr.msra.gmra.mxu2 %v10591_v62 }
  0x78   : > { %700 = vmatmul.f32.vlgmr.msra.gmra.mxu3 %v10594_v63  ;;  %639 = vmatpush.msra.mxu0 %v10598_v53 }
  0x79   : > { %659 = vmatpush.msra.mxu1 %v10600_v52  ;;  %640 = vmatmul.f32.vlgmr.msra.gmra.mxu0 %v10591_v62 }
  0x7a   : > { %660 = vmatmul.f32.vlgmr.msra.gmra.mxu1 %v10594_v63  ;;  %708 = vmatpush.msrb.mxu0 %v10418_v4  ;;  %v9026_v4 = vld [vmem:[#allocation8 + $0x384] sm:$0xf] }
  0x7b   : > { %748 = vmatpush.msrb.mxu2 %v10408_v0  ;;  %728 = vmatpush.msrb.mxu1 %v10420_v5  ;;  %v11383_v0 = vld [vmem:[#allocation24_spill] sm:$0xff] }
  0x7c   : > { %768 = vmatpush.msrb.mxu3 %v10410_v1  ;;  %709 = vmatpush.msrb.mxu0 %v10428_v8  ;;  %v11384_v1 = vld [vmem:[#allocation25_spill] sm:$0xff] }
  0x7d   : > { %749 = vmatpush.msrb.mxu2 %v10412_v2  ;;  %729 = vmatpush.msrb.mxu1 %v10432_v9  ;;  %v6798_v2 = vld [vmem:[#allocation8 + $0x380] sm:$0xf] }
  0x7e   : > { %769 = vmatpush.msrb.mxu3 %v10416_v3  ;;  %710 = vmatpush.msrb.mxu0 %v10440_v12  ;;  %v9034_v3 = vld [vmem:[#allocation8 + $0x3bc] sm:$0xf0] }
  0x7f   : > { %750 = vmatpush.msrb.mxu2 %v10424_v6  ;;  %730 = vmatpush.msrb.mxu1 %v10442_v13  ;;  %v6799_v5 = vor.u32 %v9034_v3, %v6798_v2  ;;  %v6800_v6 = vld [vmem:[#allocation8 + $0x3c0] sm:$0xf0]  ;;  %v9018_v8 = vld [vmem:[#allocation8 + $0x33c] sm:$0xf0] }
  0x80   : > { %770 = vmatpush.msrb.mxu3 %v10426_v7  ;;  %711 = vmatpush.msrb.mxu0 %v10446_v14  ;;  %v6734_v7 = vld [vmem:[#allocation8 + $0x300] sm:$0xf]  ;;  %v6803_v9 = vor.u32 %v9026_v4, %v6800_v6 }
  0x81   : > { %751 = vmatpush.msrb.mxu2 %v10434_v10  ;;  %731 = vmatpush.msrb.mxu1 %v10448_v15  ;;  %v9010_v10 = vld [vmem:[#allocation8 + $0x304] sm:$0xf]  ;;  %v7310_v12 = vld [vmem:[#allocation8 + $0x780] sm:$0xf]  ;;  %v6735_v13 = vor.u32 %v9018_v8, %v6734_v7 }
  0x82   : > { %771 = vmatpush.msrb.mxu3 %v10438_v11  ;;  %712 = vmatpush.msrb.mxu0 %v10458_v18  ;;  %v6736_v11 = vld [vmem:[#allocation8 + $0x340] sm:$0xf0]  ;;  %v9162_v14 = vld [vmem:[#allocation8 + $0x7bc] sm:$0xf0] }
  0x83   : > { %752 = vmatpush.msrb.mxu2 %v10452_v16  ;;  %732 = vmatpush.msrb.mxu1 %v10460_v19  ;;  %v9154_v15 = vld [vmem:[#allocation8 + $0x784] sm:$0xf]  ;;  %v7311_v18 = vor.u32 %v9162_v14, %v7310_v12  ;;  %v6990_v4 = vld [vmem:[#allocation8 + $0x500] sm:$0xf] }
  0x84   : > { %772 = vmatpush.msrb.mxu3 %v10454_v17  ;;  %713 = vmatpush.msrb.mxu0 %v10470_v22  ;;  %v7312_v16 = vld [vmem:[#allocation8 + $0x7c0] sm:$0xf0]  ;;  %v6739_v17 = vor.u32 %v9010_v10, %v6736_v11  ;;  %v9082_v6 = vld [vmem:[#allocation8 + $0x53c] sm:$0xf0] }
  0x85   : > { %753 = vmatpush.msrb.mxu2 %v10464_v20  ;;  %733 = vmatpush.msrb.mxu1 %v10472_v23  ;;  %v7315_v19 = vor.u32 %v9154_v15, %v7312_v16  ;;  %v6670_v20 = vld [vmem:[#allocation8 + $0x280] sm:$0xf]  ;;  %v8994_v22 = vld [vmem:[#allocation8 + $0x284] sm:$0xf] }
  0x86   : > { %773 = vmatpush.msrb.mxu3 %v10466_v21  ;;  %714 = vmatpush.msrb.mxu0 %v10482_v26  ;;  %v9002_v21 = vld [vmem:[#allocation8 + $0x2bc] sm:$0xf0]  ;;  %v6672_v23 = vld [vmem:[#allocation8 + $0x2c0] sm:$0xf0] }
  0x87   : > { %754 = vmatpush.msrb.mxu2 %v10476_v24  ;;  %734 = vmatpush.msrb.mxu1 %v10484_v27  ;;  %v7246_v24 = vld [vmem:[#allocation8 + $0x700] sm:$0xf]  ;;  %v9138_v27 = vld [vmem:[#allocation8 + $0x704] sm:$0xf] }
  0x88   : > { %774 = vmatpush.msrb.mxu3 %v10478_v25  ;;  %715 = vmatpush.msrb.mxu0 %v10494_v30  ;;  %v9146_v25 = vld [vmem:[#allocation8 + $0x73c] sm:$0xf0]  ;;  %v9074_v7 = vld [vmem:[#allocation8 + $0x504] sm:$0xf] }
  0x89   : > { %755 = vmatpush.msrb.mxu2 %v10488_v28  ;;  %735 = vmatpush.msrb.mxu1 %v10496_v31  ;;  %v7247_v26 = vor.u32 %v9146_v25, %v7246_v24  ;;  %v7248_v28 = vld [vmem:[#allocation8 + $0x740] sm:$0xf0]  ;;  %v6606_v31 = vld [vmem:[#allocation8 + $0x200] sm:$0xf] }
  0x8a   : > { %775 = vmatpush.msrb.mxu3 %v10490_v29  ;;  %716 = vmatpush.msrb.mxu0 %v10506_v34  ;;  %v6671_v29 = vor.u32 %v9002_v21, %v6670_v20  ;;  %v7251_v30 = vor.u32 %v9138_v27, %v7248_v28  ;;  %v7182_v34 = vld [vmem:[#allocation8 + $0x680] sm:$0xf]  ;;  %v6992_v8 = vld [vmem:[#allocation8 + $0x540] sm:$0xf0] }
  0x8b   : > { %756 = vmatpush.msrb.mxu2 %v10500_v32  ;;  %736 = vmatpush.msrb.mxu1 %v10508_v35  ;;  %v8986_v32 = vld [vmem:[#allocation8 + $0x23c] sm:$0xf0]  ;;  %v8930_v15 = vld [vmem:[#allocation8 + $0x84] sm:$0xf] }
  0x8c   : > { %776 = vmatpush.msrb.mxu3 %v10502_v33  ;;  %717 = vmatpush.msrb.mxu0 %v10518_v38  ;;  %v6675_v33 = vor.u32 %v8994_v22, %v6672_v23  ;;  %v9130_v35 = vld [vmem:[#allocation8 + $0x6bc] sm:$0xf0]  ;;  %v6608_v38 = vld [vmem:[#allocation8 + $0x240] sm:$0xf0] }
  0x8d   : > { %757 = vmatpush.msrb.mxu2 %v10512_v36  ;;  %737 = vmatpush.msrb.mxu1 %v10520_v39  ;;  %v9122_v36 = vld [vmem:[#allocation8 + $0x684] sm:$0xf]  ;;  %v6414_v10 = vld [vmem:[#allocation8 + $0x80] sm:$0xf] }
  0x8e   : > { %777 = vmatpush.msrb.mxu3 %v10514_v37  ;;  %718 = vmatpush.msrb.mxu0 %v10530_v42  ;;  %v8978_v37 = vld [vmem:[#allocation8 + $0x204] sm:$0xf]  ;;  %v7118_v42 = vld [vmem:[#allocation8 + $0x600] sm:$0xf] }
  0x8f   : > { %758 = vmatpush.msrb.mxu2 %v10524_v40  ;;  %738 = vmatpush.msrb.mxu1 %v10532_v43  ;;  %v7184_v39 = vld [vmem:[#allocation8 + $0x6c0] sm:$0xf0]  ;;  %v7183_v40 = vor.u32 %v9130_v35, %v7182_v34  ;;  %v6607_v43 = vor.u32 %v8986_v32, %v6606_v31  ;;  %v8938_v11 = vld [vmem:[#allocation8 + $0xbc] sm:$0xf0]  ;;  %v6806_v32 = vld [vmem:[#allocation8 + $0x388] sm:$0xf] }
  0x90   : > { %778 = vmatpush.msrb.mxu3 %v10526_v41  ;;  %719 = vmatpush.msrb.mxu0 %v10542_v46  ;;  %v7187_v41 = vor.u32 %v9122_v36, %v7184_v39  ;;  %v7120_v46 = vld [vmem:[#allocation8 + $0x640] sm:$0xf0]  ;;  %v6350_v27 = vld [vmem:[#allocation8] sm:$0xf]  ;;  %v9027_v36 = vld [vmem:[#allocation8 + $0x38c] sm:$0xf] }
  0x91   : > { %759 = vmatpush.msrb.mxu2 %v10536_v44  ;;  %739 = vmatpush.msrb.mxu1 %v10544_v47  ;;  %v9114_v44 = vld [vmem:[#allocation8 + $0x63c] sm:$0xf0]  ;;  %v6611_v47 = vor.u32 %v8978_v37, %v6608_v38  ;;  %v6416_v16 = vld [vmem:[#allocation8 + $0xc0] sm:$0xf0] }
  0x92   : > { %779 = vmatpush.msrb.mxu3 %v10538_v45  ;;  %720 = vmatpush.msrb.mxu0 %v10554_v50  ;;  %v9106_v45 = vld [vmem:[#allocation8 + $0x604] sm:$0xf]  ;;  %v6419_v23 = vor.u32 %v8930_v15, %v6416_v16  ;;  %v8922_v28 = vld [vmem:[#allocation8 + $0x3c] sm:$0xf0]  ;;  %v6616_v16 = vld [vmem:[#allocation8 + $0x248] sm:$0xf0] }
  0x93   : > { %760 = vmatpush.msrb.mxu2 %v10548_v48  ;;  %740 = vmatpush.msrb.mxu1 %v10556_v51  ;;  %v6542_v48 = vld [vmem:[#allocation8 + $0x180] sm:$0xf]  ;;  %v8962_v50 = vld [vmem:[#allocation8 + $0x184] sm:$0xf] }
  0x94   : > { %780 = vmatpush.msrb.mxu3 %v10550_v49  ;;  %721 = vmatpush.msrb.mxu0 %v10566_v54  ;;  %v8970_v49 = vld [vmem:[#allocation8 + $0x1bc] sm:$0xf0]  ;;  %v6544_v51 = vld [vmem:[#allocation8 + $0x1c0] sm:$0xf0] }
  0x95   : > { %761 = vmatpush.msrb.mxu2 %v11383_v0  ;;  %741 = vmatpush.msrb.mxu1 %v10568_v55  ;;  %v7054_v54 = vld [vmem:[#allocation8 + $0x580] sm:$0xf]  ;;  %v6543_v55 = vor.u32 %v8970_v49, %v6542_v48  ;;  %v8946_v0 = vld [vmem:[#allocation8 + $0x104] sm:$0xf]  ;;  %v6744_v48 = vld [vmem:[#allocation8 + $0x348] sm:$0xf0] }
  0x96   : > { %781 = vmatpush.msrb.mxu3 %v11384_v1  ;;  %722 = vmatpush.msrb.mxu0 %v10578_v58  ;;  %v7056_v58 = vld [vmem:[#allocation8 + $0x5c0] sm:$0xf0]  ;;  %v6926_v37 = vld [vmem:[#allocation8 + $0x480] sm:$0xf] }
  0x97   : > { %762 = vmatpush.msrb.mxu2 %v10572_v56  ;;  %742 = vmatpush.msrb.mxu1 %v10580_v59  ;;  %v9098_v56 = vld [vmem:[#allocation8 + $0x5bc] sm:$0xf0]  ;;  %v6547_v59 = vor.u32 %v8962_v50, %v6544_v51  ;;  %v6480_v1 = vld [vmem:[#allocation8 + $0x140] sm:$0xf0] }
  0x98   : > { %782 = vmatpush.msrb.mxu3 %v10574_v57  ;;  %723 = vmatpush.msrb.mxu0 %v10598_v53  ;;  %v7123_v53 = vor.u32 %v9106_v45, %v7120_v46  ;;  %v9090_v57 = vld [vmem:[#allocation8 + $0x584] sm:$0xf]  ;;  %v7055_v2 = vor.u32 %v9098_v56, %v7054_v54  ;;  %v9066_v39 = vld [vmem:[#allocation8 + $0x4bc] sm:$0xf0]  ;;  %v9019_v45 = vld [vmem:[#allocation8 + $0x344] sm:$0xf0] }
  0x99   : > { %763 = vmatpush.msrb.mxu2 %v10584_v60  ;;  %743 = vmatpush.msrb.mxu1 %v10600_v52  ;;  %v7119_v52 = vor.u32 %v9114_v44, %v7118_v42  ;;  %v6478_v60 = vld [vmem:[#allocation8 + $0x100] sm:$0xf]  ;;  %v7059_v3 = vor.u32 %v9090_v57, %v7056_v58  ;;  %v6352_v31 = vld [vmem:[#allocation8 + $0x40] sm:$0xf0]  ;;  %v6927_v42 = vor.u32 %v9066_v39, %v6926_v37  ;;  %v6742_v44 = vld [vmem:[#allocation8 + $0x308] sm:$0xf] }
  0x9a   : > { %783 = vmatpush.msrb.mxu3 %v10586_v61  ;;  %2400 = vmatpush.bf16.msra.mxu0 %v6799_v5  ;;  %v8954_v61 = vld [vmem:[#allocation8 + $0x13c] sm:$0xf0]  ;;  %v9011_v46 = vld [vmem:[#allocation8 + $0x30c] sm:$0xf]  ;;  %v6864_v54 = vld [vmem:[#allocation8 + $0x440] sm:$0xf0] }
  0x9b   : > { %2426 = vmatpush.bf16.msra.mxu2 %v6803_v9  ;;  %2413 = vmatpush.bf16.msra.mxu1 %v7311_v18  ;;  %v6479_v5 = vor.u32 %v8954_v61, %v6478_v60  ;;  %v6483_v9 = vor.u32 %v8946_v0, %v6480_v1  ;;  %v6995_v18 = vor.u32 %v9074_v7, %v6992_v8  ;;  %v6862_v49 = vld [vmem:[#allocation8 + $0x400] sm:$0xf]  ;;  %v9163_v57 = vld [vmem:[#allocation8 + $0x7c4] sm:$0xf0]  ;;  %v9155_v58 = vld [vmem:[#allocation8 + $0x78c] sm:$0xf] }
  0x9c   : > { %2439 = vmatpush.bf16.msra.mxu3 %v7315_v19  ;;  %v6415_v19 = vor.u32 %v8938_v11, %v6414_v10  ;;  %v9050_v50 = vld [vmem:[#allocation8 + $0x43c] sm:$0xf0]  ;;  %v6747_v51 = vor.u32 %v9011_v46, %v6744_v48  ;;  %v6678_v0 = vld [vmem:[#allocation8 + $0x288] sm:$0xf]  ;;  %v9139_v8 = vld [vmem:[#allocation8 + $0x70c] sm:$0xf] }
  0x9d   : > { %v9003_v1 = vld [vmem:[#allocation8 + $0x2c4] sm:$0xf0]  ;;  %v7256_v10 = vld [vmem:[#allocation8 + $0x748] sm:$0xf0] }
  0x9e   : > { %2401 = vmatpush.bf16.msra.mxu0 %v6735_v13  ;;  %v9147_v7 = vld [vmem:[#allocation8 + $0x744] sm:$0xf0]  ;;  %v7259_v11 = vor.u32 %v9139_v8, %v7256_v10  ;;  %v7064_v46 = vld [vmem:[#allocation8 + $0x5c8] sm:$0xf0] }
  0x9f   : > { %2427 = vmatpush.bf16.msra.mxu2 %v6739_v17  ;;  %2414 = vmatpush.bf16.msra.mxu1 %v7247_v26  ;;  %v6991_v17 = vor.u32 %v9082_v6, %v6990_v4  ;;  %v6680_v4 = vld [vmem:[#allocation8 + $0x2c8] sm:$0xf0]  ;;  %v7254_v6 = vld [vmem:[#allocation8 + $0x708] sm:$0xf] }
  0xa0   : > { %2440 = vmatpush.bf16.msra.mxu3 %v7251_v30  ;;  %v6351_v30 = vor.u32 %v8922_v28, %v6350_v27  ;;  %v8963_v27 = vld [vmem:[#allocation8 + $0x18c] sm:$0xf]  ;;  %v8955_v37 = vld [vmem:[#allocation8 + $0x144] sm:$0xf0] }
  0xa1   : > { %v6422_v48 = vld [vmem:[#allocation8 + $0x88] sm:$0xf]  ;;  %v6936_v10 = vld [vmem:[#allocation8 + $0x4c8] sm:$0xf0] }
  0xa2   : > { %2402 = vmatpush.bf16.msra.mxu0 %v6671_v29  ;;  %v8914_v29 = vld [vmem:[#allocation8 + $0x4] sm:$0xf] }
  0xa3   : > { %2428 = vmatpush.bf16.msra.mxu2 %v6675_v33  ;;  %2415 = vmatpush.bf16.msra.mxu1 %v7183_v40  ;;  %v9035_v33 = vld [vmem:[#allocation8 + $0x3c4] sm:$0xf0]  ;;  %v6355_v34 = vor.u32 %v8914_v29, %v6352_v31  ;;  %v9058_v40 = vld [vmem:[#allocation8 + $0x484] sm:$0xf]  ;;  %v6552_v29 = vld [vmem:[#allocation8 + $0x1c8] sm:$0xf0] }
  0xa4   : > { %2441 = vmatpush.bf16.msra.mxu3 %v7187_v41  ;;  %v6807_v35 = vor.u32 %v9035_v33, %v6806_v32  ;;  %v6928_v41 = vld [vmem:[#allocation8 + $0x4c0] sm:$0xf0]  ;;  %v7126_v31 = vld [vmem:[#allocation8 + $0x608] sm:$0xf]  ;;  %v9107_v33 = vld [vmem:[#allocation8 + $0x60c] sm:$0xf] }
  0xa5   : > { %v9115_v32 = vld [vmem:[#allocation8 + $0x644] sm:$0xf0] }
  0xa6   : > { %2403 = vmatpush.bf16.msra.mxu0 %v6607_v43  ;;  %v6931_v43 = vor.u32 %v9058_v40, %v6928_v41  ;;  %v6488_v40 = vld [vmem:[#allocation8 + $0x148] sm:$0xf0] }
  0xa7   : > { %2429 = vmatpush.bf16.msra.mxu2 %v6611_v47  ;;  %2416 = vmatpush.bf16.msra.mxu1 %v7119_v52  ;;  %v6743_v47 = vor.u32 %v9019_v45, %v6742_v44  ;;  %v6863_v52 = vor.u32 %v9050_v50, %v6862_v49  ;;  %v9091_v44 = vld [vmem:[#allocation8 + $0x58c] sm:$0xf]  ;;  %v8939_v49 = vld [vmem:[#allocation8 + $0xc4] sm:$0xf0] }
  0xa8   : > { %2442 = vmatpush.bf16.msra.mxu3 %v7123_v53  ;;  %v9042_v53 = vld [vmem:[#allocation8 + $0x404] sm:$0xf]  ;;  %v6423_v50 = vor.u32 %v8939_v49, %v6422_v48 }
  0xa9   : > { %v6867_v56 = vor.u32 %v9042_v53, %v6864_v54  ;;  %v6998_v54 = vld [vmem:[#allocation8 + $0x508] sm:$0xf] }
  0xaa   : > { %2404 = vmatpush.bf16.msra.mxu0 %v6543_v55  ;;  %v7318_v55 = vld [vmem:[#allocation8 + $0x788] sm:$0xf] }
  0xab   : > { %2430 = vmatpush.bf16.msra.mxu2 %v6547_v59  ;;  %2417 = vmatpush.bf16.msra.mxu1 %v7055_v2  ;;  %v7320_v59 = vld [vmem:[#allocation8 + $0x7c8] sm:$0xf0]  ;;  %v7319_v60 = vor.u32 %v9163_v57, %v7318_v55  ;;  %v9083_v55 = vld [vmem:[#allocation8 + $0x544] sm:$0xf0] }
  0xac   : > { %2443 = vmatpush.bf16.msra.mxu3 %v7059_v3  ;;  %v7323_v61 = vor.u32 %v9155_v58, %v7320_v59  ;;  %v8995_v2 = vld [vmem:[#allocation8 + $0x28c] sm:$0xf]  ;;  %v6679_v3 = vor.u32 %v9003_v1, %v6678_v0 }
  0xad   : > { %v9075_v57 = vld [vmem:[#allocation8 + $0x50c] sm:$0xf] }
  0xae   : > { %2405 = vmatpush.bf16.msra.mxu0 %v6479_v5  ;;  %v6683_v5 = vor.u32 %v8995_v2, %v6680_v4  ;;  %v7000_v58 = vld [vmem:[#allocation8 + $0x548] sm:$0xf0] }
  0xaf   : > { %2431 = vmatpush.bf16.msra.mxu2 %v6483_v9  ;;  %2418 = vmatpush.bf16.msra.mxu1 %v6991_v17  ;;  %v7255_v9 = vor.u32 %v9147_v7, %v7254_v6  ;;  %v7003_v59 = vor.u32 %v9075_v57, %v7000_v58  ;;  %v8915_v0 = vld [vmem:[#allocation8 + $0xc] sm:$0xf]  ;;  %v9067_v6 = vld [vmem:[#allocation8 + $0x4c4] sm:$0xf0]  ;;  %v6752_v57 = vld [vmem:[#allocation8 + $0x350] sm:$0xf0] }
  0xb0   : > { %2444 = vmatpush.bf16.msra.mxu3 %v6995_v18  ;;  %v7190_v18 = vld [vmem:[#allocation8 + $0x688] sm:$0xf]  ;;  %v6360_v2 = vld [vmem:[#allocation8 + $0x48] sm:$0xf0]  ;;  %v7326_v58 = vld [vmem:[#allocation8 + $0x790] sm:$0xf] }
  0xb1   : > { %v9059_v7 = vld [vmem:[#allocation8 + $0x48c] sm:$0xf] }
  0xb2   : > { %2406 = vmatpush.bf16.msra.mxu0 %v6415_v19  ;;  %v9131_v19 = vld [vmem:[#allocation8 + $0x6c4] sm:$0xf0] }
  0xb3   : > { %2432 = vmatpush.bf16.msra.mxu2 %v6419_v23  ;;  %2419 = vmatpush.bf16.msra.mxu1 %v6927_v42  ;;  %v7192_v23 = vld [vmem:[#allocation8 + $0x6c8] sm:$0xf0]  ;;  %v7062_v42 = vld [vmem:[#allocation8 + $0x588] sm:$0xf] }
  0xb4   : > { %2445 = vmatpush.bf16.msra.mxu3 %v6931_v43  ;;  %v9099_v43 = vld [vmem:[#allocation8 + $0x5c4] sm:$0xf0] }
  0xb5   : > { %v7063_v45 = vor.u32 %v9099_v43, %v7062_v42  ;;  %v9036_v43 = vld [vmem:[#allocation8 + $0x3cc] sm:$0xf0] }
  0xb6   : > { %2407 = vmatpush.bf16.msra.mxu0 %v6351_v30  ;;  %v6555_v30 = vor.u32 %v8963_v27, %v6552_v29 }
  0xb7   : > { %2433 = vmatpush.bf16.msra.mxu2 %v6355_v34  ;;  %2420 = vmatpush.bf16.msra.mxu1 %v6863_v52  ;;  %v7127_v34 = vor.u32 %v9115_v32, %v7126_v31  ;;  %v6424_v52 = vld [vmem:[#allocation8 + $0xc8] sm:$0xf0]  ;;  %v810_v31 = vld [vmem:[#allocation7] sm:$0x3] }
  0xb8   : > { %2446 = vmatpush.bf16.msra.mxu3 %v6867_v56  ;;  %v6999_v56 = vor.u32 %v9083_v55, %v6998_v54  ;;  %v813_v48 = vperm.slane %v810_v31, 1  ;;  %v9020_v55 = vld [vmem:[#allocation8 + $0x34c] sm:$0xf0] }
  0xf6   : > { %v641_v12 = vpop.f32.mrf.mxu0 }
  0xf7   : > { %v661_v13 = vpop.f32.mrf.mxu1 }
  0xf8   : > { %v662_v14 = vadd.f32 %v661_v13, %v641_v12  ;;  %v6614_v12 = vld [vmem:[#allocation8 + $0x208] sm:$0xf] }
  0xf9   : > { %v8987_v13 = vld [vmem:[#allocation8 + $0x244] sm:$0xf0] }
  0xfa   : > { %v10675_v20 = vsub.f32 %v10591_v62, %v662_v14  ;;  %v681_v21 = vpop.f32.mrf.mxu2  ;;  %v8979_v14 = vld [vmem:[#allocation8 + $0x20c] sm:$0xf]  ;;  %v6615_v15 = vor.u32 %v8987_v13, %v6614_v12  ;;  %v6870_v13 = vld [vmem:[#allocation8 + $0x408] sm:$0xf] }
  0xfb   : > { %v701_v22 = vpop.f32.mrf.mxu3  ;;  %v6619_v17 = vor.u32 %v8979_v14, %v6616_v16  ;;  %v9051_v14 = vld [vmem:[#allocation8 + $0x444] sm:$0xf0] }
  0xfc   : > { %v702_v24 = vadd.f32 %v701_v22, %v681_v21  ;;  %v706_v25 = vmul.f32 %v10675_v20, %v10675_v20  ;;  %v9123_v21 = vld [vmem:[#allocation8 + $0x68c] sm:$0xf]  ;;  %v7191_v22 = vor.u32 %v9131_v19, %v7190_v18  ;;  %v6871_v16 = vor.u32 %v9051_v14, %v6870_v13  ;;  %v7264_v13 = vld [vmem:[#allocation8 + $0x750] sm:$0xf0] }
  0xfd   : > { %v6872_v18 = vld [vmem:[#allocation8 + $0x448] sm:$0xf0] }
  0xfe   : > { %v10680_v26 = vsub.f32 %v10594_v63, %v702_v24  ;;  %724 = vmatmul.f32.vlgmr.msrb.gmra.mxu0 %v706_v25  ;;  %764 = vmatmul.f32.vlgmr.msrb.gmra.mxu2 %v706_v25  ;;  %v6808_v63 = vld [vmem:[#allocation8 + $0x3c8] sm:$0xf0]  ;;  %v7195_v24 = vor.u32 %v9123_v21, %v7192_v23  ;;  %v6550_v25 = vld [vmem:[#allocation8 + $0x188] sm:$0xf] }
  0xff   : > { %v6811_v38 = vor.u32 %v9027_v36, %v6808_v63  ;;  %2452 = vmatpush.bf16.msrb.mxu0 %v6807_v35  ;;  %v7128_v35 = vld [vmem:[#allocation8 + $0x648] sm:$0xf0]  ;;  %v6486_v63 = vld [vmem:[#allocation8 + $0x108] sm:$0xf] }
 0x100   : > { %v707_v62 = vmul.f32 %v10680_v26, %v10680_v26  ;;  %v7131_v36 = vor.u32 %v9107_v33, %v7128_v35  ;;  %v6487_v39 = vor.u32 %v8955_v37, %v6486_v63 }
 0x101   : > { %2478 = vmatpush.bf16.msrb.mxu2 %v6811_v38  ;;  %v8947_v38 = vld [vmem:[#allocation8 + $0x10c] sm:$0xf] }
 0x102   : > { %744 = vmatmul.f32.vlgmr.msrb.gmra.mxu1 %v707_v62  ;;  %784 = vmatmul.f32.vlgmr.msrb.gmra.mxu3 %v707_v62  ;;  %v8971_v62 = vld [vmem:[#allocation8 + $0x1c4] sm:$0xf0]  ;;  %v6491_v41 = vor.u32 %v8947_v38, %v6488_v40 }
 0x103   : > { %2453 = vmatpush.bf16.msrb.mxu0 %v6743_v47  ;;  %2465 = vmatpush.bf16.msrb.mxu1 %v7319_v60  ;;  %v6551_v28 = vor.u32 %v8971_v62, %v6550_v25  ;;  %v7067_v47 = vor.u32 %v9091_v44, %v7064_v46  ;;  %v6358_v60 = vld [vmem:[#allocation8 + $0x8] sm:$0xf]  ;;  %v9028_v44 = vld [vmem:[#allocation8 + $0x394] sm:$0xf] }
 0x104   : > { %2491 = vmatpush.bf16.msrb.mxu3 %v7323_v61  ;;  %v8923_v61 = vld [vmem:[#allocation8 + $0x44] sm:$0xf0] }
 0x105   : > { %2479 = vmatpush.bf16.msrb.mxu2 %v6747_v51  ;;  %v8931_v51 = vld [vmem:[#allocation8 + $0x8c] sm:$0xf]  ;;  %v6359_v1 = vor.u32 %v8923_v61, %v6358_v60  ;;  %v9164_v60 = vld [vmem:[#allocation8 + $0x7cc] sm:$0xf0]  ;;  %v9156_v61 = vld [vmem:[#allocation8 + $0x794] sm:$0xf] }
 0x106   : > { %v6427_v53 = vor.u32 %v8931_v51, %v6424_v52 }
 0x107   : > { %2454 = vmatpush.bf16.msrb.mxu0 %v6679_v3  ;;  %2466 = vmatpush.bf16.msrb.mxu1 %v7255_v9  ;;  %v6363_v3 = vor.u32 %v8915_v0, %v6360_v2  ;;  %v7328_v0 = vld [vmem:[#allocation8 + $0x7d0] sm:$0xf0] }
 0x108   : > { %2492 = vmatpush.bf16.msrb.mxu3 %v7259_v11  ;;  %v6939_v11 = vor.u32 %v9059_v7, %v6936_v10  ;;  %v7327_v7 = vor.u32 %v9164_v60, %v7326_v58  ;;  %v7006_v58 = vld [vmem:[#allocation8 + $0x510] sm:$0xf]  ;;  %v9076_v60 = vld [vmem:[#allocation8 + $0x514] sm:$0xf] }
 0x109   : > { %2480 = vmatpush.bf16.msrb.mxu2 %v6683_v5  ;;  %v6934_v5 = vld [vmem:[#allocation8 + $0x488] sm:$0xf] }
 0x10a   : > { %v6935_v9 = vor.u32 %v9067_v6, %v6934_v5  ;;  %v9004_v5 = vld [vmem:[#allocation8 + $0x2cc] sm:$0xf0]  ;;  %v6688_v6 = vld [vmem:[#allocation8 + $0x2d0] sm:$0xf0] }
 0x10b   : > { %2455 = vmatpush.bf16.msrb.mxu0 %v6615_v15  ;;  %2467 = vmatpush.bf16.msrb.mxu1 %v7191_v22 }
 0x10c   : > { %2493 = vmatpush.bf16.msrb.mxu3 %v7195_v24 }
 0x10d   : > { %2481 = vmatpush.bf16.msrb.mxu2 %v6619_v17  ;;  %v9043_v17 = vld [vmem:[#allocation8 + $0x40c] sm:$0xf] }
 0x10e   : > { %v6875_v21 = vor.u32 %v9043_v17, %v6872_v18  ;;  %v8988_v17 = vld [vmem:[#allocation8 + $0x24c] sm:$0xf0]  ;;  %v8980_v18 = vld [vmem:[#allocation8 + $0x214] sm:$0xf] }
 0x10f   : > { %2456 = vmatpush.bf16.msrb.mxu0 %v6551_v28  ;;  %2468 = vmatpush.bf16.msrb.mxu1 %v7127_v34  ;;  %v818_v34 = vld [vmem:[%s11348_s3] sm:$0x3] }
 0x110   : > { %2494 = vmatpush.bf16.msrb.mxu3 %v7131_v36  ;;  %v812_v36 = vperm.slane %v810_v31, 0  ;;  %v8964_v31 = vld [vmem:[#allocation8 + $0x194] sm:$0xf] }
 0x111   : > { %2482 = vmatpush.bf16.msrb.mxu2 %v6555_v30 }
 0x113   : > { %2457 = vmatpush.bf16.msrb.mxu0 %v6487_v39  ;;  %2469 = vmatpush.bf16.msrb.mxu1 %v7063_v45  ;;  %v820_v39 = vperm.slane %v818_v34, 0  ;;  %v6816_v45 = vld [vmem:[#allocation8 + $0x3d0] sm:$0xf0] }
 0x114   : > { %2495 = vmatpush.bf16.msrb.mxu3 %v7067_v47  ;;  %v6819_v52 = vor.u32 %v9028_v44, %v6816_v45 }
 0x115   : > { %2483 = vmatpush.bf16.msrb.mxu2 %v6491_v41  ;;  %v6814_v41 = vld [vmem:[#allocation8 + $0x390] sm:$0xf] }
 0x116   : > { %v6815_v51 = vor.u32 %v9036_v43, %v6814_v41  ;;  %v8956_v41 = vld [vmem:[#allocation8 + $0x14c] sm:$0xf0]  ;;  %v6496_v43 = vld [vmem:[#allocation8 + $0x150] sm:$0xf0] }
 0x117   : > { %2458 = vmatpush.bf16.msrb.mxu0 %v6423_v50  ;;  %2470 = vmatpush.bf16.msrb.mxu1 %v6999_v56  ;;  %v821_v50 = vperm.slane %v818_v34, 1  ;;  %v9012_v56 = vld [vmem:[#allocation8 + $0x314] sm:$0xf] }
 0x118   : > { %2496 = vmatpush.bf16.msrb.mxu3 %v7003_v59  ;;  %v6755_v2 = vor.u32 %v9012_v56, %v6752_v57 }
 0x119   : > { %2484 = vmatpush.bf16.msrb.mxu2 %v6427_v53  ;;  %v6750_v53 = vld [vmem:[#allocation8 + $0x310] sm:$0xf] }
 0x11b   : > { %2459 = vmatpush.bf16.msrb.mxu0 %v6359_v1  ;;  %2471 = vmatpush.bf16.msrb.mxu1 %v6935_v9  ;;  %v6751_v1 = vor.u32 %v9020_v55, %v6750_v53  ;;  %v7262_v9 = vld [vmem:[#allocation8 + $0x710] sm:$0xf]  ;;  %v6432_v55 = vld [vmem:[#allocation8 + $0xd0] sm:$0xf0] }
 0x11c   : > { %2497 = vmatpush.bf16.msrb.mxu3 %v6939_v11  ;;  %v9148_v11 = vld [vmem:[#allocation8 + $0x74c] sm:$0xf0] }
 0x11d   : > { %2485 = vmatpush.bf16.msrb.mxu2 %v6363_v3  ;;  %v6686_v3 = vld [vmem:[#allocation8 + $0x290] sm:$0xf] }
 0x11e   : > { %v6687_v14 = vor.u32 %v9004_v5, %v6686_v3  ;;  %v8940_v53 = vld [vmem:[#allocation8 + $0xcc] sm:$0xf0]  ;;  %v6368_v5 = vld [vmem:[#allocation8 + $0x50] sm:$0xf0] }
 0x11f   : > { %2472 = vmatpush.bf16.msrb.mxu1 %v6871_v16  ;;  %v6622_v16 = vld [vmem:[#allocation8 + $0x210] sm:$0xf] }
 0x120   : > { %2498 = vmatpush.bf16.msrb.mxu3 %v6875_v21  ;;  %v7263_v21 = vor.u32 %v9148_v11, %v7262_v9  ;;  %v8924_v3 = vld [vmem:[#allocation8 + $0x4c] sm:$0xf0]  ;;  %v9029_v9 = vld [vmem:[#allocation8 + $0x39c] sm:$0xf] }
 0x121   : > { %v6824_v11 = vld [vmem:[#allocation8 + $0x3d8] sm:$0xf0] }
 0x17b   : > { %v725_v4 = vpop.f32.mrf.mxu0 }
 0x17c   : > { %v726_v8 = vadd.f32 1e-05, %v725_v4 }
 0x17f   : > { %v745_v12 = vpop.f32.mrf.mxu1 }
 0x180   : > { %v746_v15 = vadd.f32 %v745_v12, %v726_v8  ;;  %v7331_v8 = vor.u32 %v9156_v61, %v7328_v0  ;;  %v9140_v12 = vld [vmem:[#allocation8 + $0x714] sm:$0xf] }
 0x181   : > { %v765_v19 = vpop.f32.mrf.mxu2  ;;  %v7008_v61 = vld [vmem:[#allocation8 + $0x550] sm:$0xf0] }
 0x182   : > { %9688 = vrsqrt.f32 %v746_v15  ;;  %v766_v22 = vadd.f32 1e-05, %v765_v19  ;;  %vm794_vm1 = vweird.f32 %v746_v15  ;;  %v6624_v19 = vld [vmem:[#allocation8 + $0x250] sm:$0xf0] }
 0x185   : > { %v785_v23 = vpop.f32.mrf.mxu3 }
 0x186   : > { %v786_v24 = vadd.f32 %v785_v23, %v766_v22  ;;  %v7267_v22 = vor.u32 %v9140_v12, %v7264_v13  ;;  %v7198_v23 = vld [vmem:[#allocation8 + $0x690] sm:$0xf] }
 0x187   : > { %v6942_v12 = vld [vmem:[#allocation8 + $0x490] sm:$0xf] }
 0x188   : > { %v9689_v25 = vpop.eup %9688  ;;  %9690 = vrsqrt.f32 %v786_v24  ;;  %vm804_vm4 = vweird.f32 %v786_v24  ;;  %v9068_v13 = vld [vmem:[#allocation8 + $0x4cc] sm:$0xf0] }
 0x189   : > { %v789_v62 = vmul.f32 %v9689_v25, %v746_v15  ;;  %vm795_vm0 = vweird.f32 %v9689_v25 }
 0x18a   : > { %vm796_vm2 = vmor %vm794_vm1, %vm795_vm0 }
 0x18b   : > { %v790_v27 = vmul.f32 %v9689_v25, %v789_v62  ;;  %v7200_v62 = vld [vmem:[#allocation8 + $0x6d0] sm:$0xf0] }
 0x18d   : > { %v791_v28 = vmul.f32 0.5, %v790_v27  ;;  %v6623_v27 = vor.u32 %v8988_v17, %v6622_v16 }
 0x18e   : > { %v9691_v29 = vpop.eup %9690 }
 0x18f   : > { %v792_v30 = vsub.f32 1.5, %v791_v28  ;;  %v799_v32 = vmul.f32 %v9691_v29, %v786_v24  ;;  %vm805_vm3 = vweird.f32 %v9691_v29  ;;  %v9132_v24 = vld [vmem:[#allocation8 + $0x6cc] sm:$0xf0]  ;;  %v6627_v28 = vor.u32 %v8980_v18, %v6624_v19 }
 0x190   : > { %vm806_vm5 = vmor %vm804_vm4, %vm805_vm3  ;;  %v6827_v19 = vor.u32 %v9029_v9, %v6824_v11 }
 0x191   : > { %v793_v33 = vmul.f32 %v9689_v25, %v792_v30  ;;  %v800_v35 = vmul.f32 %v9691_v29, %v799_v32  ;;  %v8972_v30 = vld [vmem:[#allocation8 + $0x1cc] sm:$0xf0]  ;;  %v6560_v32 = vld [vmem:[#allocation8 + $0x1d0] sm:$0xf0] }
 0x193   : > { %v797_v63 = vsel %vm796_vm2, %v9689_v25, %v793_v33  ;;  %v801_v37 = vmul.f32 0.5, %v800_v35  ;;  %v9124_v25 = vld [vmem:[#allocation8 + $0x694] sm:$0xf]  ;;  %v7199_v33 = vor.u32 %v9132_v24, %v7198_v23  ;;  %v7134_v35 = vld [vmem:[#allocation8 + $0x610] sm:$0xf]  ;;  %v6943_v24 = vor.u32 %v9068_v13, %v6942_v12 }
 0x194   : > { %v808_v38 = vmul.f32 %v797_v63, %v10675_v20  ;;  %v7203_v34 = vor.u32 %v9124_v25, %v7200_v62  ;;  %v9108_v63 = vld [vmem:[#allocation8 + $0x614] sm:$0xf]  ;;  %v9013_v23 = vld [vmem:[#allocation8 + $0x31c] sm:$0xf]  ;;  %v6502_v12 = vld [vmem:[#allocation8 + $0x118] sm:$0xf] }
 0x195   : > { %v802_v40 = vsub.f32 1.5, %v801_v37  ;;  %v7136_v37 = vld [vmem:[#allocation8 + $0x650] sm:$0xf0]  ;;  %v6760_v62 = vld [vmem:[#allocation8 + $0x358] sm:$0xf0] }
 0x196   : > { %v816_v42 = vmul.f32 %v812_v36, %v808_v38  ;;  %v9116_v36 = vld [vmem:[#allocation8 + $0x64c] sm:$0xf0]  ;;  %v7139_v45 = vor.u32 %v9108_v63, %v7136_v37  ;;  %v6694_v63 = vld [vmem:[#allocation8 + $0x298] sm:$0xf] }
 0x197   : > { %v803_v46 = vmul.f32 %v9691_v29, %v802_v40  ;;  %v6494_v40 = vld [vmem:[#allocation8 + $0x110] sm:$0xf]  ;;  %v7135_v44 = vor.u32 %v9116_v36, %v7134_v35  ;;  %v6763_v36 = vor.u32 %v9013_v23, %v6760_v62  ;;  %v8957_v13 = vld [vmem:[#allocation8 + $0x154] sm:$0xf0] }
 0x198   : > { %v824_v47 = vadd.f32 %v820_v39, %v816_v42  ;;  %v6563_v39 = vor.u32 %v8964_v31, %v6560_v32  ;;  %v8948_v42 = vld [vmem:[#allocation8 + $0x114] sm:$0xf]  ;;  %v7334_v31 = vld [vmem:[#allocation8 + $0x798] sm:$0xf]  ;;  %v6503_v23 = vor.u32 %v8957_v13, %v6502_v12 }
 0x199   : > { %v807_v49 = vsel %vm806_vm5, %v9691_v29, %v803_v46  ;;  %v6558_v29 = vld [vmem:[#allocation8 + $0x190] sm:$0xf]  ;;  %v9165_v32 = vld [vmem:[#allocation8 + $0x7d4] sm:$0xf0] }
 0x19a   : > { %v10688_v54 = vpack.c.bf16 %v824_v47, %v824_v47  ;;  %v809_v20 = vmul.f32 %v807_v49, %v10680_v26  ;;  %v8996_v26 = vld [vmem:[#allocation8 + $0x294] sm:$0xf]  ;;  %v6559_v38 = vor.u32 %v8972_v30, %v6558_v29  ;;  %v7070_v46 = vld [vmem:[#allocation8 + $0x590] sm:$0xf]  ;;  %v8941_v62 = vld [vmem:[#allocation8 + $0xd4] sm:$0xf0] }
 0x19b   : > { %v6691_v15 = vor.u32 %v8996_v26, %v6688_v6  ;;  %v9100_v47 = vld [vmem:[#allocation8 + $0x5cc] sm:$0xf0]  ;;  %v7072_v49 = vld [vmem:[#allocation8 + $0x5d0] sm:$0xf0]  ;;  %v6822_v26 = vld [vmem:[#allocation8 + $0x398] sm:$0xf] }
 0x19c   : > { %v817_v59 = vmul.f32 %v813_v48, %v809_v20  ;;  %2408 = vmatmul.bf16.vlgmr.msra.gmra.mxu0 %v10688_v54  ;;  %2434 = vmatmul.bf16.vlgmr.msra.gmra.mxu2 %v10688_v54  ;;  %v9092_v48 = vld [vmem:[#allocation8 + $0x594] sm:$0xf]  ;;  %v7071_v56 = vor.u32 %v9100_v47, %v7070_v46  ;;  %v9037_v6 = vld [vmem:[#allocation8 + $0x3d4] sm:$0xf0]  ;;  %v9141_v46 = vld [vmem:[#allocation8 + $0x71c] sm:$0xf] }
 0x19d   : > { %2504 = vmatpush.bf16.msra.mxu0 %v6815_v51  ;;  %2530 = vmatpush.bf16.msra.mxu2 %v6819_v52  ;;  %v6499_v51 = vor.u32 %v8948_v42, %v6496_v43  ;;  %v6430_v52 = vld [vmem:[#allocation8 + $0x90] sm:$0xf]  ;;  %v8932_v20 = vld [vmem:[#allocation8 + $0x94] sm:$0xf]  ;;  %v7075_v57 = vor.u32 %v9092_v48, %v7072_v49  ;;  %v6823_v18 = vor.u32 %v9037_v6, %v6822_v26  ;;  %v7272_v47 = vld [vmem:[#allocation8 + $0x758] sm:$0xf0] }
 0x19e   : > { %v825_v4 = vadd.f32 %v821_v50, %v817_v59  ;;  %v6495_v50 = vor.u32 %v8956_v41, %v6494_v40  ;;  %v9084_v59 = vld [vmem:[#allocation8 + $0x54c] sm:$0xf0]  ;;  %v6431_v0 = vor.u32 %v8940_v53, %v6430_v52  ;;  %v9044_v29 = vld [vmem:[#allocation8 + $0x414] sm:$0xf]  ;;  %v8997_v40 = vld [vmem:[#allocation8 + $0x29c] sm:$0xf]  ;;  %v7335_v42 = vor.u32 %v9165_v32, %v7334_v31 }
 0x19f   : > { %v6880_v30 = vld [vmem:[#allocation8 + $0x450] sm:$0xf0]  ;;  %v6696_v41 = vld [vmem:[#allocation8 + $0x2d8] sm:$0xf0]  ;;  %v7142_v26 = vld [vmem:[#allocation8 + $0x618] sm:$0xf] }
 0x1a0   : > { %v10693_v10 = vpack.c.bf16 %v825_v4, %v825_v4  ;;  %v8916_v4 = vld [vmem:[#allocation8 + $0x14] sm:$0xf]  ;;  %v6699_v49 = vor.u32 %v8997_v40, %v6696_v41  ;;  %v8981_v52 = vld [vmem:[#allocation8 + $0x21c] sm:$0xf]  ;;  %v9117_v6 = vld [vmem:[#allocation8 + $0x654] sm:$0xf0] }
 0x1a1   : > { %2505 = vmatpush.bf16.msra.mxu0 %v6751_v1  ;;  %2531 = vmatpush.bf16.msra.mxu2 %v6755_v2  ;;  %v6435_v1 = vor.u32 %v8932_v20, %v6432_v55  ;;  %v6366_v2 = vld [vmem:[#allocation8 + $0x10] sm:$0xf]  ;;  %v6371_v17 = vor.u32 %v8916_v4, %v6368_v5  ;;  %v6632_v53 = vld [vmem:[#allocation8 + $0x258] sm:$0xf0]  ;;  %v7275_v55 = vor.u32 %v9141_v46, %v7272_v47  ;;  %v7014_v31 = vld [vmem:[#allocation8 + $0x518] sm:$0xf] }
 0x1a2   : > { %2421 = vmatmul.bf16.vlgmr.msra.gmra.mxu1 %v10693_v10  ;;  %2447 = vmatmul.bf16.vlgmr.msra.gmra.mxu3 %v10693_v10  ;;  %v6367_v16 = vor.u32 %v8924_v3, %v6366_v2  ;;  %v8965_v2 = vld [vmem:[#allocation8 + $0x19c] sm:$0xf]  ;;  %v9085_v32 = vld [vmem:[#allocation8 + $0x554] sm:$0xf0]  ;;  %v6830_v40 = vld [vmem:[#allocation8 + $0x3a0] sm:$0xf] }
 0x1a3   : > { %2517 = vmatpush.bf16.msra.mxu1 %v7327_v7  ;;  %2543 = vmatpush.bf16.msra.mxu3 %v7331_v8  ;;  %v7007_v7 = vor.u32 %v9084_v59, %v7006_v58  ;;  %v7011_v8 = vor.u32 %v9076_v60, %v7008_v61  ;;  %v9125_v58 = vld [vmem:[#allocation8 + $0x69c] sm:$0xf]  ;;  %v6635_v61 = vor.u32 %v8981_v52, %v6632_v53  ;;  %v9038_v41 = vld [vmem:[#allocation8 + $0x3dc] sm:$0xf0]  ;;  %v6950_v46 = vld [vmem:[#allocation8 + $0x498] sm:$0xf] }
 0x1a4   : > { %v7208_v59 = vld [vmem:[#allocation8 + $0x6d8] sm:$0xf0]  ;;  %v9069_v47 = vld [vmem:[#allocation8 + $0x4d4] sm:$0xf0]  ;;  %v6831_v52 = vor.u32 %v9038_v41, %v6830_v40  ;;  %v7150_v40 = vld [vmem:[#allocation8 + $0x620] sm:$0xf] }
 0x1a5   : > { %2506 = vmatpush.bf16.msra.mxu0 %v6687_v14  ;;  %2532 = vmatpush.bf16.msra.mxu2 %v6691_v15  ;;  %v9060_v14 = vld [vmem:[#allocation8 + $0x494] sm:$0xf]  ;;  %v6568_v3 = vld [vmem:[#allocation8 + $0x1d8] sm:$0xf0]  ;;  %v7211_v5 = vor.u32 %v9125_v58, %v7208_v59  ;;  %v6768_v59 = vld [vmem:[#allocation8 + $0x360] sm:$0xf0] }
 0x1a6   : > { %v6944_v15 = vld [vmem:[#allocation8 + $0x4d0] sm:$0xf0]  ;;  %v6571_v11 = vor.u32 %v8965_v2, %v6568_v3  ;;  %v7342_v2 = vld [vmem:[#allocation8 + $0x7a0] sm:$0xf] }
 0x1a7   : > { %2518 = vmatpush.bf16.msra.mxu1 %v7263_v21  ;;  %2544 = vmatpush.bf16.msra.mxu3 %v7267_v22  ;;  %v6758_v21 = vld [vmem:[#allocation8 + $0x318] sm:$0xf]  ;;  %v6947_v25 = vor.u32 %v9060_v14, %v6944_v15  ;;  %v8949_v14 = vld [vmem:[#allocation8 + $0x11c] sm:$0xf]  ;;  %v9166_v3 = vld [vmem:[#allocation8 + $0x7dc] sm:$0xf0] }
 0x1a8   : > { %v9021_v22 = vld [vmem:[#allocation8 + $0x354] sm:$0xf0]  ;;  %v6504_v15 = vld [vmem:[#allocation8 + $0x158] sm:$0xf0]  ;;  %v7343_v12 = vor.u32 %v9166_v3, %v7342_v2  ;;  %v9118_v41 = vld [vmem:[#allocation8 + $0x65c] sm:$0xf0] }
 0x1a9   : > { %2507 = vmatpush.bf16.msra.mxu0 %v6623_v27  ;;  %2533 = vmatpush.bf16.msra.mxu2 %v6627_v28  ;;  %v6878_v27 = vld [vmem:[#allocation8 + $0x410] sm:$0xf]  ;;  %v6759_v35 = vor.u32 %v9021_v22, %v6758_v21  ;;  %v9093_v21 = vld [vmem:[#allocation8 + $0x59c] sm:$0xf]  ;;  %v7022_v2 = vld [vmem:[#allocation8 + $0x520] sm:$0xf] }
 0x1aa   : > { %v9052_v28 = vld [vmem:[#allocation8 + $0x44c] sm:$0xf0]  ;;  %v7080_v22 = vld [vmem:[#allocation8 + $0x5d8] sm:$0xf0]  ;;  %v9086_v3 = vld [vmem:[#allocation8 + $0x55c] sm:$0xf0] }
 0x1ab   : > { %2519 = vmatpush.bf16.msra.mxu1 %v7199_v33  ;;  %2545 = vmatpush.bf16.msra.mxu3 %v7203_v34  ;;  %v9157_v33 = vld [vmem:[#allocation8 + $0x79c] sm:$0xf]  ;;  %v6879_v37 = vor.u32 %v9052_v28, %v6878_v27 }
 0x1ac   : > { %2460 = vmatmul.bf16.vlgmr.msrb.gmra.mxu0 %v10688_v54  ;;  %2486 = vmatmul.bf16.vlgmr.msrb.gmra.mxu2 %v10688_v54  ;;  %v7336_v34 = vld [vmem:[#allocation8 + $0x7d8] sm:$0xf0] }
 0x1ad   : > { %2508 = vmatpush.bf16.msra.mxu0 %v6559_v38  ;;  %2534 = vmatpush.bf16.msra.mxu2 %v6563_v39  ;;  %v6883_v38 = vor.u32 %v9044_v29, %v6880_v30  ;;  %v9005_v39 = vld [vmem:[#allocation8 + $0x2d4] sm:$0xf0]  ;;  %v7339_v43 = vor.u32 %v9157_v33, %v7336_v34  ;;  %v8933_v27 = vld [vmem:[#allocation8 + $0x9c] sm:$0xf]  ;;  %v7083_v30 = vor.u32 %v9093_v21, %v7080_v22 }
 0x1ae   : > { %v6695_v48 = vor.u32 %v9005_v39, %v6694_v63  ;;  %v6440_v28 = vld [vmem:[#allocation8 + $0xd8] sm:$0xf0]  ;;  %v6374_v63 = vld [vmem:[#allocation8 + $0x18] sm:$0xf] }
 0x1af   : > { %2520 = vmatpush.bf16.msra.mxu1 %v7135_v44  ;;  %2546 = vmatpush.bf16.msra.mxu3 %v7139_v45  ;;  %v7270_v44 = vld [vmem:[#allocation8 + $0x718] sm:$0xf]  ;;  %v9077_v33 = vld [vmem:[#allocation8 + $0x51c] sm:$0xf] }
 0x1b0   : > { %v9149_v45 = vld [vmem:[#allocation8 + $0x754] sm:$0xf0]  ;;  %v7016_v34 = vld [vmem:[#allocation8 + $0x558] sm:$0xf0] }
 0x1b1   : > { %2509 = vmatpush.bf16.msra.mxu0 %v6495_v50  ;;  %2535 = vmatpush.bf16.msra.mxu2 %v6499_v51  ;;  %v6630_v50 = vld [vmem:[#allocation8 + $0x218] sm:$0xf]  ;;  %v7271_v20 = vor.u32 %v9149_v45, %v7270_v44  ;;  %v6376_v39 = vld [vmem:[#allocation8 + $0x58] sm:$0xf0]  ;;  %v9030_v44 = vld [vmem:[#allocation8 + $0x3a4] sm:$0xf] }
 0x1b2   : > { %2473 = vmatmul.bf16.vlgmr.msrb.gmra.mxu1 %v10693_v10  ;;  %2499 = vmatmul.bf16.vlgmr.msrb.gmra.mxu3 %v10693_v10  ;;  %v8989_v51 = vld [vmem:[#allocation8 + $0x254] sm:$0xf0]  ;;  %v6832_v45 = vld [vmem:[#allocation8 + $0x3e0] sm:$0xf0] }
 0x1b3   : > { %2521 = vmatpush.bf16.msra.mxu1 %v7071_v56  ;;  %2547 = vmatpush.bf16.msra.mxu3 %v7075_v57  ;;  %v7206_v56 = vld [vmem:[#allocation8 + $0x698] sm:$0xf]  ;;  %v6631_v60 = vor.u32 %v8989_v51, %v6630_v50  ;;  %v6835_v53 = vor.u32 %v9030_v44, %v6832_v45 }
 0x1b4   : > { %v9133_v57 = vld [vmem:[#allocation8 + $0x6d4] sm:$0xf0] }
 0x1b5   : > { %2510 = vmatpush.bf16.msra.mxu0 %v6431_v0  ;;  %2536 = vmatpush.bf16.msra.mxu2 %v6435_v1  ;;  %v6566_v0 = vld [vmem:[#allocation8 + $0x198] sm:$0xf]  ;;  %v7207_v4 = vor.u32 %v9133_v57, %v7206_v56  ;;  %v9014_v56 = vld [vmem:[#allocation8 + $0x324] sm:$0xf]  ;;  %v6951_v57 = vor.u32 %v9069_v47, %v6950_v46  ;;  %v6510_v46 = vld [vmem:[#allocation8 + $0x120] sm:$0xf] }
 0x1b6   : > { %v8973_v1 = vld [vmem:[#allocation8 + $0x1d4] sm:$0xf0]  ;;  %v8958_v47 = vld [vmem:[#allocation8 + $0x15c] sm:$0xf0] }
 0x1b7   : > { %2522 = vmatpush.bf16.msra.mxu1 %v7007_v7  ;;  %2548 = vmatpush.bf16.msra.mxu3 %v7011_v8  ;;  %v9109_v7 = vld [vmem:[#allocation8 + $0x61c] sm:$0xf]  ;;  %v6567_v9 = vor.u32 %v8973_v1, %v6566_v0 }
 0x1b8   : > { %v7144_v8 = vld [vmem:[#allocation8 + $0x658] sm:$0xf0] }
 0x1b9   : > { %2511 = vmatpush.bf16.msra.mxu0 %v6367_v16  ;;  %2537 = vmatpush.bf16.msra.mxu2 %v6371_v17  ;;  %v7143_v16 = vor.u32 %v9117_v6, %v7142_v26  ;;  %v7147_v17 = vor.u32 %v9109_v7, %v7144_v8  ;;  %v9045_v0 = vld [vmem:[#allocation8 + $0x41c] sm:$0xf]  ;;  %v6771_v6 = vor.u32 %v9014_v56, %v6768_v59  ;;  %v8942_v59 = vld [vmem:[#allocation8 + $0xdc] sm:$0xf0] }
 0x1ba   : > { %v6888_v1 = vld [vmem:[#allocation8 + $0x458] sm:$0xf0]  ;;  %v6511_v56 = vor.u32 %v8958_v47, %v6510_v46 }
 0x1bb   : > { %2523 = vmatpush.bf16.msra.mxu1 %v6943_v24  ;;  %2549 = vmatpush.bf16.msra.mxu3 %v6947_v25  ;;  %v6507_v24 = vor.u32 %v8949_v14, %v6504_v15  ;;  %v6438_v25 = vld [vmem:[#allocation8 + $0x98] sm:$0xf]  ;;  %v6891_v8 = vor.u32 %v9045_v0, %v6888_v1  ;;  %v8998_v14 = vld [vmem:[#allocation8 + $0x2a4] sm:$0xf] }
 0x1bc   : > { %2512 = vmatmul.bf16.vlgmr.msra.gmra.mxu0 %v10688_v54  ;;  %2538 = vmatmul.bf16.vlgmr.msra.gmra.mxu2 %v10688_v54  ;;  %v6704_v15 = vld [vmem:[#allocation8 + $0x2e0] sm:$0xf0] }
 0x1bd   : > { %2556 = vmatpush.bf16.msrb.mxu0 %v6823_v18  ;;  %2582 = vmatpush.bf16.msrb.mxu2 %v6827_v19  ;;  %v7078_v18 = vld [vmem:[#allocation8 + $0x598] sm:$0xf]  ;;  %v6707_v22 = vor.u32 %v8998_v14, %v6704_v15  ;;  %v8934_v0 = vld [vmem:[#allocation8 + $0xa4] sm:$0xf]  ;;  %v6838_v14 = vld [vmem:[#allocation8 + $0x3a8] sm:$0xf] }
 0x1be   : > { %v9101_v19 = vld [vmem:[#allocation8 + $0x5d4] sm:$0xf0]  ;;  %v6448_v1 = vld [vmem:[#allocation8 + $0xe0] sm:$0xf0]  ;;  %v9039_v15 = vld [vmem:[#allocation8 + $0x3e4] sm:$0xf0] }
 0x1bf   : > { %2524 = vmatpush.bf16.msra.mxu1 %v6879_v37  ;;  %2550 = vmatpush.bf16.msra.mxu3 %v6883_v38  ;;  %v7079_v29 = vor.u32 %v9101_v19, %v7078_v18  ;;  %v8925_v37 = vld [vmem:[#allocation8 + $0x54] sm:$0xf0]  ;;  %v8917_v38 = vld [vmem:[#allocation8 + $0x1c] sm:$0xf]  ;;  %v9142_v18 = vld [vmem:[#allocation8 + $0x724] sm:$0xf] }
 0x1c0   : > { %v6375_v50 = vor.u32 %v8925_v37, %v6374_v63  ;;  %v6379_v51 = vor.u32 %v8917_v38, %v6376_v39  ;;  %v7280_v19 = vld [vmem:[#allocation8 + $0x760] sm:$0xf0] }
 0x1c1   : > { %2557 = vmatpush.bf16.msrb.mxu0 %v6759_v35  ;;  %2583 = vmatpush.bf16.msrb.mxu2 %v6763_v36  ;;  %v6439_v35 = vor.u32 %v8941_v62, %v6438_v25  ;;  %v6443_v36 = vor.u32 %v8933_v27, %v6440_v28  ;;  %v7283_v62 = vor.u32 %v9142_v18, %v7280_v19  ;;  %v8982_v27 = vld [vmem:[#allocation8 + $0x224] sm:$0xf]  ;;  %v6958_v18 = vld [vmem:[#allocation8 + $0x4a0] sm:$0xf] }
 0x1c2   : > { %2525 = vmatmul.bf16.vlgmr.msra.gmra.mxu1 %v10693_v10  ;;  %2551 = vmatmul.bf16.vlgmr.msra.gmra.mxu3 %v10693_v10  ;;  %v6640_v28 = vld [vmem:[#allocation8 + $0x260] sm:$0xf0]  ;;  %v9070_v19 = vld [vmem:[#allocation8 + $0x4dc] sm:$0xf0] }
 0x1c3   : > { %2569 = vmatpush.bf16.msrb.mxu1 %v7335_v42  ;;  %2595 = vmatpush.bf16.msrb.mxu3 %v7339_v43  ;;  %v7015_v42 = vor.u32 %v9085_v32, %v7014_v31  ;;  %v7019_v43 = vor.u32 %v9077_v33, %v7016_v34  ;;  %v9126_v31 = vld [vmem:[#allocation8 + $0x6a4] sm:$0xf]  ;;  %v6643_v34 = vor.u32 %v8982_v27, %v6640_v28  ;;  %v6774_v27 = vld [vmem:[#allocation8 + $0x328] sm:$0xf] }
 0x1c4   : > { %v7216_v32 = vld [vmem:[#allocation8 + $0x6e0] sm:$0xf0]  ;;  %v9023_v28 = vld [vmem:[#allocation8 + $0x364] sm:$0xf0] }
 0x1c5   : > { %2558 = vmatpush.bf16.msrb.mxu0 %v6695_v48  ;;  %2584 = vmatpush.bf16.msrb.mxu2 %v6699_v49  ;;  %v9061_v48 = vld [vmem:[#allocation8 + $0x49c] sm:$0xf]  ;;  %v7219_v37 = vor.u32 %v9126_v31, %v7216_v32  ;;  %v8966_v38 = vld [vmem:[#allocation8 + $0x1a4] sm:$0xf]  ;;  %v6776_v32 = vld [vmem:[#allocation8 + $0x368] sm:$0xf0] }
 0x1c6   : > { %v6952_v49 = vld [vmem:[#allocation8 + $0x4d8] sm:$0xf0]  ;;  %v6576_v39 = vld [vmem:[#allocation8 + $0x1e0] sm:$0xf0] }
 0x1c7   : > { %2570 = vmatpush.bf16.msrb.mxu1 %v7271_v20  ;;  %2596 = vmatpush.bf16.msrb.mxu3 %v7275_v55  ;;  %v6766_v20 = vld [vmem:[#allocation8 + $0x320] sm:$0xf]  ;;  %v6955_v58 = vor.u32 %v9061_v48, %v6952_v49  ;;  %v6579_v45 = vor.u32 %v8966_v38, %v6576_v39  ;;  %v7151_v48 = vor.u32 %v9118_v41, %v7150_v40  ;;  %v9159_v38 = vld [vmem:[#allocation8 + $0x7ac] sm:$0xf] }
 0x1c8   : > { %v9022_v55 = vld [vmem:[#allocation8 + $0x35c] sm:$0xf0]  ;;  %v7352_v39 = vld [vmem:[#allocation8 + $0x7e8] sm:$0xf0]  ;;  %v6775_v40 = vor.u32 %v9023_v28, %v6774_v27 }
 0x1c9   : > { %2559 = vmatpush.bf16.msrb.mxu0 %v6631_v60  ;;  %2585 = vmatpush.bf16.msrb.mxu2 %v6635_v61  ;;  %v6886_v60 = vld [vmem:[#allocation8 + $0x418] sm:$0xf]  ;;  %v6767_v26 = vor.u32 %v9022_v55, %v6766_v20  ;;  %v9094_v20 = vld [vmem:[#allocation8 + $0x5a4] sm:$0xf]  ;;  %v7355_v47 = vor.u32 %v9159_v38, %v7352_v39  ;;  %v9095_v27 = vld [vmem:[#allocation8 + $0x5ac] sm:$0xf] }
 0x1ca   : > { %v9053_v61 = vld [vmem:[#allocation8 + $0x454] sm:$0xf0]  ;;  %v7088_v55 = vld [vmem:[#allocation8 + $0x5e0] sm:$0xf0]  ;;  %v7096_v28 = vld [vmem:[#allocation8 + $0x5e8] sm:$0xf0] }
 0x1cb   : > { %2571 = vmatpush.bf16.msrb.mxu1 %v7207_v4  ;;  %2597 = vmatpush.bf16.msrb.mxu3 %v7211_v5  ;;  %v9158_v4 = vld [vmem:[#allocation8 + $0x7a4] sm:$0xf]  ;;  %v6887_v7 = vor.u32 %v9053_v61, %v6886_v60  ;;  %v7091_v61 = vor.u32 %v9094_v20, %v7088_v55  ;;  %v9079_v38 = vld [vmem:[#allocation8 + $0x52c] sm:$0xf] }
 0x1cc   : > { %v7344_v5 = vld [vmem:[#allocation8 + $0x7e0] sm:$0xf0]  ;;  %v7032_v39 = vld [vmem:[#allocation8 + $0x568] sm:$0xf0] }
 0x1cd   : > { %2560 = vmatpush.bf16.msrb.mxu0 %v6567_v9  ;;  %2586 = vmatpush.bf16.msrb.mxu2 %v6571_v11  ;;  %v6702_v9 = vld [vmem:[#allocation8 + $0x2a0] sm:$0xf]  ;;  %v7347_v13 = vor.u32 %v9158_v4, %v7344_v5  ;;  %v9078_v4 = vld [vmem:[#allocation8 + $0x524] sm:$0xf] }
 0x1ce   : > { %v9006_v11 = vld [vmem:[#allocation8 + $0x2dc] sm:$0xf0]  ;;  %v7024_v5 = vld [vmem:[#allocation8 + $0x560] sm:$0xf0] }
 0x1cf   : > { %2572 = vmatpush.bf16.msrb.mxu1 %v7143_v16  ;;  %2598 = vmatpush.bf16.msrb.mxu3 %v7147_v17  ;;  %v7278_v16 = vld [vmem:[#allocation8 + $0x720] sm:$0xf]  ;;  %v6703_v21 = vor.u32 %v9006_v11, %v6702_v9  ;;  %v8918_v9 = vld [vmem:[#allocation8 + $0x24] sm:$0xf]  ;;  %v7023_v11 = vor.u32 %v9086_v3, %v7022_v2  ;;  %v9127_v2 = vld [vmem:[#allocation8 + $0x6ac] sm:$0xf] }
 0x1d0   : > { %v9150_v17 = vld [vmem:[#allocation8 + $0x75c] sm:$0xf0]  ;;  %v7224_v3 = vld [vmem:[#allocation8 + $0x6e8] sm:$0xf0] }
 0x1d1   : > { %2561 = vmatpush.bf16.msrb.mxu0 %v6503_v23  ;;  %2587 = vmatpush.bf16.msrb.mxu2 %v6507_v24  ;;  %v6638_v23 = vld [vmem:[#allocation8 + $0x220] sm:$0xf]  ;;  %v7279_v25 = vor.u32 %v9150_v17, %v7278_v16  ;;  %v9031_v16 = vld [vmem:[#allocation8 + $0x3ac] sm:$0xf] }
 0x1d2   : > { %v8990_v24 = vld [vmem:[#allocation8 + $0x25c] sm:$0xf0]  ;;  %v6840_v17 = vld [vmem:[#allocation8 + $0x3e8] sm:$0xf0] }
 0x1d3   : > { %2573 = vmatpush.bf16.msrb.mxu1 %v7079_v29  ;;  %2599 = vmatpush.bf16.msrb.mxu3 %v7083_v30  ;;  %v7214_v29 = vld [vmem:[#allocation8 + $0x6a0] sm:$0xf]  ;;  %v6639_v33 = vor.u32 %v8990_v24, %v6638_v23 }
 0x1d4   : > { %v9134_v30 = vld [vmem:[#allocation8 + $0x6dc] sm:$0xf0] }
 0x1d5   : > { %2562 = vmatpush.bf16.msrb.mxu0 %v6439_v35  ;;  %2588 = vmatpush.bf16.msrb.mxu2 %v6443_v36  ;;  %v6574_v35 = vld [vmem:[#allocation8 + $0x1a0] sm:$0xf]  ;;  %v7215_v63 = vor.u32 %v9134_v30, %v7214_v29  ;;  %v9015_v29 = vld [vmem:[#allocation8 + $0x32c] sm:$0xf]  ;;  %v6959_v30 = vor.u32 %v9070_v19, %v6958_v18  ;;  %v6518_v18 = vld [vmem:[#allocation8 + $0x128] sm:$0xf] }
 0x1d6   : > { %v8974_v36 = vld [vmem:[#allocation8 + $0x1dc] sm:$0xf0]  ;;  %v6779_v41 = vor.u32 %v9015_v29, %v6776_v32  ;;  %v8959_v19 = vld [vmem:[#allocation8 + $0x164] sm:$0xf0] }
 0x1d7   : > { %2574 = vmatpush.bf16.msrb.mxu1 %v7015_v42  ;;  %2600 = vmatpush.bf16.msrb.mxu3 %v7019_v43  ;;  %v9110_v42 = vld [vmem:[#allocation8 + $0x624] sm:$0xf]  ;;  %v6575_v44 = vor.u32 %v8974_v36, %v6574_v35  ;;  %v6519_v29 = vor.u32 %v8959_v19, %v6518_v18  ;;  %v8943_v32 = vld [vmem:[#allocation8 + $0xe4] sm:$0xf0] }
 0x1d8   : > { %v7152_v43 = vld [vmem:[#allocation8 + $0x660] sm:$0xf0] }
 0x1d9   : > { %2563 = vmatpush.bf16.msrb.mxu0 %v6375_v50  ;;  %2589 = vmatpush.bf16.msrb.mxu2 %v6379_v51  ;;  %v7155_v49 = vor.u32 %v9110_v42, %v7152_v43  ;;  %v8950_v50 = vld [vmem:[#allocation8 + $0x124] sm:$0xf] }
 0x1da   : > { %v6512_v51 = vld [vmem:[#allocation8 + $0x160] sm:$0xf0] }
 0x1db   : > { %2575 = vmatpush.bf16.msrb.mxu1 %v6951_v57  ;;  %2601 = vmatpush.bf16.msrb.mxu3 %v6955_v58  ;;  %v6515_v57 = vor.u32 %v8950_v50, %v6512_v51  ;;  %v6446_v58 = vld [vmem:[#allocation8 + $0xa0] sm:$0xf]  ;;  %v9046_v35 = vld [vmem:[#allocation8 + $0x424] sm:$0xf]  ;;  %v7286_v50 = vld [vmem:[#allocation8 + $0x728] sm:$0xf] }
 0x1dc   : > { %2564 = vmatmul.bf16.vlgmr.msrb.gmra.mxu0 %v10688_v54  ;;  %2590 = vmatmul.bf16.vlgmr.msrb.gmra.mxu2 %v10688_v54  ;;  %v6896_v36 = vld [vmem:[#allocation8 + $0x460] sm:$0xf0]  ;;  %v9151_v51 = vld [vmem:[#allocation8 + $0x764] sm:$0xf0] }
 0x1dd   : > { %2608 = vmatpush.bf16.msra.mxu0 %v6831_v52  ;;  %2634 = vmatpush.bf16.msra.mxu2 %v6835_v53  ;;  %v7086_v52 = vld [vmem:[#allocation8 + $0x5a0] sm:$0xf]  ;;  %v6899_v43 = vor.u32 %v9046_v35, %v6896_v36  ;;  %v8935_v35 = vld [vmem:[#allocation8 + $0xac] sm:$0xf] }
 0x1de   : > { %v9102_v53 = vld [vmem:[#allocation8 + $0x5dc] sm:$0xf0]  ;;  %v6456_v36 = vld [vmem:[#allocation8 + $0xe8] sm:$0xf0] }
 0x1df   : > { %2576 = vmatpush.bf16.msrb.mxu1 %v6887_v7  ;;  %2602 = vmatpush.bf16.msrb.mxu3 %v6891_v8  ;;  %v7087_v60 = vor.u32 %v9102_v53, %v7086_v52  ;;  %v6382_v7 = vld [vmem:[#allocation8 + $0x20] sm:$0xf]  ;;  %v9143_v52 = vld [vmem:[#allocation8 + $0x72c] sm:$0xf] }
 0x1e0   : > { %v8926_v8 = vld [vmem:[#allocation8 + $0x5c] sm:$0xf0]  ;;  %v7288_v53 = vld [vmem:[#allocation8 + $0x768] sm:$0xf0] }
 0x1e1   : > { %2609 = vmatpush.bf16.msra.mxu0 %v6767_v26  ;;  %2635 = vmatpush.bf16.msra.mxu2 %v6771_v6  ;;  %v6447_v26 = vor.u32 %v8942_v59, %v6446_v58  ;;  %v6451_v6 = vor.u32 %v8934_v0, %v6448_v1  ;;  %v6383_v23 = vor.u32 %v8926_v8, %v6382_v7  ;;  %v7222_v0 = vld [vmem:[#allocation8 + $0x6a8] sm:$0xf] }
 0x1e2   : > { %2577 = vmatmul.bf16.vlgmr.msrb.gmra.mxu1 %v10693_v10  ;;  %2603 = vmatmul.bf16.vlgmr.msrb.gmra.mxu3 %v10693_v10  ;;  %v7287_v58 = vor.u32 %v9151_v51, %v7286_v50  ;;  %v7291_v59 = vor.u32 %v9143_v52, %v7288_v53  ;;  %v9135_v1 = vld [vmem:[#allocation8 + $0x6e4] sm:$0xf0]  ;;  %v7227_v8 = vor.u32 %v9127_v2, %v7224_v3  ;;  %v9032_v50 = vld [vmem:[#allocation8 + $0x3b4] sm:$0xf] }
 0x1e3   : > { %2621 = vmatpush.bf16.msra.mxu1 %v7343_v12  ;;  %2647 = vmatpush.bf16.msra.mxu3 %v7347_v13  ;;  %v7027_v12 = vor.u32 %v9078_v4, %v7024_v5  ;;  %v6384_v13 = vld [vmem:[#allocation8 + $0x60] sm:$0xf0]  ;;  %v7223_v7 = vor.u32 %v9135_v1, %v7222_v0  ;;  %v6848_v51 = vld [vmem:[#allocation8 + $0x3f0] sm:$0xf0]  ;;  %v6966_v52 = vld [vmem:[#allocation8 + $0x4a8] sm:$0xf] }
 0x1e4   : > { %v6387_v24 = vor.u32 %v8918_v9, %v6384_v13  ;;  %v8967_v9 = vld [vmem:[#allocation8 + $0x1ac] sm:$0xf]  ;;  %v9119_v13 = vld [vmem:[#allocation8 + $0x664] sm:$0xf0]  ;;  %v9016_v0 = vld [vmem:[#allocation8 + $0x334] sm:$0xf] }
 0x1e5   : > { %2610 = vmatpush.bf16.msra.mxu0 %v6703_v21  ;;  %2636 = vmatpush.bf16.msra.mxu2 %v6707_v22  ;;  %v9062_v21 = vld [vmem:[#allocation8 + $0x4a4] sm:$0xf]  ;;  %v9071_v53 = vld [vmem:[#allocation8 + $0x4e4] sm:$0xf0]  ;;  %v6784_v3 = vld [vmem:[#allocation8 + $0x370] sm:$0xf0] }
 0x1e6   : > { %v6960_v22 = vld [vmem:[#allocation8 + $0x4e0] sm:$0xf0]  ;;  %v6967_v1 = vor.u32 %v9071_v53, %v6966_v52 }
 0x1e7   : > { %2622 = vmatpush.bf16.msra.mxu1 %v7279_v25  ;;  %2648 = vmatpush.bf16.msra.mxu3 %v7283_v62  ;;  %v6839_v25 = vor.u32 %v9039_v15, %v6838_v14  ;;  %v6843_v62 = vor.u32 %v9031_v16, %v6840_v17  ;;  %v6963_v31 = vor.u32 %v9062_v21, %v6960_v22  ;;  %v9111_v14 = vld [vmem:[#allocation8 + $0x62c] sm:$0xf] }
 0x1e8   : > { %v7160_v15 = vld [vmem:[#allocation8 + $0x668] sm:$0xf0] }
 0x1e9   : > { %2611 = vmatpush.bf16.msra.mxu0 %v6639_v33  ;;  %2637 = vmatpush.bf16.msra.mxu2 %v6643_v34  ;;  %v6894_v33 = vld [vmem:[#allocation8 + $0x420] sm:$0xf]  ;;  %v7163_v22 = vor.u32 %v9111_v14, %v7160_v15 }
 0x1ea   : > { %v9054_v34 = vld [vmem:[#allocation8 + $0x45c] sm:$0xf0] }
 0x1eb   : > { %2623 = vmatpush.bf16.msra.mxu1 %v7215_v63  ;;  %2649 = vmatpush.bf16.msra.mxu3 %v7219_v37  ;;  %v7350_v63 = vld [vmem:[#allocation8 + $0x7a8] sm:$0xf]  ;;  %v6895_v42 = vor.u32 %v9054_v34, %v6894_v33  ;;  %v7099_v34 = vor.u32 %v9095_v27, %v7096_v28 }
 0x1ec   : > { %v9167_v37 = vld [vmem:[#allocation8 + $0x7e4] sm:$0xf0] }
 0x1ed   : > { %2612 = vmatpush.bf16.msra.mxu0 %v6575_v44  ;;  %2638 = vmatpush.bf16.msra.mxu2 %v6579_v45  ;;  %v6710_v44 = vld [vmem:[#allocation8 + $0x2a8] sm:$0xf]  ;;  %v7351_v46 = vor.u32 %v9167_v37, %v7350_v63 }
 0x1ee   : > { %v9007_v45 = vld [vmem:[#allocation8 + $0x2e4] sm:$0xf0] }
 0x1ef   : > { %2624 = vmatpush.bf16.msra.mxu1 %v7151_v48  ;;  %2650 = vmatpush.bf16.msra.mxu3 %v7155_v49  ;;  %v8999_v48 = vld [vmem:[#allocation8 + $0x2ac] sm:$0xf]  ;;  %v6711_v20 = vor.u32 %v9007_v45, %v6710_v44  ;;  %v7030_v63 = vld [vmem:[#allocation8 + $0x528] sm:$0xf] }
 0x1f0   : > { %v6712_v49 = vld [vmem:[#allocation8 + $0x2e8] sm:$0xf0]  ;;  %v9087_v37 = vld [vmem:[#allocation8 + $0x564] sm:$0xf0] }
 0x1f1   : > { %2613 = vmatpush.bf16.msra.mxu0 %v6511_v56  ;;  %2639 = vmatpush.bf16.msra.mxu2 %v6515_v57  ;;  %v6715_v55 = vor.u32 %v8999_v48, %v6712_v49  ;;  %v6646_v56 = vld [vmem:[#allocation8 + $0x228] sm:$0xf]  ;;  %v8919_v44 = vld [vmem:[#allocation8 + $0x2c] sm:$0xf]  ;;  %v7031_v45 = vor.u32 %v9087_v37, %v7030_v63  ;;  %v6846_v48 = vld [vmem:[#allocation8 + $0x3b0] sm:$0xf] }
 0x1f2   : > { %v8991_v57 = vld [vmem:[#allocation8 + $0x264] sm:$0xf0]  ;;  %v9040_v49 = vld [vmem:[#allocation8 + $0x3ec] sm:$0xf0]  ;;  %v9128_v37 = vld [vmem:[#allocation8 + $0x6b4] sm:$0xf] }
 0x1f3   : > { %2625 = vmatpush.bf16.msra.mxu1 %v7087_v60  ;;  %2651 = vmatpush.bf16.msra.mxu3 %v7091_v61  ;;  %v8983_v60 = vld [vmem:[#allocation8 + $0x22c] sm:$0xf]  ;;  %v6647_v4 = vor.u32 %v8991_v57, %v6646_v56  ;;  %v9136_v63 = vld [vmem:[#allocation8 + $0x6ec] sm:$0xf0] }
 0x1f4   : > { %v6648_v61 = vld [vmem:[#allocation8 + $0x268] sm:$0xf0] }
 0x1f5   : > { %2614 = vmatpush.bf16.msra.mxu0 %v6447_v26  ;;  %2640 = vmatpush.bf16.msra.mxu2 %v6451_v6  ;;  %v6651_v5 = vor.u32 %v8983_v60, %v6648_v61  ;;  %v6582_v26 = vld [vmem:[#allocation8 + $0x1a8] sm:$0xf]  ;;  %v6782_v60 = vld [vmem:[#allocation8 + $0x330] sm:$0xf] }
 0x1f6   : > { %v8975_v6 = vld [vmem:[#allocation8 + $0x1e4] sm:$0xf0]  ;;  %v9024_v61 = vld [vmem:[#allocation8 + $0x36c] sm:$0xf0] }
 0x1f7   : > { %2626 = vmatpush.bf16.msra.mxu1 %v7023_v11  ;;  %2652 = vmatpush.bf16.msra.mxu3 %v7027_v12  ;;  %v6584_v11 = vld [vmem:[#allocation8 + $0x1e8] sm:$0xf0]  ;;  %v7158_v12 = vld [vmem:[#allocation8 + $0x628] sm:$0xf]  ;;  %v6583_v16 = vor.u32 %v8975_v6, %v6582_v26 }
 0x1f8   : > { %v6587_v17 = vor.u32 %v8967_v9, %v6584_v11  ;;  %v7159_v21 = vor.u32 %v9119_v13, %v7158_v12  ;;  %v9047_v26 = vld [vmem:[#allocation8 + $0x42c] sm:$0xf]  ;;  %v9160_v9 = vld [vmem:[#allocation8 + $0x7b4] sm:$0xf]  ;;  %v6783_v12 = vor.u32 %v9024_v61, %v6782_v60  ;;  %v6787_v13 = vor.u32 %v9016_v0, %v6784_v3  ;;  %v7102_v0 = vld [vmem:[#allocation8 + $0x5b0] sm:$0xf] }
 0x1f9   : > { %2615 = vmatpush.bf16.msra.mxu0 %v6383_v23  ;;  %2641 = vmatpush.bf16.msra.mxu2 %v6387_v24  ;;  %v8951_v23 = vld [vmem:[#allocation8 + $0x12c] sm:$0xf]  ;;  %v7360_v11 = vld [vmem:[#allocation8 + $0x7f0] sm:$0xf0] }
 0x1fa   : > { %v6520_v24 = vld [vmem:[#allocation8 + $0x168] sm:$0xf0]  ;;  %v7363_v19 = vor.u32 %v9160_v9, %v7360_v11  ;;  %v8952_v60 = vld [vmem:[#allocation8 + $0x134] sm:$0xf] }
 0x1fb   : > { %2627 = vmatpush.bf16.msra.mxu1 %v6959_v30  ;;  %2653 = vmatpush.bf16.msra.mxu3 %v6963_v31  ;;  %v6523_v30 = vor.u32 %v8951_v23, %v6520_v24  ;;  %v6454_v31 = vld [vmem:[#allocation8 + $0xa8] sm:$0xf]  ;;  %v6904_v6 = vld [vmem:[#allocation8 + $0x468] sm:$0xf0]  ;;  %v7294_v23 = vld [vmem:[#allocation8 + $0x730] sm:$0xf] }
 0x1fc   : > { %2616 = vmatmul.bf16.vlgmr.msra.gmra.mxu0 %v10688_v54  ;;  %2642 = vmatmul.bf16.vlgmr.msra.gmra.mxu2 %v10688_v54  ;;  %v6907_v15 = vor.u32 %v9047_v26, %v6904_v6  ;;  %v9152_v24 = vld [vmem:[#allocation8 + $0x76c] sm:$0xf0]  ;;  %v6528_v61 = vld [vmem:[#allocation8 + $0x170] sm:$0xf0] }
 0x1fd   : > { %2660 = vmatpush.bf16.msrb.mxu0 %v6839_v25  ;;  %2686 = vmatpush.bf16.msrb.mxu2 %v6843_v62  ;;  %v7094_v25 = vld [vmem:[#allocation8 + $0x5a8] sm:$0xf]  ;;  %v7104_v3 = vld [vmem:[#allocation8 + $0x5f0] sm:$0xf0]  ;;  %v6462_v26 = vld [vmem:[#allocation8 + $0xb0] sm:$0xf] }
 0x1fe   : > { %v9103_v62 = vld [vmem:[#allocation8 + $0x5e4] sm:$0xf0]  ;;  %v8944_v6 = vld [vmem:[#allocation8 + $0xec] sm:$0xf0]  ;;  %v8936_v11 = vld [vmem:[#allocation8 + $0xb4] sm:$0xf] }
 0x1ff   : > { %2628 = vmatpush.bf16.msra.mxu1 %v6895_v42  ;;  %2654 = vmatpush.bf16.msra.mxu3 %v6899_v43  ;;  %v7095_v33 = vor.u32 %v9103_v62, %v7094_v25  ;;  %v6390_v42 = vld [vmem:[#allocation8 + $0x28] sm:$0xf]  ;;  %v9144_v25 = vld [vmem:[#allocation8 + $0x734] sm:$0xf] }
 0x200   : > { %v8927_v43 = vld [vmem:[#allocation8 + $0x64] sm:$0xf0]  ;;  %v7296_v62 = vld [vmem:[#allocation8 + $0x770] sm:$0xf0] }
 0x201   : > { %2661 = vmatpush.bf16.msrb.mxu0 %v6775_v40  ;;  %2687 = vmatpush.bf16.msrb.mxu2 %v6779_v41  ;;  %v6455_v40 = vor.u32 %v8943_v32, %v6454_v31  ;;  %v6459_v41 = vor.u32 %v8935_v35, %v6456_v36  ;;  %v6391_v56 = vor.u32 %v8927_v43, %v6390_v42  ;;  %v6656_v35 = vld [vmem:[#allocation8 + $0x270] sm:$0xf0]  ;;  %v7230_v36 = vld [vmem:[#allocation8 + $0x6b0] sm:$0xf] }
 0x202   : > { %2629 = vmatmul.bf16.vlgmr.msra.gmra.mxu1 %v10693_v10  ;;  %2655 = vmatmul.bf16.vlgmr.msra.gmra.mxu3 %v10693_v10  ;;  %v7295_v32 = vor.u32 %v9152_v24, %v7294_v23  ;;  %v8976_v42 = vld [vmem:[#allocation8 + $0x1ec] sm:$0xf0]  ;;  %v7231_v43 = vor.u32 %v9136_v63, %v7230_v36  ;;  %v8920_v24 = vld [vmem:[#allocation8 + $0x34] sm:$0xf] }
 0x203   : > { %2673 = vmatpush.bf16.msrb.mxu1 %v7351_v46  ;;  %2699 = vmatpush.bf16.msrb.mxu3 %v7355_v47  ;;  %v7035_v46 = vor.u32 %v9079_v38, %v7032_v39  ;;  %v6392_v47 = vld [vmem:[#allocation8 + $0x68] sm:$0xf0]  ;;  %v7232_v38 = vld [vmem:[#allocation8 + $0x6f0] sm:$0xf0]  ;;  %v8928_v23 = vld [vmem:[#allocation8 + $0x6c] sm:$0xf0] }
 0x204   : > { %v6395_v57 = vor.u32 %v8919_v44, %v6392_v47  ;;  %v7235_v44 = vor.u32 %v9128_v37, %v7232_v38  ;;  %v7166_v47 = vld [vmem:[#allocation8 + $0x630] sm:$0xf]  ;;  %v9064_v36 = vld [vmem:[#allocation8 + $0x4b4] sm:$0xf] }
 0x205   : > { %2662 = vmatpush.bf16.msrb.mxu0 %v6711_v20  ;;  %2688 = vmatpush.bf16.msrb.mxu2 %v6715_v55  ;;  %v9063_v20 = vld [vmem:[#allocation8 + $0x4ac] sm:$0xf]  ;;  %v6976_v63 = vld [vmem:[#allocation8 + $0x4f0] sm:$0xf0] }
 0x206   : > { %v6968_v55 = vld [vmem:[#allocation8 + $0x4e8] sm:$0xf0] }
 0x207   : > { %2674 = vmatpush.bf16.msrb.mxu1 %v7287_v58  ;;  %2700 = vmatpush.bf16.msrb.mxu3 %v7291_v59  ;;  %v6847_v58 = vor.u32 %v9040_v49, %v6846_v48  ;;  %v6851_v59 = vor.u32 %v9032_v50, %v6848_v51  ;;  %v6971_v2 = vor.u32 %v9063_v20, %v6968_v55  ;;  %v9120_v48 = vld [vmem:[#allocation8 + $0x66c] sm:$0xf0]  ;;  %v9112_v49 = vld [vmem:[#allocation8 + $0x634] sm:$0xf] }
 0x208   : > { %v7168_v50 = vld [vmem:[#allocation8 + $0x670] sm:$0xf0]  ;;  %v6526_v55 = vld [vmem:[#allocation8 + $0x130] sm:$0xf] }
 0x209   : > { %2663 = vmatpush.bf16.msrb.mxu0 %v6647_v4  ;;  %2689 = vmatpush.bf16.msrb.mxu2 %v6651_v5  ;;  %v6902_v4 = vld [vmem:[#allocation8 + $0x428] sm:$0xf] }
 0x20a   : > { %v9055_v5 = vld [vmem:[#allocation8 + $0x464] sm:$0xf0] }
 0x20b   : > { %2675 = vmatpush.bf16.msrb.mxu1 %v7223_v7  ;;  %2701 = vmatpush.bf16.msrb.mxu3 %v7227_v8  ;;  %v7358_v7 = vld [vmem:[#allocation8 + $0x7b0] sm:$0xf]  ;;  %v6903_v14 = vor.u32 %v9055_v5, %v6902_v4  ;;  %v6531_v5 = vor.u32 %v8952_v60, %v6528_v61  ;;  %v7368_v60 = vld [vmem:[#allocation8 + $0x7f8] sm:$0xf0] }
 0x20c   : > { %v9168_v8 = vld [vmem:[#allocation8 + $0x7ec] sm:$0xf0] }
 0x20d   : > { %2664 = vmatpush.bf16.msrb.mxu0 %v6583_v16  ;;  %2690 = vmatpush.bf16.msrb.mxu2 %v6587_v17  ;;  %v6718_v16 = vld [vmem:[#allocation8 + $0x2b0] sm:$0xf]  ;;  %v7359_v18 = vor.u32 %v9168_v8, %v7358_v7 }
 0x20e   : > { %v9008_v17 = vld [vmem:[#allocation8 + $0x2ec] sm:$0xf0] }
 0x20f   : > { %2676 = vmatpush.bf16.msrb.mxu1 %v7159_v21  ;;  %2702 = vmatpush.bf16.msrb.mxu3 %v7163_v22  ;;  %v9000_v21 = vld [vmem:[#allocation8 + $0x2b4] sm:$0xf]  ;;  %v6719_v27 = vor.u32 %v9008_v17, %v6718_v16 }
 0x210   : > { %v6720_v22 = vld [vmem:[#allocation8 + $0x2f0] sm:$0xf0] }
 0x211   : > { %2665 = vmatpush.bf16.msrb.mxu0 %v6519_v29  ;;  %2691 = vmatpush.bf16.msrb.mxu2 %v6523_v30  ;;  %v6723_v28 = vor.u32 %v9000_v21, %v6720_v22  ;;  %v6654_v29 = vld [vmem:[#allocation8 + $0x230] sm:$0xf]  ;;  %v7040_v16 = vld [vmem:[#allocation8 + $0x570] sm:$0xf0] }
 0x212   : > { %v8992_v30 = vld [vmem:[#allocation8 + $0x26c] sm:$0xf0] }
 0x213   : > { %2677 = vmatpush.bf16.msrb.mxu1 %v7095_v33  ;;  %2703 = vmatpush.bf16.msrb.mxu3 %v7099_v34  ;;  %v7299_v33 = vor.u32 %v9144_v25, %v7296_v62  ;;  %v8984_v34 = vld [vmem:[#allocation8 + $0x234] sm:$0xf]  ;;  %v6655_v39 = vor.u32 %v8992_v30, %v6654_v29  ;;  %v6398_v22 = vld [vmem:[#allocation8 + $0x30] sm:$0xf]  ;;  %v6854_v29 = vld [vmem:[#allocation8 + $0x3b8] sm:$0xf] }
 0x214   : > { %v9041_v30 = vld [vmem:[#allocation8 + $0x3f4] sm:$0xf0]  ;;  %v6399_v37 = vor.u32 %v8928_v23, %v6398_v22 }
 0x215   : > { %2666 = vmatpush.bf16.msrb.mxu0 %v6455_v40  ;;  %2692 = vmatpush.bf16.msrb.mxu2 %v6459_v41  ;;  %v6659_v40 = vor.u32 %v8984_v34, %v6656_v35  ;;  %v6590_v41 = vld [vmem:[#allocation8 + $0x1b0] sm:$0xf]  ;;  %v8993_v22 = vld [vmem:[#allocation8 + $0x274] sm:$0xf0] }
 0x216   : > { %v6591_v53 = vor.u32 %v8976_v42, %v6590_v41  ;;  %v6974_v34 = vld [vmem:[#allocation8 + $0x4b0] sm:$0xf]  ;;  %v6855_v41 = vor.u32 %v9041_v30, %v6854_v29  ;;  %v8985_v29 = vld [vmem:[#allocation8 + $0x23c] sm:$0xf] }
 0x217   : > { %2678 = vmatpush.bf16.msrb.mxu1 %v7031_v45  ;;  %2704 = vmatpush.bf16.msrb.mxu3 %v7035_v46  ;;  %v8968_v45 = vld [vmem:[#allocation8 + $0x1b4] sm:$0xf]  ;;  %v9072_v35 = vld [vmem:[#allocation8 + $0x4ec] sm:$0xf0]  ;;  %v6664_v30 = vld [vmem:[#allocation8 + $0x278] sm:$0xf0] }
 0x218   : > { %v6592_v46 = vld [vmem:[#allocation8 + $0x1f0] sm:$0xf0] }
 0x219   : > { %2667 = vmatpush.bf16.msrb.mxu0 %v6391_v56  ;;  %2693 = vmatpush.bf16.msrb.mxu2 %v6395_v57  ;;  %v10715_v31 = vpop.f32.mrf.mxu0  ;;  %v6595_v20 = vor.u32 %v8968_v45, %v6592_v46  ;;  %v8960_v56 = vld [vmem:[#allocation8 + $0x16c] sm:$0xf0]  ;;  %v9017_v45 = vld [vmem:[#allocation8 + $0x33c] sm:$0xf]  ;;  %v6975_v46 = vor.u32 %v9072_v35, %v6974_v34 }
 0x21a   : > { %v6527_v4 = vor.u32 %v8960_v56, %v6526_v55  ;;  %v9048_v55 = vld [vmem:[#allocation8 + $0x434] sm:$0xf]  ;;  %v9129_v34 = vld [vmem:[#allocation8 + $0x6bc] sm:$0xf] }
 0x21b   : > { %2679 = vmatpush.bf16.msrb.mxu1 %v6967_v1  ;;  %2705 = vmatpush.bf16.msrb.mxu3 %v6971_v2  ;;  %v9104_v1 = vld [vmem:[#allocation8 + $0x5ec] sm:$0xf0]  ;;  %v9096_v2 = vld [vmem:[#allocation8 + $0x5b4] sm:$0xf]  ;;  %v7240_v35 = vld [vmem:[#allocation8 + $0x6f8] sm:$0xf0] }
 0x21c   : > { %2668 = vmatmul.bf16.vlgmr.msrb.gmra.mxu0 %v10688_v54  ;;  %2694 = vmatmul.bf16.vlgmr.msrb.gmra.mxu2 %v10688_v54  ;;  %v7103_v8 = vor.u32 %v9104_v1, %v7102_v0  ;;  %v7107_v9 = vor.u32 %v9096_v2, %v7104_v3  ;;  %v6912_v56 = vld [vmem:[#allocation8 + $0x470] sm:$0xf0] }
 0x21d   : > { %2712 = vmatpush.bf16.msra.mxu0 %v6847_v58  ;;  %2738 = vmatpush.bf16.msra.mxu2 %v6851_v59  ;;  %v7167_v58 = vor.u32 %v9120_v48, %v7166_v47  ;;  %v7171_v59 = vor.u32 %v9112_v49, %v7168_v50  ;;  %v6979_v47 = vor.u32 %v9064_v36, %v6976_v63  ;;  %v6792_v48 = vld [vmem:[#allocation8 + $0x378] sm:$0xf0]  ;;  %v6910_v49 = vld [vmem:[#allocation8 + $0x430] sm:$0xf] }
 0x21e   : > { %v9056_v50 = vld [vmem:[#allocation8 + $0x46c] sm:$0xf0]  ;;  %v6795_v1 = vor.u32 %v9017_v45, %v6792_v48  ;;  %v7174_v45 = vld [vmem:[#allocation8 + $0x638] sm:$0xf]  ;;  %v9113_v48 = vld [vmem:[#allocation8 + $0x63c] sm:$0xf] }
 0x21f   : > { %2680 = vmatpush.bf16.msrb.mxu1 %v6903_v14  ;;  %2706 = vmatpush.bf16.msrb.mxu3 %v6907_v15  ;;  %v10719_v51 = vpop.f32.mrf.mxu1  ;;  %v10721_v52 = vpop.f32.mrf.mxu2  ;;  %v9088_v14 = vld [vmem:[#allocation8 + $0x56c] sm:$0xf0]  ;;  %v9080_v15 = vld [vmem:[#allocation8 + $0x534] sm:$0xf]  ;;  %v6911_v3 = vor.u32 %v9056_v50, %v6910_v49  ;;  %v7176_v49 = vld [vmem:[#allocation8 + $0x678] sm:$0xf0] }
 0x221   : > { %2713 = vmatpush.bf16.msra.mxu0 %v6783_v12  ;;  %2739 = vmatpush.bf16.msra.mxu2 %v6787_v13  ;;  %v2411_v57 = vpop.f32.mrf.mxu0  ;;  %v6464_v12 = vld [vmem:[#allocation8 + $0xf0] sm:$0xf0]  ;;  %v7038_v13 = vld [vmem:[#allocation8 + $0x530] sm:$0xf] }
 0x222   : > { %2681 = vmatmul.bf16.vlgmr.msrb.gmra.mxu1 %v10693_v10  ;;  %2707 = vmatmul.bf16.vlgmr.msrb.gmra.mxu3 %v10693_v10  ;;  %v6467_v21 = vor.u32 %v8936_v11, %v6464_v12  ;;  %v7039_v62 = vor.u32 %v9088_v14, %v7038_v13  ;;  %v7366_v57 = vld [vmem:[#allocation8 + $0x7b8] sm:$0xf]  ;;  %v6728_v11 = vld [vmem:[#allocation8 + $0x2f8] sm:$0xf0] }
 0x223   : > { %2725 = vmatpush.bf16.msra.mxu1 %v7359_v18  ;;  %2751 = vmatpush.bf16.msra.mxu3 %v7363_v19  ;;  %v6463_v19 = vor.u32 %v8944_v6, %v6462_v26  ;;  %v9009_v26 = vld [vmem:[#allocation8 + $0x2f4] sm:$0xf0]  ;;  %v9145_v14 = vld [vmem:[#allocation8 + $0x73c] sm:$0xf] }
 0x224   : > { %v7302_v12 = vld [vmem:[#allocation8 + $0x738] sm:$0xf] }
 0x225   : > { %2714 = vmatpush.bf16.msra.mxu0 %v6719_v27  ;;  %2740 = vmatpush.bf16.msra.mxu2 %v6723_v28  ;;  %v10723_v7 = vpop.f32.mrf.mxu3  ;;  %v7043_v27 = vor.u32 %v9080_v15, %v7040_v16  ;;  %v6400_v28 = vld [vmem:[#allocation8 + $0x70] sm:$0xf0]  ;;  %v9153_v13 = vld [vmem:[#allocation8 + $0x774] sm:$0xf0]  ;;  %v7304_v15 = vld [vmem:[#allocation8 + $0x778] sm:$0xf0] }
 0x226   : > { %v6403_v38 = vor.u32 %v8920_v24, %v6400_v28  ;;  %v7307_v28 = vor.u32 %v9145_v14, %v7304_v15  ;;  %v6470_v15 = vld [vmem:[#allocation8 + $0xb8] sm:$0xf] }
 0x227   : > { %2726 = vmatpush.bf16.msra.mxu1 %v7295_v32  ;;  %2752 = vmatpush.bf16.msra.mxu3 %v7299_v33  ;;  %v2424_v17 = vpop.f32.mrf.mxu1  ;;  %v2437_v18 = vpop.f32.mrf.mxu2  ;;  %v9033_v32 = vld [vmem:[#allocation8 + $0x3bc] sm:$0xf] }
 0x228   : > { %v6856_v33 = vld [vmem:[#allocation8 + $0x3f8] sm:$0xf0] }
 0x229   : > { %2715 = vmatpush.bf16.msra.mxu0 %v6655_v39  ;;  %2741 = vmatpush.bf16.msra.mxu2 %v6659_v40  ;;  %v10725_v25 = vpop.f32.mrf.mxu0  ;;  %v10727_v39 = vld [vmem:[#allocation10] sm:$0xff]  ;;  %v6859_v42 = vor.u32 %v9033_v32, %v6856_v33  ;;  %v7238_v32 = vld [vmem:[#allocation8 + $0x6b8] sm:$0xf] }
 0x22a   : > { %v1088_v2 = vperm.slane %v10727_v39, 0  ;;  %v1089_v17 = vperm.slane %v10727_v39, 1  ;;  %v9137_v33 = vld [vmem:[#allocation8 + $0x6f4] sm:$0xf0]  ;;  %v1090_v63 = vperm.slane %v10727_v39, 2 }
 0x22b   : > { %2727 = vmatpush.bf16.msra.mxu1 %v7231_v43  ;;  %2753 = vmatpush.bf16.msra.mxu3 %v7235_v44  ;;  %v6790_v43 = vld [vmem:[#allocation8 + $0x338] sm:$0xf] }
 0x22c   : > { %v9025_v44 = vld [vmem:[#allocation8 + $0x374] sm:$0xf0]  ;;  %v2410_v23 = vadd.f32 %v10715_v31, %v1088_v2  ;;  %v8953_v2 = vld [vmem:[#allocation8 + $0x13c] sm:$0xf] }
 0x22d   : > { %2716 = vmatpush.bf16.msra.mxu0 %v6591_v53  ;;  %2742 = vmatpush.bf16.msra.mxu2 %v6595_v20  ;;  %v2450_v40 = vpop.f32.mrf.mxu3  ;;  %v6791_v0 = vor.u32 %v9025_v44, %v6790_v43  ;;  %v7243_v43 = vor.u32 %v9129_v34, %v7240_v35  ;;  %v6600_v44 = vld [vmem:[#allocation8 + $0x1f8] sm:$0xf0]  ;;  %v6406_v35 = vld [vmem:[#allocation8 + $0x38] sm:$0xf] }
 0x22e   : > { %v10741_v36 = vadd.f32 %v10719_v51, %v2410_v23  ;;  %v6598_v40 = vld [vmem:[#allocation8 + $0x1b8] sm:$0xf]  ;;  %v8969_v51 = vld [vmem:[#allocation8 + $0x1bc] sm:$0xf] }
 0x22f   : > { %2728 = vmatpush.bf16.msra.mxu1 %v7167_v58  ;;  %2754 = vmatpush.bf16.msra.mxu3 %v7171_v59  ;;  %v10729_v53 = vpop.f32.mrf.mxu1  ;;  %v10731_v20 = vpop.f32.mrf.mxu2  ;;  %v9169_v58 = vld [vmem:[#allocation8 + $0x7f4] sm:$0xf0]  ;;  %v9161_v59 = vld [vmem:[#allocation8 + $0x7bc] sm:$0xf] }
 0x230   : > { %v7367_v6 = vor.u32 %v9169_v58, %v7366_v57  ;;  %v2832_v50 = vmul.f32 0.044715, %v10741_v36  ;;  %v6603_v58 = vor.u32 %v8969_v51, %v6600_v44  ;;  %v7046_v23 = vld [vmem:[#allocation8 + $0x538] sm:$0xf]  ;;  %v9185_v51 = vld [vmem:[#allocation11 + $0x74] sm:$0xf0] }
 0x231   : > { %2717 = vmatpush.bf16.msra.mxu0 %v6527_v4  ;;  %2743 = vmatpush.bf16.msra.mxu2 %v6531_v5  ;;  %v2463_v61 = vpop.f32.mrf.mxu0  ;;  %v6915_v4 = vor.u32 %v9048_v55, %v6912_v56  ;;  %v6726_v5 = vld [vmem:[#allocation8 + $0x2b8] sm:$0xf] }
 0x232   : > { %v6727_v18 = vor.u32 %v9009_v26, %v6726_v5  ;;  %v2462_v61 = vadd.f32 %v10725_v25, %v1090_v63  ;;  %v9097_v26 = vld [vmem:[#allocation8 + $0x5bc] sm:$0xf]  ;;  %v1091_v25 = vperm.slane %v10727_v39, 3  ;;  %v8929_v63 = vld [vmem:[#allocation8 + $0x74] sm:$0xf0] }
 0x233   : > { %2729 = vmatpush.bf16.msra.mxu1 %v7103_v8  ;;  %2755 = vmatpush.bf16.msra.mxu3 %v7107_v9  ;;  %v7371_v8 = vor.u32 %v9161_v59, %v7368_v60  ;;  %v9001_v9 = vld [vmem:[#allocation8 + $0x2bc] sm:$0xf]  ;;  %v6534_v59 = vld [vmem:[#allocation8 + $0x138] sm:$0xf] }
 0x234   : > { %v8961_v60 = vld [vmem:[#allocation8 + $0x174] sm:$0xf0] }
 0x235   : > { %2718 = vmatpush.bf16.msra.mxu0 %v6463_v19  ;;  %2744 = vmatpush.bf16.msra.mxu2 %v6467_v21  ;;  %v10736_v16 = vpop.f32.mrf.mxu3  ;;  %v6731_v19 = vor.u32 %v9001_v9, %v6728_v11  ;;  %v6662_v21 = vld [vmem:[#allocation8 + $0x238] sm:$0xf]  ;;  %v10760_v9 = vadd.f32 %v10729_v53, %v2462_v61 }
 0x236   : > { %v9089_v53 = vld [vmem:[#allocation8 + $0x574] sm:$0xf0] }
 0x237   : > { %2730 = vmatpush.bf16.msra.mxu1 %v7039_v62  ;;  %2756 = vmatpush.bf16.msra.mxu3 %v7043_v27  ;;  %v2476_v24 = vpop.f32.mrf.mxu1  ;;  %v2489_v62 = vpop.f32.mrf.mxu2  ;;  %v7303_v27 = vor.u32 %v9153_v13, %v7302_v12  ;;  %v6535_v13 = vor.u32 %v8961_v60, %v6534_v59  ;;  %v7422_v59 = vld [vmem:[#allocation11 + $0x60] sm:$0xf] }
 0x238   : > { %v9081_v24 = vld [vmem:[#allocation8 + $0x53c] sm:$0xf] }
 0x239   : > { %2719 = vmatpush.bf16.msra.mxu0 %v6399_v37  ;;  %2745 = vmatpush.bf16.msra.mxu2 %v6403_v38  ;;  %v10745_v31 = vpop.f32.mrf.mxu0  ;;  %v6663_v37 = vor.u32 %v8993_v22, %v6662_v21  ;;  %v6667_v38 = vor.u32 %v8985_v29, %v6664_v30  ;;  %v8937_v21 = vld [vmem:[#allocation8 + $0xbc] sm:$0xf]  ;;  %v2488_v29 = vadd.f32 %v10731_v20, %v1091_v25 }
 0x23a   : > { %v6472_v22 = vld [vmem:[#allocation8 + $0xf8] sm:$0xf0] }
 0x23b   : > { %2731 = vmatpush.bf16.msra.mxu1 %v6975_v46  ;;  %2757 = vmatpush.bf16.msra.mxu3 %v6979_v47  ;;  %v2436_v46 = vadd.f32 %v10721_v52, %v1089_v17  ;;  %v9121_v47 = vld [vmem:[#allocation8 + $0x674] sm:$0xf0]  ;;  %v7048_v62 = vld [vmem:[#allocation8 + $0x578] sm:$0xf0]  ;;  %v6475_v34 = vor.u32 %v8937_v21, %v6472_v22 }
 0x23c   : > { %2720 = vmatmul.bf16.vlgmr.msra.gmra.mxu0 %v10688_v54  ;;  %2746 = vmatmul.bf16.vlgmr.msra.gmra.mxu2 %v10688_v54  ;;  %v8945_v17 = vld [vmem:[#allocation8 + $0xf4] sm:$0xf0]  ;;  %v6408_v20 = vld [vmem:[#allocation8 + $0x78] sm:$0xf0] }
 0x23d   : > { %2764 = vmatpush.bf16.msrb.mxu0 %v6855_v41  ;;  %2790 = vmatpush.bf16.msrb.mxu2 %v6859_v42  ;;  %v8977_v41 = vld [vmem:[#allocation8 + $0x1f4] sm:$0xf0]  ;;  %v7239_v42 = vor.u32 %v9137_v33, %v7238_v32  ;;  %v2502_v55 = vpop.f32.mrf.mxu3  ;;  %v10751_v56 = vadd.f32 %v10723_v7, %v2436_v46  ;;  %v6471_v33 = vor.u32 %v8945_v17, %v6470_v15  ;;  %v9217_v46 = vld [vmem:[#allocation11 + $0x174] sm:$0xf0]  ;;  %v7622_v17 = vld [vmem:[#allocation11 + $0x1f0] sm:$0xf] }
 0x23e   : > { %v6599_v57 = vor.u32 %v8977_v41, %v6598_v40  ;;  %v9105_v7 = vld [vmem:[#allocation8 + $0x5f4] sm:$0xf0]  ;;  %v7047_v41 = vor.u32 %v9089_v53, %v7046_v23  ;;  %v6984_v55 = vld [vmem:[#allocation8 + $0x4f8] sm:$0xf0]  ;;  %v9201_v15 = vld [vmem:[#allocation11 + $0xf4] sm:$0xf0] }
 0x23f   : > { %2732 = vmatpush.bf16.msra.mxu1 %v6911_v3  ;;  %2758 = vmatpush.bf16.msra.mxu3 %v6915_v4  ;;  %v10754_v52 = vpop.f32.mrf.mxu2  ;;  %v6536_v3 = vld [vmem:[#allocation8 + $0x178] sm:$0xf0]  ;;  %v7110_v4 = vld [vmem:[#allocation8 + $0x5b8] sm:$0xf]  ;;  %v10756_v5 = vpop.f32.mrf.mxu1  ;;  %v2833_v12 = vmul.f32 0.044715, %v10751_v56 }
 0x240   : > { %v6539_v14 = vor.u32 %v8953_v2, %v6536_v3  ;;  %v7550_v2 = vld [vmem:[#allocation11 + $0x160] sm:$0xf] }
 0x241   : > { %2765 = vmatpush.bf16.msrb.mxu0 %v6791_v0  ;;  %2791 = vmatpush.bf16.msrb.mxu2 %v6795_v1  ;;  %v7175_v0 = vor.u32 %v9121_v47, %v7174_v45  ;;  %v7179_v1 = vor.u32 %v9113_v48, %v7176_v49  ;;  %v2515_v11 = vpop.f32.mrf.mxu0  ;;  %v2849_v30 = vmul.f32 %v2833_v12, %v10751_v56  ;;  %v7558_v45 = vld [vmem:[#allocation11 + $0x170] sm:$0xf]  ;;  %v6982_v47 = vld [vmem:[#allocation8 + $0x4b8] sm:$0xf]  ;;  %v6920_v12 = vld [vmem:[#allocation8 + $0x478] sm:$0xf0] }
 0x242   : > { %2733 = vmatmul.bf16.vlgmr.msra.gmra.mxu1 %v10693_v10  ;;  %2759 = vmatmul.bf16.vlgmr.msra.gmra.mxu3 %v10693_v10  ;;  %v9073_v49 = vld [vmem:[#allocation8 + $0x4f4] sm:$0xf0]  ;;  %v9049_v11 = vld [vmem:[#allocation8 + $0x43c] sm:$0xf] }
 0x243   : > { %2777 = vmatpush.bf16.msrb.mxu1 %v7367_v6  ;;  %2803 = vmatpush.bf16.msrb.mxu3 %v7371_v8  ;;  %v7112_v6 = vld [vmem:[#allocation8 + $0x5f8] sm:$0xf0]  ;;  %v2848_v8 = vmul.f32 %v2832_v50, %v10741_v36 }
 0x244   : > { %v9065_v50 = vld [vmem:[#allocation8 + $0x4bc] sm:$0xf] }
 0x245   : > { %2766 = vmatpush.bf16.msrb.mxu0 %v6727_v18  ;;  %2792 = vmatpush.bf16.msrb.mxu2 %v6731_v19  ;;  %v7111_v18 = vor.u32 %v9105_v7, %v7110_v4  ;;  %v7115_v19 = vor.u32 %v9097_v26, %v7112_v6  ;;  %v10768_v32 = vpop.f32.mrf.mxu3  ;;  %v6983_v4 = vor.u32 %v9073_v49, %v6982_v47  ;;  %v9215_v26 = vld [vmem:[#allocation11 + $0x164] sm:$0xf0] }
 0x246   : > { %v6987_v7 = vor.u32 %v9065_v50, %v6984_v55  ;;  %v6918_v6 = vld [vmem:[#allocation8 + $0x438] sm:$0xf]  ;;  %v7551_v23 = vor.u32 %v9215_v26, %v7550_v2  ;;  %v7478_v50 = vld [vmem:[#allocation11 + $0xd0] sm:$0xf] }
 0x247   : > { %2778 = vmatpush.bf16.msrb.mxu1 %v7303_v27  ;;  %2804 = vmatpush.bf16.msrb.mxu3 %v7307_v28  ;;  %v2864_v27 = vmul.f32 %v2848_v8, %v10741_v36  ;;  %v2834_v28 = vmul.f32 0.044715, %v10760_v9  ;;  %v2541_v40 = vpop.f32.mrf.mxu2  ;;  %v2528_v44 = vpop.f32.mrf.mxu1  ;;  %v9057_v8 = vld [vmem:[#allocation8 + $0x474] sm:$0xf0]  ;;  %v7398_v2 = vld [vmem:[#allocation11 + $0x30] sm:$0xf] }
 0x248   : > { %v7614_v40 = vld [vmem:[#allocation11 + $0x1e0] sm:$0xf]  ;;  %v9211_v49 = vld [vmem:[#allocation11 + $0x144] sm:$0xf0] }
 0x249   : > { %2767 = vmatpush.bf16.msrb.mxu0 %v6663_v37  ;;  %2793 = vmatpush.bf16.msrb.mxu2 %v6667_v38  ;;  %v8921_v37 = vld [vmem:[#allocation8 + $0x3c] sm:$0xf]  ;;  %v10771_v38 = vadd.f32 %v10736_v16, %v2488_v29  ;;  %v2850_v48 = vmul.f32 %v2834_v28, %v10760_v9  ;;  %v2865_v16 = vmul.f32 %v2849_v30, %v10751_v56  ;;  %v9181_v28 = vld [vmem:[#allocation11 + $0x54] sm:$0xf0]  ;;  %v7406_v44 = vld [vmem:[#allocation11 + $0x40] sm:$0xf] }
 0x24a   : > { %v2880_v3 = vadd.f32 %v2864_v27, %v10741_v36  ;;  %v7414_v27 = vld [vmem:[#allocation11 + $0x50] sm:$0xf] }
 0x24b   : > { %2779 = vmatpush.bf16.msrb.mxu1 %v7239_v42  ;;  %2805 = vmatpush.bf16.msrb.mxu3 %v7243_v43  ;;  %v7051_v42 = vor.u32 %v9081_v24, %v7048_v62  ;;  %v7430_v43 = vld [vmem:[#allocation11 + $0x70] sm:$0xf]  ;;  %v2835_v60 = vmul.f32 0.044715, %v10771_v38  ;;  %v2866_v25 = vmul.f32 %v2850_v48, %v10760_v9  ;;  %v6919_v24 = vor.u32 %v9057_v8, %v6918_v6 }
 0x24c   : > { %v7431_v61 = vor.u32 %v9185_v51, %v7430_v43  ;;  %v2896_v53 = vmul.f32 0.7978846, %v2880_v3  ;;  %v6923_v62 = vor.u32 %v9049_v11, %v6920_v12  ;;  %v9177_v3 = vld [vmem:[#allocation11 + $0x34] sm:$0xf0]  ;;  %v7526_v8 = vld [vmem:[#allocation11 + $0x130] sm:$0xf] }
 0x24d   : > { %2768 = vmatpush.bf16.msrb.mxu0 %v6599_v57  ;;  %2794 = vmatpush.bf16.msrb.mxu2 %v6603_v58  ;;  %v6407_v57 = vor.u32 %v8929_v63, %v6406_v35  ;;  %v6411_v58 = vor.u32 %v8921_v37, %v6408_v20  ;;  %v2851_v21 = vmul.f32 %v2835_v60, %v10771_v38  ;;  %v7486_v35 = vld [vmem:[#allocation11 + $0xe0] sm:$0xf]  ;;  %v9199_v37 = vld [vmem:[#allocation11 + $0xe4] sm:$0xf0]  ;;  %v1092_v20 = vperm.slane %v10727_v39, 4 }
 0x24e   : > { %v2882_v63 = vadd.f32 %v2866_v25, %v10760_v9  ;;  %9692 = vtanh.f32 %v2896_v53  ;;  %v7487_v47 = vor.u32 %v9199_v37, %v7486_v35  ;;  %v9209_v25 = vld [vmem:[#allocation11 + $0x134] sm:$0xf0]  ;;  %v9195_v11 = vld [vmem:[#allocation11 + $0xc4] sm:$0xf0]  ;;  %v7598_v12 = vld [vmem:[#allocation11 + $0x1c0] sm:$0xf] }
 0x24f   : > { %2780 = vmatpush.bf16.msrb.mxu1 %v7175_v0  ;;  %2806 = vmatpush.bf16.msrb.mxu3 %v7179_v1  ;;  %v7559_v0 = vor.u32 %v9217_v46, %v7558_v45  ;;  %v9183_v1 = vld [vmem:[#allocation11 + $0x64] sm:$0xf0]  ;;  %v7534_v46 = vld [vmem:[#allocation11 + $0x140] sm:$0xf]  ;;  %v9225_v35 = vld [vmem:[#allocation11 + $0x1b4] sm:$0xf0] }
 0x250   : > { %v7423_v22 = vor.u32 %v9183_v1, %v7422_v59  ;;  %v9179_v45 = vld [vmem:[#allocation11 + $0x44] sm:$0xf0]  ;;  %v2898_v55 = vmul.f32 0.7978846, %v2882_v63  ;;  %v9229_v59 = vld [vmem:[#allocation11 + $0x1d4] sm:$0xf0]  ;;  %v7535_v1 = vor.u32 %v9211_v49, %v7534_v46 }
 0x251   : > { %2769 = vmatpush.bf16.msrb.mxu0 %v6535_v13  ;;  %2795 = vmatpush.bf16.msrb.mxu2 %v6539_v14  ;;  %v7494_v13 = vld [vmem:[#allocation11 + $0xf0] sm:$0xf]  ;;  %v2554_v14 = vpop.f32.mrf.mxu3  ;;  %v7390_v53 = vld [vmem:[#allocation11 + $0x20] sm:$0xf] }
 0x252   : > { %v7495_v29 = vor.u32 %v9201_v15, %v7494_v13  ;;  %v9227_v13 = vld [vmem:[#allocation11 + $0x1c4] sm:$0xf0]  ;;  %v10794_v15 = vmul.f32 0.5, %v10741_v36 }
 0x253   : > { %2781 = vmatpush.bf16.msrb.mxu1 %v7111_v18  ;;  %2807 = vmatpush.bf16.msrb.mxu3 %v7115_v19  ;;  %v9233_v18 = vld [vmem:[#allocation11 + $0x1f4] sm:$0xf0]  ;;  %v2881_v19 = vadd.f32 %v2865_v16, %v10751_v56 }
 0x254   : > { %v7623_v30 = vor.u32 %v9233_v18, %v7622_v17  ;;  %v1094_v18 = vperm.slane %v10727_v39, 6 }
 0x255   : > { %2770 = vmatpush.bf16.msrb.mxu0 %v6471_v33  ;;  %2796 = vmatpush.bf16.msrb.mxu2 %v6475_v34  ;;  %v7542_v33 = vld [vmem:[#allocation11 + $0x150] sm:$0xf]  ;;  %v9213_v34 = vld [vmem:[#allocation11 + $0x154] sm:$0xf0]  ;;  %v2897_v43 = vmul.f32 0.7978846, %v2881_v19  ;;  %v7399_v19 = vor.u32 %v9177_v3, %v7398_v2 }
 0x256   : > { %v7543_v51 = vor.u32 %v9213_v34, %v7542_v33  ;;  %v9193_v33 = vld [vmem:[#allocation11 + $0xb4] sm:$0xf0]  ;;  %v7590_v34 = vld [vmem:[#allocation11 + $0x1b0] sm:$0xf]  ;;  %v9171_v3 = vld [vmem:[#allocation11 + $0x4] sm:$0xf0] }
 0x257   : > { %2782 = vmatpush.bf16.msrb.mxu1 %v7047_v41  ;;  %2808 = vmatpush.bf16.msrb.mxu3 %v7051_v42  ;;  %v9231_v41 = vld [vmem:[#allocation11 + $0x1e4] sm:$0xf0]  ;;  %v2867_v42 = vmul.f32 %v2851_v21, %v10771_v38  ;;  %9694 = vtanh.f32 %v2897_v43  ;;  %v7527_v21 = vor.u32 %v9209_v25, %v7526_v8  ;;  %v7591_v46 = vor.u32 %v9225_v35, %v7590_v34  ;;  %v7686_v25 = vld [vmem:[#allocation11 + $0x270] sm:$0xf]  ;;  %v7806_v34 = vld [vmem:[#allocation11 + $0x360] sm:$0xf] }
 0x258   : > { %v7615_v48 = vor.u32 %v9231_v41, %v7614_v40  ;;  %9696 = vtanh.f32 %v2898_v55  ;;  %v2818_v41 = vmul.f32 0.5, %v10760_v9  ;;  %v7582_v55 = vld [vmem:[#allocation11 + $0x1a0] sm:$0xf]  ;;  %v9279_v35 = vld [vmem:[#allocation11 + $0x364] sm:$0xf0] }
 0x259   : > { %2771 = vmatpush.bf16.msrb.mxu0 %v6407_v57  ;;  %2797 = vmatpush.bf16.msrb.mxu2 %v6411_v58  ;;  %v2565_v16 = vpop.f32.mrf.mxu0  ;;  %v9197_v57 = vld [vmem:[#allocation11 + $0xd4] sm:$0xf0]  ;;  %v7606_v58 = vld [vmem:[#allocation11 + $0x1d0] sm:$0xf]  ;;  %v2883_v60 = vadd.f32 %v2867_v42, %v10771_v38 }
 0x25a   : > { %v7479_v26 = vor.u32 %v9197_v57, %v7478_v50  ;;  %v7607_v6 = vor.u32 %v9229_v59, %v7606_v58  ;;  %v2566_v42 = vadd.f32 %v2565_v16, %v1094_v18  ;;  %v9191_v50 = vld [vmem:[#allocation11 + $0xa4] sm:$0xf0]  ;;  %v7374_v58 = vld [vmem:[#allocation11] sm:$0xf]  ;;  %v7446_v18 = vld [vmem:[#allocation11 + $0x90] sm:$0xf] }
 0x25b   : > { %2783 = vmatpush.bf16.msrb.mxu1 %v6983_v4  ;;  %2809 = vmatpush.bf16.msrb.mxu3 %v6987_v7  ;;  %v9693_v4 = vpop.eup %9692  ;;  %v2514_v7 = vadd.f32 %v10745_v31, %v1092_v20  ;;  %v10797_v31 = vmul.f32 0.5, %v10751_v56  ;;  %v2899_v17 = vmul.f32 0.7978846, %v2883_v60  ;;  %v1095_v20 = vperm.slane %v10727_v39, 7  ;;  %v9223_v16 = vld [vmem:[#allocation11 + $0x1a4] sm:$0xf0] }
 0x25c   : > { %2772 = vmatmul.bf16.vlgmr.msrb.gmra.mxu0 %v10688_v54  ;;  %2798 = vmatmul.bf16.vlgmr.msrb.gmra.mxu2 %v10688_v54  ;;  %v7415_v54 = vor.u32 %v9181_v28, %v7414_v27  ;;  %v7518_v27 = vld [vmem:[#allocation11 + $0x120] sm:$0xf]  ;;  %v9207_v28 = vld [vmem:[#allocation11 + $0x124] sm:$0xf0]  ;;  %v7583_v8 = vor.u32 %v9223_v16, %v7582_v55  ;;  %v7807_v55 = vor.u32 %v9279_v35, %v7806_v34  ;;  %v2819_v16 = vmul.f32 0.5, %v10771_v38 }
 0x25d   : > { %4518 = vmatpush.bf16.msra.mxu0 %v7431_v61  ;;  %4544 = vmatpush.bf16.msra.mxu2 %v7559_v0  ;;  %v1093_v61 = vperm.slane %v10727_v39, 5  ;;  %v7407_v0 = vor.u32 %v9179_v45, %v7406_v44  ;;  %v10791_v14 = vadd.f32 %v10756_v5, %v2514_v7  ;;  %v10802_v5 = vadd.f32 1.0, %v9693_v4  ;;  %v9695_v63 = vpop.eup %9694  ;;  %v9173_v44 = vld [vmem:[#allocation11 + $0x14] sm:$0xf0]  ;;  %v7502_v4 = vld [vmem:[#allocation11 + $0x100] sm:$0xf] }
 0x25e   : > { %9698 = vtanh.f32 %v2899_v17  ;;  %v2929_v60 = vadd.f32 1.0, %v9695_v63  ;;  %v9203_v7 = vld [vmem:[#allocation11 + $0x104] sm:$0xf0]  ;;  %v9281_v17 = vld [vmem:[#allocation11 + $0x374] sm:$0xf0] }
 0x25f   : > { %2784 = vmatpush.bf16.msrb.mxu1 %v6919_v24  ;;  %2810 = vmatpush.bf16.msrb.mxu3 %v6923_v62  ;;  %v9175_v24 = vld [vmem:[#allocation11 + $0x24] sm:$0xf0]  ;;  %v2540_v36 = vadd.f32 %v10754_v52, %v1093_v61  ;;  %v7599_v62 = vor.u32 %v9227_v13, %v7598_v12  ;;  %v2836_v37 = vmul.f32 0.044715, %v10791_v14  ;;  %v9697_v52 = vpop.eup %9696  ;;  %v7654_v35 = vld [vmem:[#allocation11 + $0x230] sm:$0xf] }
 0x260   : > { %v7391_v43 = vor.u32 %v9175_v24, %v7390_v53  ;;  %v2930_v59 = vadd.f32 1.0, %v9697_v52  ;;  %v9221_v53 = vld [vmem:[#allocation11 + $0x194] sm:$0xf0]  ;;  %v2944_v24 = vmul.f32 %v10802_v5, %v10794_v15  ;;  %v9187_v52 = vld [vmem:[#allocation11 + $0x84] sm:$0xf0] }
 0x261   : > { %4519 = vmatpush.bf16.msra.mxu0 %v7423_v22  ;;  %4545 = vmatpush.bf16.msra.mxu2 %v7551_v23  ;;  %v2578_v22 = vpop.f32.mrf.mxu1  ;;  %v10800_v23 = vpop.f32.mrf.mxu2  ;;  %v10807_v40 = vadd.f32 %v10768_v32, %v2540_v36  ;;  %v9205_v32 = vld [vmem:[#allocation11 + $0x114] sm:$0xf0]  ;;  %v2852_v57 = vmul.f32 %v2836_v37, %v10791_v14 }
 0x262   : > { %2785 = vmatmul.bf16.vlgmr.msrb.gmra.mxu1 %v10693_v10  ;;  %2811 = vmatmul.bf16.vlgmr.msrb.gmra.mxu3 %v10693_v10  ;;  %v7470_v10 = vld [vmem:[#allocation11 + $0xc0] sm:$0xf]  ;;  %v10811_v49 = vadd.f32 %v2578_v22, %v2566_v42  ;;  %v2592_v13 = vadd.f32 %v10800_v23, %v1095_v20  ;;  %v7574_v22 = vld [vmem:[#allocation11 + $0x190] sm:$0xf]  ;;  %v2946_v36 = vmul.f32 %v2930_v59, %v2818_v41 }
 0x263   : > { %4531 = vmatpush.bf16.msra.mxu1 %v7495_v29  ;;  %4557 = vmatpush.bf16.msra.mxu3 %v7623_v30  ;;  %v7471_v56 = vor.u32 %v9195_v11, %v7470_v10  ;;  %v7462_v29 = vld [vmem:[#allocation11 + $0xb0] sm:$0xf]  ;;  %v2567_v30 = vpop.f32.mrf.mxu0  ;;  %v10815_v39 = vmul.f32 0.044715, %v10807_v40  ;;  %v9249_v10 = vld [vmem:[#allocation11 + $0x274] sm:$0xf0]  ;;  %v7575_v15 = vor.u32 %v9221_v53, %v7574_v22  ;;  %v10825_v20 = vpack.c.bf16 %v2944_v24, %v2944_v24 }
 0x264   : > { %v7463_v45 = vor.u32 %v9193_v33, %v7462_v29  ;;  %v7814_v11 = vld [vmem:[#allocation11 + $0x370] sm:$0xf]  ;;  %v2838_v12 = vmul.f32 0.044715, %v10811_v49  ;;  %v7687_v23 = vor.u32 %v9249_v10, %v7686_v25  ;;  %v9247_v33 = vld [vmem:[#allocation11 + $0x264] sm:$0xf0] }
 0x265   : > { %4520 = vmatpush.bf16.msra.mxu0 %v7415_v54  ;;  %4546 = vmatpush.bf16.msra.mxu2 %v7543_v51  ;;  %v7519_v54 = vor.u32 %v9207_v28, %v7518_v27  ;;  %v7382_v51 = vld [vmem:[#allocation11 + $0x10] sm:$0xf]  ;;  %v2604_v9 = vpop.f32.mrf.mxu3  ;;  %v7503_v27 = vor.u32 %v9203_v7, %v7502_v4  ;;  %v7678_v28 = vld [vmem:[#allocation11 + $0x260] sm:$0xf]  ;;  %v7815_v30 = vor.u32 %v9281_v17, %v7814_v11  ;;  %v9263_v4 = vld [vmem:[#allocation11 + $0x2e4] sm:$0xf0] }
 0x266   : > { %v7383_v61 = vor.u32 %v9173_v44, %v7382_v51  ;;  %v2854_v63 = vmul.f32 %v2838_v12, %v10811_v49  ;;  %v7438_v41 = vld [vmem:[#allocation11 + $0x80] sm:$0xf]  ;;  %v9265_v51 = vld [vmem:[#allocation11 + $0x2f4] sm:$0xf0]  ;;  %v9243_v12 = vld [vmem:[#allocation11 + $0x244] sm:$0xf0] }
 0x267   : > { %4532 = vmatpush.bf16.msra.mxu1 %v7487_v47  ;;  %4558 = vmatpush.bf16.msra.mxu3 %v7615_v48  ;;  %v7510_v47 = vld [vmem:[#allocation11 + $0x110] sm:$0xf]  ;;  %v7454_v48 = vld [vmem:[#allocation11 + $0xa0] sm:$0xf]  ;;  %v9275_v53 = vld [vmem:[#allocation11 + $0x344] sm:$0xf0] }
 0x268   : > { %v7566_v42 = vld [vmem:[#allocation11 + $0x180] sm:$0xf]  ;;  %v7734_v24 = vld [vmem:[#allocation11 + $0x2d0] sm:$0xf] }
 0x269   : > { %4521 = vmatpush.bf16.msra.mxu0 %v7407_v0  ;;  %4547 = vmatpush.bf16.msra.mxu2 %v7535_v1  ;;  %v7511_v0 = vor.u32 %v9205_v32, %v7510_v47  ;;  %v2580_v1 = vpop.f32.mrf.mxu1  ;;  %v2593_v2 = vpop.f32.mrf.mxu2  ;;  %v9297_v47 = vld [vmem:[#allocation11 + $0x3f4] sm:$0xf0]  ;;  %v2945_v32 = vmul.f32 %v2929_v60, %v10797_v31  ;;  %v7870_v7 = vld [vmem:[#allocation11 + $0x3e0] sm:$0xf] }
 0x26a   : > { %v7798_v1 = vld [vmem:[#allocation11 + $0x350] sm:$0xf]  ;;  %v9277_v2 = vld [vmem:[#allocation11 + $0x354] sm:$0xf0]  ;;  %v7662_v11 = vld [vmem:[#allocation11 + $0x240] sm:$0xf] }
 0x26b   : > { %4533 = vmatpush.bf16.msra.mxu1 %v7479_v26  ;;  %4559 = vmatpush.bf16.msra.mxu3 %v7607_v6  ;;  %v9699_v26 = vpop.eup %9698  ;;  %v7455_v6 = vor.u32 %v9191_v50, %v7454_v48  ;;  %v7679_v50 = vor.u32 %v9247_v33, %v7678_v28  ;;  %v7799_v10 = vor.u32 %v9277_v2, %v7798_v1  ;;  %v7790_v22 = vld [vmem:[#allocation11 + $0x340] sm:$0xf]  ;;  %v7862_v28 = vld [vmem:[#allocation11 + $0x3d0] sm:$0xf]  ;;  %v9289_v1 = vld [vmem:[#allocation11 + $0x3b4] sm:$0xf0] }
 0x26c   : > { %v2931_v29 = vadd.f32 1.0, %v9699_v26  ;;  %v9295_v26 = vld [vmem:[#allocation11 + $0x3e4] sm:$0xf0]  ;;  %v7663_v33 = vor.u32 %v9243_v12, %v7662_v11  ;;  %v7791_v34 = vor.u32 %v9275_v53, %v7790_v22  ;;  %v10856_v11 = vmul.f32 0.5, %v10807_v40 }
 0x26d   : > { %4522 = vmatpush.bf16.msra.mxu0 %v7399_v19  ;;  %4548 = vmatpush.bf16.msra.mxu2 %v7527_v21  ;;  %v2868_v19 = vmul.f32 %v2852_v57, %v10791_v14  ;;  %v9189_v21 = vld [vmem:[#allocation11 + $0x94] sm:$0xf0]  ;;  %v2606_v5 = vpop.f32.mrf.mxu3  ;;  %v2870_v57 = vmul.f32 %v2854_v63, %v10811_v49 }
 0x26e   : > { %v7447_v37 = vor.u32 %v9189_v21, %v7446_v18  ;;  %v2947_v60 = vmul.f32 %v2931_v29, %v2819_v16  ;;  %v7871_v21 = vor.u32 %v9295_v26, %v7870_v7  ;;  %v9293_v29 = vld [vmem:[#allocation11 + $0x3d4] sm:$0xf0]  ;;  %v9239_v16 = vld [vmem:[#allocation11 + $0x224] sm:$0xf0] }
 0x26f   : > { %4534 = vmatpush.bf16.msra.mxu1 %v7471_v56  ;;  %4560 = vmatpush.bf16.msra.mxu3 %v7599_v62  ;;  %v10822_v56 = vadd.f32 %v2604_v9, %v2592_v13  ;;  %v7375_v62 = vor.u32 %v9171_v3, %v7374_v58  ;;  %v2884_v48 = vadd.f32 %v2868_v19, %v10791_v14  ;;  %v7742_v3 = vld [vmem:[#allocation11 + $0x2e0] sm:$0xf]  ;;  %v9241_v63 = vld [vmem:[#allocation11 + $0x234] sm:$0xf0] }
 0x270   : > { %v2853_v9 = vmul.f32 %v10815_v39, %v10807_v40  ;;  %v7439_v58 = vor.u32 %v9187_v52, %v7438_v41  ;;  %v2886_v17 = vadd.f32 %v2870_v57, %v10811_v49  ;;  %v10843_v18 = vpack.c.bf16 %v2947_v60, %v2947_v60  ;;  %v7782_v41 = vld [vmem:[#allocation11 + $0x330] sm:$0xf]  ;;  %v9273_v52 = vld [vmem:[#allocation11 + $0x334] sm:$0xf0]  ;;  %v7774_v57 = vld [vmem:[#allocation11 + $0x320] sm:$0xf] }
 0x271   : > { %4523 = vmatpush.bf16.msra.mxu0 %v7391_v43  ;;  %4549 = vmatpush.bf16.msra.mxu2 %v7519_v54  ;;  %v9219_v43 = vld [vmem:[#allocation11 + $0x184] sm:$0xf0]  ;;  %v7750_v54 = vld [vmem:[#allocation11 + $0x2f0] sm:$0xf]  ;;  %v2839_v44 = vmul.f32 0.044715, %v10822_v56  ;;  %v7743_v19 = vor.u32 %v9263_v4, %v7742_v3  ;;  %v7863_v5 = vor.u32 %v9293_v29, %v7862_v28 }
 0x272   : > { %v7567_v59 = vor.u32 %v9219_v43, %v7566_v42  ;;  %v7751_v31 = vor.u32 %v9265_v51, %v7750_v54  ;;  %v2900_v13 = vmul.f32 0.7978846, %v2884_v48  ;;  %v7726_v42 = vld [vmem:[#allocation11 + $0x2c0] sm:$0xf]  ;;  %v9259_v43 = vld [vmem:[#allocation11 + $0x2c4] sm:$0xf0]  ;;  %v7783_v48 = vor.u32 %v9273_v52, %v7782_v41 }
 0x273   : > { %4535 = vmatpush.bf16.msra.mxu1 %v7463_v45  ;;  %4561 = vmatpush.bf16.msra.mxu3 %v7591_v46  ;;  %v10828_v45 = vpack.c.bf16 %v2946_v36, %v2946_v36  ;;  %v7878_v46 = vld [vmem:[#allocation11 + $0x3f0] sm:$0xf]  ;;  %v2855_v38 = vmul.f32 %v2839_v44, %v10822_v56  ;;  %v7854_v54 = vld [vmem:[#allocation11 + $0x3c0] sm:$0xf]  ;;  %v9291_v51 = vld [vmem:[#allocation11 + $0x3c4] sm:$0xf0] }
 0x274   : > { %v7879_v39 = vor.u32 %v9297_v47, %v7878_v46  ;;  %9700 = vtanh.f32 %v2900_v13  ;;  %v7846_v60 = vld [vmem:[#allocation11 + $0x3b0] sm:$0xf]  ;;  %v9235_v28 = vld [vmem:[#allocation11 + $0x204] sm:$0xf0] }
 0x275   : > { %4524 = vmatpush.bf16.msra.mxu0 %v7383_v61  ;;  %4550 = vmatpush.bf16.msra.mxu2 %v7511_v0  ;;  %v7670_v61 = vld [vmem:[#allocation11 + $0x250] sm:$0xf]  ;;  %v9245_v0 = vld [vmem:[#allocation11 + $0x254] sm:$0xf0]  ;;  %v2871_v36 = vmul.f32 %v2855_v38, %v10822_v56  ;;  %v2820_v38 = vmul.f32 0.5, %v10791_v14 }
 0x276   : > { %v7671_v25 = vor.u32 %v9245_v0, %v7670_v61  ;;  %v9271_v61 = vld [vmem:[#allocation11 + $0x324] sm:$0xf0]  ;;  %v7718_v0 = vld [vmem:[#allocation11 + $0x2b0] sm:$0xf] }
 0x277   : > { %4536 = vmatpush.bf16.msra.mxu1 %v7455_v6  ;;  %4562 = vmatpush.bf16.msra.mxu3 %v7583_v8  ;;  %v2869_v6 = vmul.f32 %v2853_v9, %v10807_v40  ;;  %v10840_v8 = vpack.c.bf16 %v2945_v32, %v2945_v32  ;;  %v2887_v44 = vadd.f32 %v2871_v36, %v10822_v56  ;;  %v7766_v14 = vld [vmem:[#allocation11 + $0x310] sm:$0xf]  ;;  %v7838_v36 = vld [vmem:[#allocation11 + $0x3a0] sm:$0xf] }
 0x278   : > { %v7655_v32 = vor.u32 %v9241_v63, %v7654_v35 }
 0x279   : > { %4525 = vmatpush.bf16.msra.mxu0 %v7375_v62  ;;  %4551 = vmatpush.bf16.msra.mxu2 %v7503_v27  ;;  %v2617_v62 = vpop.f32.mrf.mxu0  ;;  %v9261_v27 = vld [vmem:[#allocation11 + $0x2d4] sm:$0xf0]  ;;  %v2903_v2 = vmul.f32 0.7978846, %v2887_v44  ;;  %v7702_v44 = vld [vmem:[#allocation11 + $0x290] sm:$0xf] }
 0x27a   : > { %v9701_v4 = vpop.eup %9700 }
 0x27b   : > { %4537 = vmatpush.bf16.msra.mxu1 %v7447_v37  ;;  %4563 = vmatpush.bf16.msra.mxu3 %v7575_v15  ;;  %v2902_v37 = vmul.f32 0.7978846, %v2886_v17  ;;  %v7735_v15 = vor.u32 %v9261_v27, %v7734_v24  ;;  %v7847_v17 = vor.u32 %v9289_v1, %v7846_v60  ;;  %v9255_v24 = vld [vmem:[#allocation11 + $0x2a4] sm:$0xf0]  ;;  %v7630_v27 = vld [vmem:[#allocation11 + $0x200] sm:$0xf] }
 0x27c   : > { %4526 = vmatmul.bf16.vlgmr.msra.gmra.mxu0 %v10825_v20  ;;  %4552 = vmatmul.bf16.vlgmr.msra.gmra.mxu2 %v10828_v45  ;;  %v2932_v29 = vadd.f32 1.0, %v9701_v4  ;;  %v7694_v1 = vld [vmem:[#allocation11 + $0x280] sm:$0xf] }
 0x27d   : > { %4570 = vmatpush.bf16.msrb.mxu0 %v7687_v23  ;;  %4596 = vmatpush.bf16.msrb.mxu2 %v7815_v30  ;;  %v10848_v23 = vld [vmem:[#allocation10 + $0x8] sm:$0xff]  ;;  %v2885_v30 = vadd.f32 %v2869_v6, %v10807_v40  ;;  %9702 = vtanh.f32 %v2902_v37  ;;  %v7775_v6 = vor.u32 %v9271_v61, %v7774_v57  ;;  %v2822_v40 = vmul.f32 0.5, %v10811_v49  ;;  %v7758_v37 = vld [vmem:[#allocation11 + $0x300] sm:$0xf]  ;;  %v9311_v61 = vld [vmem:[#allocation11 + $0x464] sm:$0xf0] }
 0x27e   : > { %v1096_v46 = vperm.slane %v10848_v23, 0  ;;  %v1097_v7 = vperm.slane %v10848_v23, 1 }
 0x27f   : > { %4538 = vmatpush.bf16.msra.mxu1 %v7439_v58  ;;  %4564 = vmatpush.bf16.msra.mxu3 %v7567_v59  ;;  %v2901_v47 = vmul.f32 0.7978846, %v2885_v30  ;;  %v2630_v9 = vpop.f32.mrf.mxu1  ;;  %v7727_v58 = vor.u32 %v9259_v43, %v7726_v42  ;;  %v7855_v59 = vor.u32 %v9291_v51, %v7854_v54  ;;  %v9313_v54 = vld [vmem:[#allocation11 + $0x474] sm:$0xf0] }
 0x280   : > { %v2618_v3 = vadd.f32 %v2617_v62, %v1096_v46  ;;  %v9287_v62 = vld [vmem:[#allocation11 + $0x3a4] sm:$0xf0]  ;;  %v9253_v46 = vld [vmem:[#allocation11 + $0x294] sm:$0xf0] }
 0x281   : > { %4571 = vmatpush.bf16.msrb.mxu0 %v7679_v50  ;;  %4597 = vmatpush.bf16.msrb.mxu2 %v7807_v55  ;;  %v2643_v50 = vpop.f32.mrf.mxu2  ;;  %v7646_v55 = vld [vmem:[#allocation11 + $0x220] sm:$0xf]  ;;  %9704 = vtanh.f32 %v2901_v47  ;;  %v7839_v43 = vor.u32 %v9287_v62, %v7838_v36  ;;  %v7830_v47 = vld [vmem:[#allocation11 + $0x390] sm:$0xf] }
 0x282   : > { %4539 = vmatmul.bf16.vlgmr.msra.gmra.mxu1 %v10840_v8  ;;  %4565 = vmatmul.bf16.vlgmr.msra.gmra.mxu3 %v10843_v18  ;;  %v7647_v26 = vor.u32 %v9239_v16, %v7646_v55  ;;  %v10858_v12 = vadd.f32 %v2630_v9, %v2618_v3  ;;  %9706 = vtanh.f32 %v2903_v2  ;;  %v2644_v30 = vadd.f32 %v2643_v50, %v1097_v7  ;;  %v8070_v9 = vld [vmem:[#allocation11 + $0x570] sm:$0xf]  ;;  %v9345_v50 = vld [vmem:[#allocation11 + $0x574] sm:$0xf0]  ;;  %v9251_v2 = vld [vmem:[#allocation11 + $0x284] sm:$0xf0] }
 0x283   : > { %4583 = vmatpush.bf16.msrb.mxu1 %v7751_v31  ;;  %4609 = vmatpush.bf16.msrb.mxu3 %v7879_v39  ;;  %v9257_v31 = vld [vmem:[#allocation11 + $0x2b4] sm:$0xf0]  ;;  %v2619_v39 = vpop.f32.mrf.mxu0  ;;  %v9703_v22 = vpop.eup %9702  ;;  %v7631_v16 = vor.u32 %v9235_v28, %v7630_v27  ;;  %v7822_v3 = vld [vmem:[#allocation11 + $0x380] sm:$0xf]  ;;  %v7695_v27 = vor.u32 %v9251_v2, %v7694_v1  ;;  %v2823_v28 = vmul.f32 0.5, %v10822_v56 }
 0x284   : > { %v7719_v13 = vor.u32 %v9257_v31, %v7718_v0  ;;  %v2840_v52 = vmul.f32 0.044715, %v10858_v12  ;;  %v2934_v51 = vadd.f32 1.0, %v9703_v22  ;;  %v7703_v39 = vor.u32 %v9253_v46, %v7702_v44  ;;  %v9343_v22 = vld [vmem:[#allocation11 + $0x564] sm:$0xf0] }
 0x285   : > { %4572 = vmatpush.bf16.msrb.mxu0 %v7671_v25  ;;  %4598 = vmatpush.bf16.msrb.mxu2 %v7799_v10  ;;  %v7638_v25 = vld [vmem:[#allocation11 + $0x210] sm:$0xf]  ;;  %v9237_v10 = vld [vmem:[#allocation11 + $0x214] sm:$0xf0]  ;;  %v2656_v53 = vpop.f32.mrf.mxu3  ;;  %v8126_v56 = vld [vmem:[#allocation11 + $0x5e0] sm:$0xf] }
 0x286   : > { %v10862_v49 = vadd.f32 %v2656_v53, %v2644_v30  ;;  %v2856_v31 = vmul.f32 %v2840_v52, %v10858_v12  ;;  %v2950_v60 = vmul.f32 %v2934_v51, %v2822_v40  ;;  %v8134_v53 = vld [vmem:[#allocation11 + $0x5f0] sm:$0xf]  ;;  %v9359_v52 = vld [vmem:[#allocation11 + $0x5e4] sm:$0xf0]  ;;  %v7918_v46 = vld [vmem:[#allocation11 + $0x440] sm:$0xf] }
 0x287   : > { %4584 = vmatpush.bf16.msrb.mxu1 %v7743_v19  ;;  %4610 = vmatpush.bf16.msrb.mxu3 %v7871_v21  ;;  %v9269_v19 = vld [vmem:[#allocation11 + $0x314] sm:$0xf0]  ;;  %v7710_v21 = vld [vmem:[#allocation11 + $0x2a0] sm:$0xf]  ;;  %v2632_v35 = vpop.f32.mrf.mxu1  ;;  %v9705_v41 = vpop.eup %9704  ;;  %v7910_v1 = vld [vmem:[#allocation11 + $0x430] sm:$0xf] }
 0x288   : > { %v7711_v42 = vor.u32 %v9255_v24, %v7710_v21  ;;  %v9707_v55 = vpop.eup %9706  ;;  %v2933_v0 = vadd.f32 1.0, %v9705_v41  ;;  %v9361_v24 = vld [vmem:[#allocation11 + $0x5f4] sm:$0xf0]  ;;  %v2872_v36 = vmul.f32 %v2856_v31, %v10858_v12  ;;  %v10870_v62 = vpack.c.bf16 %v2950_v60, %v2950_v60  ;;  %v7998_v35 = vld [vmem:[#allocation11 + $0x4e0] sm:$0xf] }
 0x289   : > { %4573 = vmatpush.bf16.msrb.mxu0 %v7663_v33  ;;  %4599 = vmatpush.bf16.msrb.mxu2 %v7791_v34  ;;  %v7639_v33 = vor.u32 %v9237_v10, %v7638_v25  ;;  %v7767_v34 = vor.u32 %v9269_v19, %v7766_v14  ;;  %v2645_v63 = vpop.f32.mrf.mxu2  ;;  %v8071_v25 = vor.u32 %v9345_v50, %v8070_v9  ;;  %v9329_v10 = vld [vmem:[#allocation11 + $0x4f4] sm:$0xf0] }
 0x28a   : > { %v2949_v21 = vmul.f32 %v2933_v0, %v10856_v11  ;;  %v9327_v63 = vld [vmem:[#allocation11 + $0x4e4] sm:$0xf0]  ;;  %v9341_v41 = vld [vmem:[#allocation11 + $0x554] sm:$0xf0]  ;;  %v1098_v0 = vperm.slane %v10848_v23, 2 }
 0x28b   : > { %4585 = vmatpush.bf16.msrb.mxu1 %v7735_v15  ;;  %4611 = vmatpush.bf16.msrb.mxu3 %v7863_v5  ;;  %v9267_v15 = vld [vmem:[#allocation11 + $0x304] sm:$0xf0]  ;;  %v7942_v5 = vld [vmem:[#allocation11 + $0x470] sm:$0xf]  ;;  %v7999_v44 = vor.u32 %v9327_v63, %v7998_v35  ;;  %v9325_v9 = vld [vmem:[#allocation11 + $0x4d4] sm:$0xf0] }
 0x28c   : > { %v7759_v57 = vor.u32 %v9267_v15, %v7758_v37  ;;  %v8135_v15 = vor.u32 %v9361_v24, %v8134_v53  ;;  %v10878_v51 = vpack.c.bf16 %v2949_v21, %v2949_v21  ;;  %v9305_v2 = vld [vmem:[#allocation11 + $0x434] sm:$0xf0]  ;;  %v1099_v21 = vperm.slane %v10848_v23, 3  ;;  %v9335_v35 = vld [vmem:[#allocation11 + $0x524] sm:$0xf0] }
 0x28d   : > { %4574 = vmatpush.bf16.msrb.mxu0 %v7655_v32  ;;  %4600 = vmatpush.bf16.msrb.mxu2 %v7783_v48  ;;  %v9285_v32 = vld [vmem:[#allocation11 + $0x394] sm:$0xf0]  ;;  %v2948_v48 = vmul.f32 %v2932_v29, %v2820_v38  ;;  %v2841_v38 = vmul.f32 0.044715, %v10862_v49  ;;  %v2658_v7 = vpop.f32.mrf.mxu3 }
 0x28e   : > { %v7831_v4 = vor.u32 %v9285_v32, %v7830_v47  ;;  %v9307_v47 = vld [vmem:[#allocation11 + $0x444] sm:$0xf0] }
 0x28f   : > { %4586 = vmatpush.bf16.msrb.mxu1 %v7727_v58  ;;  %4612 = vmatpush.bf16.msrb.mxu3 %v7855_v59  ;;  %v7943_v58 = vor.u32 %v9313_v54, %v7942_v5  ;;  %v7934_v59 = vld [vmem:[#allocation11 + $0x460] sm:$0xf]  ;;  %v10866_v14 = vpack.c.bf16 %v2948_v48, %v2948_v48  ;;  %v2857_v29 = vmul.f32 %v2841_v38, %v10862_v49  ;;  %v8054_v5 = vld [vmem:[#allocation11 + $0x550] sm:$0xf] }
 0x290   : > { %v7935_v19 = vor.u32 %v9311_v61, %v7934_v59  ;;  %v7990_v48 = vld [vmem:[#allocation11 + $0x4d0] sm:$0xf]  ;;  %v8055_v50 = vor.u32 %v9341_v41, %v8054_v5  ;;  %v9357_v61 = vld [vmem:[#allocation11 + $0x5d4] sm:$0xf0]  ;;  %v7919_v31 = vor.u32 %v9307_v47, %v7918_v46  ;;  %v7982_v38 = vld [vmem:[#allocation11 + $0x4c0] sm:$0xf] }
 0x291   : > { %4575 = vmatpush.bf16.msrb.mxu0 %v7647_v26  ;;  %4601 = vmatpush.bf16.msrb.mxu2 %v7775_v6  ;;  %v9283_v26 = vld [vmem:[#allocation11 + $0x384] sm:$0xf0]  ;;  %v8006_v6 = vld [vmem:[#allocation11 + $0x4f0] sm:$0xf]  ;;  %v2873_v54 = vmul.f32 %v2857_v29, %v10862_v49  ;;  %v7991_v60 = vor.u32 %v9325_v9, %v7990_v48  ;;  %v7966_v47 = vld [vmem:[#allocation11 + $0x4a0] sm:$0xf] }
 0x292   : > { %v7823_v40 = vor.u32 %v9283_v26, %v7822_v3  ;;  %v8007_v30 = vor.u32 %v9329_v10, %v8006_v6  ;;  %v8118_v59 = vld [vmem:[#allocation11 + $0x5d0] sm:$0xf]  ;;  %v8110_v10 = vld [vmem:[#allocation11 + $0x5c0] sm:$0xf]  ;;  %v9319_v48 = vld [vmem:[#allocation11 + $0x4a4] sm:$0xf0] }
 0x293   : > { %4587 = vmatpush.bf16.msrb.mxu1 %v7719_v13  ;;  %4613 = vmatpush.bf16.msrb.mxu3 %v7847_v17  ;;  %v2935_v13 = vadd.f32 1.0, %v9707_v55  ;;  %v8062_v17 = vld [vmem:[#allocation11 + $0x560] sm:$0xf]  ;;  %v8127_v55 = vor.u32 %v9359_v52, %v8126_v56  ;;  %v2889_v3 = vadd.f32 %v2873_v54, %v10862_v49  ;;  %v8119_v26 = vor.u32 %v9357_v61, %v8118_v59  ;;  %v8038_v6 = vld [vmem:[#allocation11 + $0x530] sm:$0xf] }
 0x294   : > { %v8063_v37 = vor.u32 %v9343_v22, %v8062_v17  ;;  %v7902_v22 = vld [vmem:[#allocation11 + $0x420] sm:$0xf]  ;;  %v7894_v52 = vld [vmem:[#allocation11 + $0x410] sm:$0xf]  ;;  %v9351_v59 = vld [vmem:[#allocation11 + $0x5a4] sm:$0xf0] }
 0x295   : > { %4576 = vmatpush.bf16.msrb.mxu0 %v7639_v33  ;;  %4602 = vmatpush.bf16.msrb.mxu2 %v7767_v34  ;;  %v7926_v33 = vld [vmem:[#allocation11 + $0x450] sm:$0xf]  ;;  %v9309_v34 = vld [vmem:[#allocation11 + $0x454] sm:$0xf0]  ;;  %v2951_v11 = vmul.f32 %v2935_v13, %v2823_v28  ;;  %v9355_v13 = vld [vmem:[#allocation11 + $0x5c4] sm:$0xf0] }
 0x296   : > { %v7974_v28 = vld [vmem:[#allocation11 + $0x4b0] sm:$0xf]  ;;  %v2905_v29 = vmul.f32 0.7978846, %v2889_v3 }
 0x297   : > { %4588 = vmatpush.bf16.msrb.mxu1 %v7711_v42  ;;  %4614 = vmatpush.bf16.msrb.mxu3 %v7839_v43  ;;  %v7927_v42 = vor.u32 %v9309_v34, %v7926_v33  ;;  %v2888_v43 = vadd.f32 %v2872_v36, %v10858_v12  ;;  %v10880_v32 = vpack.c.bf16 %v2951_v11, %v2951_v11  ;;  %v8030_v11 = vld [vmem:[#allocation11 + $0x520] sm:$0xf] }
 0x298   : > { %v8111_v34 = vor.u32 %v9355_v13, %v8110_v10  ;;  %v8014_v13 = vld [vmem:[#allocation11 + $0x500] sm:$0xf] }
 0x299   : > { %4577 = vmatpush.bf16.msrb.mxu0 %v7631_v16  ;;  %4603 = vmatpush.bf16.msrb.mxu2 %v7759_v57  ;;  %v8046_v16 = vld [vmem:[#allocation11 + $0x540] sm:$0xf]  ;;  %v2669_v57 = vpop.f32.mrf.mxu0 }
 0x29a   : > { %v2670_v17 = vadd.f32 %v2669_v57, %v1098_v0  ;;  %v9333_v57 = vld [vmem:[#allocation11 + $0x514] sm:$0xf0] }
 0x29b   : > { %4589 = vmatpush.bf16.msrb.mxu1 %v7703_v39  ;;  %4615 = vmatpush.bf16.msrb.mxu3 %v7831_v4  ;;  %v2904_v39 = vmul.f32 0.7978846, %v2888_v43  ;;  %v9323_v4 = vld [vmem:[#allocation11 + $0x4c4] sm:$0xf0]  ;;  %v8031_v43 = vor.u32 %v9335_v35, %v8030_v11 }
 0x29c   : > { %4578 = vmatmul.bf16.vlgmr.msrb.gmra.mxu0 %v10866_v14  ;;  %4604 = vmatmul.bf16.vlgmr.msrb.gmra.mxu2 %v10870_v62  ;;  %v7983_v36 = vor.u32 %v9323_v4, %v7982_v38  ;;  %v7967_v38 = vor.u32 %v9319_v48, %v7966_v47  ;;  %v7958_v4 = vld [vmem:[#allocation11 + $0x490] sm:$0xf]  ;;  %v8318_v47 = vld [vmem:[#allocation11 + $0x760] sm:$0xf]  ;;  %v9407_v48 = vld [vmem:[#allocation11 + $0x764] sm:$0xf0] }
 0x29d   : > { %4622 = vmatpush.bf16.msra.mxu0 %v7943_v58  ;;  %4648 = vmatpush.bf16.msra.mxu2 %v8071_v25  ;;  %v9339_v58 = vld [vmem:[#allocation11 + $0x544] sm:$0xf0]  ;;  %v9337_v25 = vld [vmem:[#allocation11 + $0x534] sm:$0xf0]  ;;  %9708 = vtanh.f32 %v2904_v39 }
 0x29e   : > { %v8047_v7 = vor.u32 %v9339_v58, %v8046_v16  ;;  %v8039_v33 = vor.u32 %v9337_v25, %v8038_v6  ;;  %9710 = vtanh.f32 %v2905_v29  ;;  %v7886_v16 = vld [vmem:[#allocation11 + $0x400] sm:$0xf]  ;;  %v9299_v39 = vld [vmem:[#allocation11 + $0x404] sm:$0xf0] }
 0x29f   : > { %4590 = vmatpush.bf16.msrb.mxu1 %v7695_v27  ;;  %4616 = vmatpush.bf16.msrb.mxu3 %v7823_v40  ;;  %v2682_v53 = vpop.f32.mrf.mxu1  ;;  %v2695_v24 = vpop.f32.mrf.mxu2  ;;  %v9303_v27 = vld [vmem:[#allocation11 + $0x424] sm:$0xf0]  ;;  %v8094_v58 = vld [vmem:[#allocation11 + $0x5a0] sm:$0xf] }
 0x2a0   : > { %v10887_v40 = vadd.f32 %v2682_v53, %v2670_v17  ;;  %v7903_v41 = vor.u32 %v9303_v27, %v7902_v22  ;;  %v2696_v46 = vadd.f32 %v2695_v24, %v1099_v21  ;;  %v8095_v10 = vor.u32 %v9351_v59, %v8094_v58  ;;  %v9331_v17 = vld [vmem:[#allocation11 + $0x504] sm:$0xf0]  ;;  %v8086_v24 = vld [vmem:[#allocation11 + $0x590] sm:$0xf]  ;;  %v8190_v29 = vld [vmem:[#allocation11 + $0x660] sm:$0xf] }
 0x2a1   : > { %4623 = vmatpush.bf16.msra.mxu0 %v7935_v19  ;;  %4649 = vmatpush.bf16.msra.mxu2 %v8063_v37  ;;  %v7911_v19 = vor.u32 %v9305_v2, %v7910_v1  ;;  %v2671_v63 = vpop.f32.mrf.mxu0  ;;  %v8102_v37 = vld [vmem:[#allocation11 + $0x5b0] sm:$0xf]  ;;  %v9377_v1 = vld [vmem:[#allocation11 + $0x674] sm:$0xf0]  ;;  %v2824_v22 = vmul.f32 0.5, %v10858_v12  ;;  %v2825_v53 = vmul.f32 0.5, %v10862_v49  ;;  %v8015_v12 = vor.u32 %v9331_v17, %v8014_v13 }
 0x2a2   : > { %4591 = vmatmul.bf16.vlgmr.msrb.gmra.mxu1 %v10878_v51  ;;  %4617 = vmatmul.bf16.vlgmr.msrb.gmra.mxu3 %v10880_v32  ;;  %v2842_v5 = vmul.f32 0.044715, %v10887_v40  ;;  %v8310_v17 = vld [vmem:[#allocation11 + $0x750] sm:$0xf] }
 0x2a3   : > { %4635 = vmatpush.bf16.msra.mxu1 %v8007_v30  ;;  %4661 = vmatpush.bf16.msra.mxu3 %v8135_v15  ;;  %v9321_v30 = vld [vmem:[#allocation11 + $0x4b4] sm:$0xf0]  ;;  %v9709_v54 = vpop.eup %9708 }
 0x2a4   : > { %v9353_v15 = vld [vmem:[#allocation11 + $0x5b4] sm:$0xf0]  ;;  %v7975_v56 = vor.u32 %v9321_v30, %v7974_v28  ;;  %v9711_v21 = vpop.eup %9710  ;;  %v7887_v28 = vor.u32 %v9299_v39, %v7886_v16 }
 0x2a5   : > { %4624 = vmatpush.bf16.msra.mxu0 %v7927_v42  ;;  %4650 = vmatpush.bf16.msra.mxu2 %v8055_v50  ;;  %v9301_v42 = vld [vmem:[#allocation11 + $0x414] sm:$0xf0]  ;;  %v8103_v9 = vor.u32 %v9353_v15, %v8102_v37  ;;  %v8022_v50 = vld [vmem:[#allocation11 + $0x510] sm:$0xf]  ;;  %v9375_v37 = vld [vmem:[#allocation11 + $0x664] sm:$0xf0] }
 0x2a6   : > { %v8023_v25 = vor.u32 %v9333_v57, %v8022_v50  ;;  %v7950_v15 = vld [vmem:[#allocation11 + $0x480] sm:$0xf]  ;;  %v8390_v50 = vld [vmem:[#allocation11 + $0x7f0] sm:$0xf]  ;;  %v8191_v57 = vor.u32 %v9375_v37, %v8190_v29  ;;  %v9373_v39 = vld [vmem:[#allocation11 + $0x654] sm:$0xf0] }
 0x2a7   : > { %4636 = vmatpush.bf16.msra.mxu1 %v7999_v44  ;;  %4662 = vmatpush.bf16.msra.mxu3 %v8127_v55  ;;  %v2858_v44 = vmul.f32 %v2842_v5, %v10887_v40  ;;  %v2708_v55 = vpop.f32.mrf.mxu3  ;;  %v2684_v2 = vpop.f32.mrf.mxu1  ;;  %v9315_v5 = vld [vmem:[#allocation11 + $0x484] sm:$0xf0] }
 0x2a8   : > { %v10892_v0 = vadd.f32 %v2708_v55, %v2696_v46  ;;  %v2697_v3 = vpop.f32.mrf.mxu2  ;;  %v9347_v46 = vld [vmem:[#allocation11 + $0x584] sm:$0xf0]  ;;  %v9425_v55 = vld [vmem:[#allocation11 + $0x7f4] sm:$0xf0]  ;;  %v7951_v58 = vor.u32 %v9315_v5, %v7950_v15  ;;  %v8254_v2 = vld [vmem:[#allocation11 + $0x6e0] sm:$0xf] }
 0x2a9   : > { %4625 = vmatpush.bf16.msra.mxu0 %v7919_v31  ;;  %4651 = vmatpush.bf16.msra.mxu2 %v8047_v7  ;;  %v2874_v61 = vmul.f32 %v2858_v44, %v10887_v40  ;;  %v7895_v31 = vor.u32 %v9301_v42, %v7894_v52  ;;  %v9317_v7 = vld [vmem:[#allocation11 + $0x494] sm:$0xf0]  ;;  %v2937_v52 = vadd.f32 1.0, %v9711_v21  ;;  %v8078_v44 = vld [vmem:[#allocation11 + $0x580] sm:$0xf]  ;;  %v1100_v5 = vperm.slane %v10848_v23, 4 }
 0x2aa   : > { %v2843_v6 = vmul.f32 0.044715, %v10892_v0  ;;  %v7959_v35 = vor.u32 %v9317_v7, %v7958_v4  ;;  %v9391_v3 = vld [vmem:[#allocation11 + $0x6e4] sm:$0xf0]  ;;  %v8391_v4 = vor.u32 %v9425_v55, %v8390_v50  ;;  %v8294_v50 = vld [vmem:[#allocation11 + $0x730] sm:$0xf] }
 0x2ab   : > { %4637 = vmatpush.bf16.msra.mxu1 %v7991_v60  ;;  %4663 = vmatpush.bf16.msra.mxu3 %v8119_v26  ;;  %v8198_v60 = vld [vmem:[#allocation11 + $0x670] sm:$0xf]  ;;  %v2936_v26 = vadd.f32 1.0, %v9709_v54  ;;  %v9403_v37 = vld [vmem:[#allocation11 + $0x744] sm:$0xf0] }
 0x2ac   : > { %v2859_v27 = vmul.f32 %v2843_v6, %v10892_v0  ;;  %v8199_v11 = vor.u32 %v9377_v1, %v8198_v60  ;;  %v8079_v60 = vor.u32 %v9347_v46, %v8078_v44  ;;  %v9423_v6 = vld [vmem:[#allocation11 + $0x7e4] sm:$0xf0]  ;;  %v8366_v46 = vld [vmem:[#allocation11 + $0x7c0] sm:$0xf]  ;;  %v9401_v55 = vld [vmem:[#allocation11 + $0x734] sm:$0xf0] }
 0x2ad   : > { %4626 = vmatpush.bf16.msra.mxu0 %v7911_v19  ;;  %4652 = vmatpush.bf16.msra.mxu2 %v8039_v33  ;;  %v2890_v19 = vadd.f32 %v2874_v61, %v10887_v40  ;;  %v8326_v33 = vld [vmem:[#allocation11 + $0x770] sm:$0xf]  ;;  %v2952_v63 = vmul.f32 %v2936_v26, %v2824_v22  ;;  %v2953_v61 = vmul.f32 %v2937_v52, %v2825_v53  ;;  %v8382_v26 = vld [vmem:[#allocation11 + $0x7e0] sm:$0xf]  ;;  %v9387_v52 = vld [vmem:[#allocation11 + $0x6c4] sm:$0xf0] }
 0x2ae   : > { %v2875_v49 = vmul.f32 %v2859_v27, %v10892_v0  ;;  %v8255_v22 = vor.u32 %v9391_v3, %v8254_v2  ;;  %v8174_v53 = vld [vmem:[#allocation11 + $0x640] sm:$0xf]  ;;  %v8246_v27 = vld [vmem:[#allocation11 + $0x6d0] sm:$0xf]  ;;  %v8383_v29 = vor.u32 %v9423_v6, %v8382_v26  ;;  %v9417_v26 = vld [vmem:[#allocation11 + $0x7b4] sm:$0xf0] }
 0x2af   : > { %4638 = vmatpush.bf16.msra.mxu1 %v7983_v36  ;;  %4664 = vmatpush.bf16.msra.mxu3 %v8111_v34  ;;  %v9349_v36 = vld [vmem:[#allocation11 + $0x594] sm:$0xf0]  ;;  %v2906_v30 = vmul.f32 0.7978846, %v2890_v19  ;;  %v10901_v16 = vpack.c.bf16 %v2952_v63, %v2952_v63  ;;  %v10905_v21 = vpack.c.bf16 %v2953_v61, %v2953_v61  ;;  %v8302_v63 = vld [vmem:[#allocation11 + $0x740] sm:$0xf] }
 0x2b0   : > { %v9409_v34 = vld [vmem:[#allocation11 + $0x774] sm:$0xf0]  ;;  %v8087_v42 = vor.u32 %v9349_v36, %v8086_v24  ;;  %v9371_v24 = vld [vmem:[#allocation11 + $0x644] sm:$0xf0]  ;;  %v8303_v44 = vor.u32 %v9403_v37, %v8302_v63 }
 0x2b1   : > { %4627 = vmatpush.bf16.msra.mxu0 %v7903_v41  ;;  %4653 = vmatpush.bf16.msra.mxu2 %v8031_v43  ;;  %v8262_v41 = vld [vmem:[#allocation11 + $0x6f0] sm:$0xf]  ;;  %9712 = vtanh.f32 %v2906_v30  ;;  %v2710_v43 = vpop.f32.mrf.mxu3  ;;  %v8327_v54 = vor.u32 %v9409_v34, %v8326_v33  ;;  %v9405_v19 = vld [vmem:[#allocation11 + $0x754] sm:$0xf0]  ;;  %v9367_v61 = vld [vmem:[#allocation11 + $0x624] sm:$0xf0] }
 0x2b2   : > { %v8311_v30 = vor.u32 %v9405_v19, %v8310_v17  ;;  %v9421_v33 = vld [vmem:[#allocation11 + $0x7d4] sm:$0xf0] }
 0x2b3   : > { %4639 = vmatpush.bf16.msra.mxu1 %v7975_v56  ;;  %4665 = vmatpush.bf16.msra.mxu3 %v8103_v9  ;;  %v9393_v56 = vld [vmem:[#allocation11 + $0x6f4] sm:$0xf0]  ;;  %v2891_v9 = vadd.f32 %v2875_v49, %v10892_v0  ;;  %v8166_v49 = vld [vmem:[#allocation11 + $0x630] sm:$0xf] }
 0x2b4   : > { %v8263_v59 = vor.u32 %v9393_v56, %v8262_v41  ;;  %v9369_v41 = vld [vmem:[#allocation11 + $0x634] sm:$0xf0]  ;;  %v8238_v56 = vld [vmem:[#allocation11 + $0x6c0] sm:$0xf] }
 0x2b5   : > { %4628 = vmatpush.bf16.msra.mxu0 %v7895_v31  ;;  %4654 = vmatpush.bf16.msra.mxu2 %v8023_v25  ;;  %v8182_v31 = vld [vmem:[#allocation11 + $0x650] sm:$0xf]  ;;  %v2907_v1 = vmul.f32 0.7978846, %v2891_v9  ;;  %v9397_v63 = vld [vmem:[#allocation11 + $0x714] sm:$0xf0] }
 0x2b6   : > { %v8183_v25 = vor.u32 %v9373_v39, %v8182_v31 }
 0x2b7   : > { %4640 = vmatpush.bf16.msra.mxu1 %v7967_v38  ;;  %4666 = vmatpush.bf16.msra.mxu3 %v8095_v10  ;;  %v8319_v38 = vor.u32 %v9407_v48, %v8318_v47  ;;  %v9713_v7 = vpop.eup %9712  ;;  %9714 = vtanh.f32 %v2907_v1  ;;  %v2826_v10 = vmul.f32 0.5, %v10887_v40  ;;  %v8374_v40 = vld [vmem:[#allocation11 + $0x7d0] sm:$0xf]  ;;  %v9419_v47 = vld [vmem:[#allocation11 + $0x7c4] sm:$0xf0]  ;;  %v8167_v48 = vor.u32 %v9369_v41, %v8166_v49 }
 0x2b8   : > { %v2938_v13 = vadd.f32 1.0, %v9713_v7  ;;  %v9385_v1 = vld [vmem:[#allocation11 + $0x6b4] sm:$0xf0]  ;;  %v8367_v2 = vor.u32 %v9419_v47, %v8366_v46  ;;  %v8358_v7 = vld [vmem:[#allocation11 + $0x7b0] sm:$0xf] }
 0x2b9   : > { %4629 = vmatpush.bf16.msra.mxu0 %v7887_v28  ;;  %4655 = vmatpush.bf16.msra.mxu2 %v8015_v12  ;;  %v9389_v28 = vld [vmem:[#allocation11 + $0x6d4] sm:$0xf0]  ;;  %v2721_v34 = vpop.f32.mrf.mxu0  ;;  %v9363_v49 = vld [vmem:[#allocation11 + $0x604] sm:$0xf0]  ;;  %v9184_v41 = vld [vmem:[#allocation11 + $0x74] sm:$0xf] }
 0x2ba   : > { %v2954_v36 = vmul.f32 %v2938_v13, %v2826_v10  ;;  %v8247_v12 = vor.u32 %v9389_v28, %v8246_v27  ;;  %v8286_v10 = vld [vmem:[#allocation11 + $0x720] sm:$0xf]  ;;  %v9399_v13 = vld [vmem:[#allocation11 + $0x724] sm:$0xf0] }
 0x2bb   : > { %4641 = vmatpush.bf16.msra.mxu1 %v7959_v35  ;;  %4667 = vmatpush.bf16.msra.mxu3 %v8087_v42  ;;  %v2827_v42 = vmul.f32 0.5, %v10892_v0 }
 0x2bc   : > { %4630 = vmatmul.bf16.vlgmr.msra.gmra.mxu0 %v10901_v16  ;;  %v10908_v35 = vpack.c.bf16 %v2954_v36, %v2954_v36  ;;  %v9383_v36 = vld [vmem:[#allocation11 + $0x6a4] sm:$0xf0] }
 0x2bd   : > { %4674 = vmatpush.bf16.msrb.mxu0 %v8199_v11  ;;  %4700 = vmatpush.bf16.msrb.mxu2 %v8327_v54  ;;  %v8175_v11 = vor.u32 %v9371_v24, %v8174_v53  ;;  %v9715_v15 = vpop.eup %9714  ;;  %v8375_v54 = vor.u32 %v9421_v33, %v8374_v40  ;;  %v9365_v53 = vld [vmem:[#allocation11 + $0x614] sm:$0xf0]  ;;  %v8222_v24 = vld [vmem:[#allocation11 + $0x6a0] sm:$0xf]  ;;  %v9415_v40 = vld [vmem:[#allocation11 + $0x7a4] sm:$0xf0] }
 0x2be   : > { %4656 = vmatmul.bf16.vlgmr.msra.gmra.mxu2 %v10908_v35  ;;  %v2939_v43 = vadd.f32 1.0, %v9715_v15 }
 0x2bf   : > { %4642 = vmatpush.bf16.msra.mxu1 %v7951_v58  ;;  %4668 = vmatpush.bf16.msra.mxu3 %v8079_v60  ;;  %v8239_v58 = vor.u32 %v9387_v52, %v8238_v56  ;;  %v2734_v31 = vpop.f32.mrf.mxu1  ;;  %v2747_v39 = vpop.f32.mrf.mxu2  ;;  %v8230_v60 = vld [vmem:[#allocation11 + $0x6b0] sm:$0xf] }
 0x2c0   : > { %v2955_v9 = vmul.f32 %v2939_v43, %v2827_v42  ;;  %v8231_v19 = vor.u32 %v9385_v1, %v8230_v60  ;;  %v7432_v42 = vld [vmem:[#allocation11 + $0x78] sm:$0xf0]  ;;  %v8214_v43 = vld [vmem:[#allocation11 + $0x690] sm:$0xf] }
 0x2c1   : > { %4675 = vmatpush.bf16.msrb.mxu0 %v8191_v57  ;;  %4701 = vmatpush.bf16.msrb.mxu2 %v8319_v38  ;;  %v2722_v57 = vadd.f32 %v2721_v34, %v1100_v5  ;;  %v1101_v38 = vperm.slane %v10848_v23, 5  ;;  %v2723_v6 = vpop.f32.mrf.mxu0  ;;  %v8359_v23 = vor.u32 %v9417_v26, %v8358_v7  ;;  %v8223_v5 = vor.u32 %v9383_v36, %v8222_v24  ;;  %v9379_v7 = vld [vmem:[#allocation11 + $0x684] sm:$0xf0]  ;;  %v9200_v26 = vld [vmem:[#allocation11 + $0xf4] sm:$0xf] }
 0x2c2   : > { %4643 = vmatmul.bf16.vlgmr.msra.gmra.mxu1 %v10905_v21  ;;  %v10913_v0 = vpack.c.bf16 %v2955_v9, %v2955_v9  ;;  %v8342_v9 = vld [vmem:[#allocation11 + $0x790] sm:$0xf]  ;;  %v7435_v60 = vor.u32 %v9184_v41, %v7432_v42  ;;  %v9232_v24 = vld [vmem:[#allocation11 + $0x1f4] sm:$0xf]  ;;  %v7624_v36 = vld [vmem:[#allocation11 + $0x1f8] sm:$0xf0] }
 0x2c3   : > { %4687 = vmatpush.bf16.msrb.mxu1 %v8263_v59  ;;  %4713 = vmatpush.bf16.msrb.mxu3 %v8391_v4  ;;  %v8158_v59 = vld [vmem:[#allocation11 + $0x620] sm:$0xf]  ;;  %v10915_v3 = vadd.f32 %v2734_v31, %v2722_v57  ;;  %v8295_v4 = vor.u32 %v9401_v55, %v8294_v50  ;;  %v2748_v28 = vadd.f32 %v2747_v39, %v1101_v38  ;;  %v9413_v50 = vld [vmem:[#allocation11 + $0x794] sm:$0xf0]  ;;  %v9182_v57 = vld [vmem:[#allocation11 + $0x64] sm:$0xf] }
 0x2c4   : > { %4669 = vmatmul.bf16.vlgmr.msra.gmra.mxu3 %v10913_v0  ;;  %v7560_v38 = vld [vmem:[#allocation11 + $0x178] sm:$0xf0]  ;;  %v8343_v6 = vor.u32 %v9413_v50, %v8342_v9  ;;  %v9230_v41 = vld [vmem:[#allocation11 + $0x1e4] sm:$0xf]  ;;  %v9196_v50 = vld [vmem:[#allocation11 + $0xd4] sm:$0xf] }
 0x2c5   : > { %4676 = vmatpush.bf16.msrb.mxu0 %v8183_v25  ;;  %4702 = vmatpush.bf16.msrb.mxu2 %v8311_v30  ;;  %v8159_v25 = vor.u32 %v9367_v61, %v8158_v59  ;;  %v2844_v17 = vmul.f32 0.044715, %v10915_v3  ;;  %v8350_v30 = vld [vmem:[#allocation11 + $0x7a0] sm:$0xf]  ;;  %v2760_v33 = vpop.f32.mrf.mxu3  ;;  %v9395_v61 = vld [vmem:[#allocation11 + $0x704] sm:$0xf0] }
 0x2c6   : > { %v10922_v15 = vadd.f32 %v2760_v33, %v2748_v28  ;;  %v8270_v59 = vld [vmem:[#allocation11 + $0x700] sm:$0xf]  ;;  %v9180_v33 = vld [vmem:[#allocation11 + $0x54] sm:$0xf] }
 0x2c7   : > { %4688 = vmatpush.bf16.msrb.mxu1 %v8255_v22  ;;  %4714 = vmatpush.bf16.msrb.mxu3 %v8383_v29  ;;  %v8150_v22 = vld [vmem:[#allocation11 + $0x610] sm:$0xf]  ;;  %v2860_v27 = vmul.f32 %v2844_v17, %v10915_v3  ;;  %v8287_v29 = vor.u32 %v9399_v13, %v8286_v10  ;;  %v2736_v56 = vpop.f32.mrf.mxu1  ;;  %v2749_v52 = vpop.f32.mrf.mxu2  ;;  %v7496_v10 = vld [vmem:[#allocation11 + $0xf8] sm:$0xf0]  ;;  %v8271_v13 = vor.u32 %v9395_v61, %v8270_v59  ;;  %v8334_v17 = vld [vmem:[#allocation11 + $0x780] sm:$0xf] }
 0x2c8   : > { %v8151_v34 = vor.u32 %v9365_v53, %v8150_v22  ;;  %v2845_v47 = vmul.f32 0.044715, %v10922_v15  ;;  %v7616_v56 = vld [vmem:[#allocation11 + $0x1e8] sm:$0xf0]  ;;  %v9228_v61 = vld [vmem:[#allocation11 + $0x1d4] sm:$0xf] }
 0x2c9   : > { %4677 = vmatpush.bf16.msrb.mxu0 %v8175_v11  ;;  %4703 = vmatpush.bf16.msrb.mxu2 %v8303_v44  ;;  %v8278_v11 = vld [vmem:[#allocation11 + $0x710] sm:$0xf]  ;;  %v2876_v37 = vmul.f32 %v2860_v27, %v10915_v3  ;;  %v8351_v44 = vor.u32 %v9415_v40, %v8350_v30  ;;  %v7552_v30 = vld [vmem:[#allocation11 + $0x168] sm:$0xf0]  ;;  %v7499_v40 = vor.u32 %v9200_v26, %v7496_v10  ;;  %v9194_v10 = vld [vmem:[#allocation11 + $0xc4] sm:$0xf] }
 0x2ca   : > { %v2861_v39 = vmul.f32 %v2845_v47, %v10922_v15  ;;  %v9178_v47 = vld [vmem:[#allocation11 + $0x44] sm:$0xf] }
 0x2cb   : > { %4689 = vmatpush.bf16.msrb.mxu1 %v8247_v12  ;;  %4715 = vmatpush.bf16.msrb.mxu3 %v8375_v54  ;;  %v8142_v12 = vld [vmem:[#allocation11 + $0x600] sm:$0xf]  ;;  %v9381_v54 = vld [vmem:[#allocation11 + $0x694] sm:$0xf0]  ;;  %v2892_v46 = vadd.f32 %v2876_v37, %v10915_v3  ;;  %v9198_v37 = vld [vmem:[#allocation11 + $0xe4] sm:$0xf] }
 0x2cc   : > { %v8143_v55 = vor.u32 %v9363_v49, %v8142_v12  ;;  %v8215_v1 = vor.u32 %v9381_v54, %v8214_v43  ;;  %v7627_v12 = vor.u32 %v9232_v24, %v7624_v36  ;;  %v9212_v43 = vld [vmem:[#allocation11 + $0x154] sm:$0xf]  ;;  %v7544_v54 = vld [vmem:[#allocation11 + $0x158] sm:$0xf0]  ;;  %v9226_v24 = vld [vmem:[#allocation11 + $0x1c4] sm:$0xf] }
 0x2cd   : > { %4678 = vmatpush.bf16.msrb.mxu0 %v8167_v48  ;;  %4704 = vmatpush.bf16.msrb.mxu2 %v8295_v4  ;;  %v8279_v48 = vor.u32 %v9397_v63, %v8278_v11  ;;  %v2908_v31 = vmul.f32 0.7978846, %v2892_v46  ;;  %v8206_v4 = vld [vmem:[#allocation11 + $0x680] sm:$0xf]  ;;  %v2762_v22 = vpop.f32.mrf.mxu3  ;;  %v7547_v59 = vor.u32 %v9212_v43, %v7544_v54  ;;  %v7600_v36 = vld [vmem:[#allocation11 + $0x1c8] sm:$0xf0] }
 0x2ce   : > { %v8207_v28 = vor.u32 %v9379_v7, %v8206_v4  ;;  %v9176_v4 = vld [vmem:[#allocation11 + $0x34] sm:$0xf]  ;;  %v7400_v7 = vld [vmem:[#allocation11 + $0x38] sm:$0xf0]  ;;  %v9206_v54 = vld [vmem:[#allocation11 + $0x124] sm:$0xf] }
 0x2cf   : > { %4690 = vmatpush.bf16.msrb.mxu1 %v8239_v58  ;;  %4716 = vmatpush.bf16.msrb.mxu3 %v8367_v2  ;;  %v7424_v58 = vld [vmem:[#allocation11 + $0x68] sm:$0xf0]  ;;  %v9216_v2 = vld [vmem:[#allocation11 + $0x174] sm:$0xf]  ;;  %9716 = vtanh.f32 %v2908_v31  ;;  %v7608_v31 = vld [vmem:[#allocation11 + $0x1d8] sm:$0xf0] }
 0x2d0   : > { %v7563_v53 = vor.u32 %v9216_v2, %v7560_v38  ;;  %v7427_v27 = vor.u32 %v9182_v57, %v7424_v58  ;;  %v7619_v57 = vor.u32 %v9230_v41, %v7616_v56  ;;  %v9224_v41 = vld [vmem:[#allocation11 + $0x1b4] sm:$0xf]  ;;  %v7592_v56 = vld [vmem:[#allocation11 + $0x1b8] sm:$0xf0] }
 0x2d1   : > { %4679 = vmatpush.bf16.msrb.mxu0 %v8159_v25  ;;  %4705 = vmatpush.bf16.msrb.mxu2 %v8287_v29  ;;  %v2877_v25 = vmul.f32 %v2861_v39, %v10922_v15  ;;  %v9214_v29 = vld [vmem:[#allocation11 + $0x164] sm:$0xf] }
 0x2d2   : > { %v7555_v49 = vor.u32 %v9214_v29, %v7552_v30 }
 0x2d3   : > { %4691 = vmatpush.bf16.msrb.mxu1 %v8231_v19  ;;  %4717 = vmatpush.bf16.msrb.mxu3 %v8359_v23  ;;  %v9411_v19 = vld [vmem:[#allocation11 + $0x784] sm:$0xf0]  ;;  %v2893_v23 = vadd.f32 %v2877_v25, %v10922_v15 }
 0x2d4   : > { %v8335_v11 = vor.u32 %v9411_v19, %v8334_v17  ;;  %v7611_v17 = vor.u32 %v9228_v61, %v7608_v31  ;;  %v2829_v19 = vmul.f32 0.5, %v10922_v15  ;;  %v7603_v15 = vor.u32 %v9226_v24, %v7600_v36  ;;  %v9222_v61 = vld [vmem:[#allocation11 + $0x1a4] sm:$0xf]  ;;  %v7584_v31 = vld [vmem:[#allocation11 + $0x1a8] sm:$0xf0] }
 0x2d5   : > { %4680 = vmatpush.bf16.msrb.mxu0 %v8151_v34  ;;  %4706 = vmatpush.bf16.msrb.mxu2 %v8279_v48  ;;  %v7416_v34 = vld [vmem:[#allocation11 + $0x58] sm:$0xf0]  ;;  %v2909_v63 = vmul.f32 0.7978846, %v2893_v23  ;;  %v9717_v52 = vpop.eup %9716  ;;  %v7408_v48 = vld [vmem:[#allocation11 + $0x48] sm:$0xf0]  ;;  %v7403_v23 = vor.u32 %v9176_v4, %v7400_v7 }
 0x2d6   : > { %v7419_v42 = vor.u32 %v9180_v33, %v7416_v34  ;;  %v2940_v9 = vadd.f32 1.0, %v9717_v52  ;;  %v7411_v39 = vor.u32 %v9178_v47, %v7408_v48  ;;  %v7392_v33 = vld [vmem:[#allocation11 + $0x28] sm:$0xf0]  ;;  %v9172_v48 = vld [vmem:[#allocation11 + $0x14] sm:$0xf] }
 0x2d7   : > { %4692 = vmatpush.bf16.msrb.mxu1 %v8223_v5  ;;  %4718 = vmatpush.bf16.msrb.mxu3 %v8351_v44  ;;  %v7488_v5 = vld [vmem:[#allocation11 + $0xe8] sm:$0xf0]  ;;  %9718 = vtanh.f32 %v2909_v63  ;;  %v2828_v44 = vmul.f32 0.5, %v10915_v3  ;;  %v7464_v63 = vld [vmem:[#allocation11 + $0xb8] sm:$0xf0] }
 0x2d8   : > { %v7491_v46 = vor.u32 %v9198_v37, %v7488_v5 }
 0x2d9   : > { %4681 = vmatpush.bf16.msrb.mxu0 %v8143_v55  ;;  %4707 = vmatpush.bf16.msrb.mxu2 %v8271_v13  ;;  %v7480_v55 = vld [vmem:[#allocation11 + $0xd8] sm:$0xf0]  ;;  %v2956_v58 = vmul.f32 %v2940_v9, %v2828_v44  ;;  %v2773_v3 = vpop.f32.mrf.mxu0  ;;  %v7472_v13 = vld [vmem:[#allocation11 + $0xc8] sm:$0xf0] }
 0x2da   : > { %v7483_v38 = vor.u32 %v9196_v50, %v7480_v55  ;;  %v7475_v29 = vor.u32 %v9194_v10, %v7472_v13  ;;  %v7520_v44 = vld [vmem:[#allocation11 + $0x128] sm:$0xf0]  ;;  %v7384_v9 = vld [vmem:[#allocation11 + $0x18] sm:$0xf0]  ;;  %v9190_v55 = vld [vmem:[#allocation11 + $0xa4] sm:$0xf] }
 0x2db   : > { %4693 = vmatpush.bf16.msrb.mxu1 %v8215_v1  ;;  %4719 = vmatpush.bf16.msrb.mxu3 %v8343_v6  ;;  %v7536_v1 = vld [vmem:[#allocation11 + $0x148] sm:$0xf0]  ;;  %v10930_v2 = vpack.c.bf16 %v2956_v58, %v2956_v58  ;;  %v9736_v6 = vld [vmem:[#allocation10 + $0x8] sm:$0xff]  ;;  %v7595_v58 = vor.u32 %v9224_v41, %v7592_v56 }
 0x2dc   : > { %v1102_v25 = vperm.slane %v9736_v6, 6  ;;  %v7440_v56 = vld [vmem:[#allocation11 + $0x88] sm:$0xf0] }
 0x2dd   : > { %4726 = vmatpush.bf16.msra.mxu0 %v7435_v60  ;;  %4752 = vmatpush.bf16.msra.mxu2 %v7563_v53  ;;  %v9210_v60 = vld [vmem:[#allocation11 + $0x144] sm:$0xf]  ;;  %v9719_v26 = vpop.eup %9718 }
 0x2de   : > { %4682 = vmatmul.bf16.vlgmr.msrb.gmra.mxu0 %v10930_v2  ;;  %v2941_v22 = vadd.f32 1.0, %v9719_v26  ;;  %v7539_v53 = vor.u32 %v9210_v60, %v7536_v1  ;;  %v2774_v34 = vadd.f32 %v2773_v3, %v1102_v25  ;;  %v7387_v1 = vor.u32 %v9172_v48, %v7384_v9  ;;  %v9204_v3 = vld [vmem:[#allocation11 + $0x114] sm:$0xf]  ;;  %v9170_v26 = vld [vmem:[#allocation11 + $0x4] sm:$0xf] }
 0x2df   : > { %4694 = vmatpush.bf16.msrb.mxu1 %v8207_v28  ;;  %4720 = vmatpush.bf16.msrb.mxu3 %v8335_v11  ;;  %v7528_v28 = vld [vmem:[#allocation11 + $0x138] sm:$0xf0]  ;;  %v9192_v11 = vld [vmem:[#allocation11 + $0xb4] sm:$0xf]  ;;  %v2786_v37 = vpop.f32.mrf.mxu1  ;;  %v2799_v5 = vpop.f32.mrf.mxu2 }
 0x2e0   : > { %v2957_v30 = vmul.f32 %v2941_v22, %v2829_v19  ;;  %v10936_v52 = vadd.f32 %v2786_v37, %v2774_v34  ;;  %v7467_v47 = vor.u32 %v9192_v11, %v7464_v63  ;;  %v9248_v25 = vld [vmem:[#allocation11 + $0x274] sm:$0xf]  ;;  %v7448_v22 = vld [vmem:[#allocation11 + $0x98] sm:$0xf0]  ;;  %v7504_v34 = vld [vmem:[#allocation11 + $0x108] sm:$0xf0] }
 0x2e1   : > { %4727 = vmatpush.bf16.msra.mxu0 %v7427_v27  ;;  %4753 = vmatpush.bf16.msra.mxu2 %v7555_v49  ;;  %v9208_v27 = vld [vmem:[#allocation11 + $0x134] sm:$0xf]  ;;  %v7680_v37 = vld [vmem:[#allocation11 + $0x268] sm:$0xf0] }
 0x2e2   : > { %v7531_v49 = vor.u32 %v9208_v27, %v7528_v28  ;;  %v2846_v50 = vmul.f32 0.044715, %v10936_v52  ;;  %v9188_v19 = vld [vmem:[#allocation11 + $0x94] sm:$0xf]  ;;  %v7576_v28 = vld [vmem:[#allocation11 + $0x198] sm:$0xf0] }
 0x2e3   : > { %4739 = vmatpush.bf16.msra.mxu1 %v7499_v40  ;;  %4765 = vmatpush.bf16.msra.mxu3 %v7627_v12  ;;  %v9174_v40 = vld [vmem:[#allocation11 + $0x24] sm:$0xf]  ;;  %v10934_v12 = vpack.c.bf16 %v2957_v30, %v2957_v30  ;;  %v9220_v27 = vld [vmem:[#allocation11 + $0x194] sm:$0xf]  ;;  %v7451_v63 = vor.u32 %v9188_v19, %v7448_v22  ;;  %v7816_v19 = vld [vmem:[#allocation11 + $0x378] sm:$0xf0] }
 0x2e4   : > { %v7395_v43 = vor.u32 %v9174_v40, %v7392_v33  ;;  %v9202_v33 = vld [vmem:[#allocation11 + $0x104] sm:$0xf]  ;;  %v10952_v22 = vld [vmem:[#allocation13] sm:$0x3] }
 0x2e5   : > { %4728 = vmatpush.bf16.msra.mxu0 %v7419_v42  ;;  %4754 = vmatpush.bf16.msra.mxu2 %v7547_v59  ;;  %v1103_v42 = vperm.slane %v9736_v6, 7  ;;  %v7523_v59 = vor.u32 %v9206_v54, %v7520_v44  ;;  %v2812_v4 = vpop.f32.mrf.mxu3  ;;  %v7376_v6 = vld [vmem:[#allocation11 + $0x8] sm:$0xf0]  ;;  %v7752_v54 = vld [vmem:[#allocation11 + $0x2f8] sm:$0xf0]  ;;  %v7507_v44 = vor.u32 %v9202_v33, %v7504_v34 }
 0x2e6   : > { %4695 = vmatmul.bf16.vlgmr.msrb.gmra.mxu1 %v10934_v12  ;;  %v7379_v40 = vor.u32 %v9170_v26, %v7376_v6  ;;  %v7664_v26 = vld [vmem:[#allocation11 + $0x248] sm:$0xf0]  ;;  %v9260_v6 = vld [vmem:[#allocation11 + $0x2d4] sm:$0xf]  ;;  %v9278_v33 = vld [vmem:[#allocation11 + $0x364] sm:$0xf] }
 0x2e7   : > { %4740 = vmatpush.bf16.msra.mxu1 %v7491_v46  ;;  %4766 = vmatpush.bf16.msra.mxu3 %v7619_v57  ;;  %v2775_v46 = vpop.f32.mrf.mxu0  ;;  %v7456_v57 = vld [vmem:[#allocation11 + $0xa8] sm:$0xf0]  ;;  %v2800_v60 = vadd.f32 %v2799_v5, %v1103_v42  ;;  %v2788_v24 = vpop.f32.mrf.mxu1  ;;  %v9186_v5 = vld [vmem:[#allocation11 + $0x84] sm:$0xf]  ;;  %v9264_v42 = vld [vmem:[#allocation11 + $0x2f4] sm:$0xf] }
 0x2e8   : > { %v7459_v7 = vor.u32 %v9190_v55, %v7456_v57  ;;  %v2801_v36 = vpop.f32.mrf.mxu2  ;;  %v9218_v46 = vld [vmem:[#allocation11 + $0x184] sm:$0xf]  ;;  %v7443_v55 = vor.u32 %v9186_v5, %v7440_v56  ;;  %v7808_v34 = vld [vmem:[#allocation11 + $0x368] sm:$0xf0]  ;;  %v9296_v5 = vld [vmem:[#allocation11 + $0x3f4] sm:$0xf] }
 0x2e9   : > { %4729 = vmatpush.bf16.msra.mxu0 %v7411_v39  ;;  %4755 = vmatpush.bf16.msra.mxu2 %v7539_v53  ;;  %v2862_v39 = vmul.f32 %v2846_v50, %v10936_v52  ;;  %v10942_v13 = vadd.f32 %v2812_v4, %v2800_v60  ;;  %v7587_v53 = vor.u32 %v9222_v61, %v7584_v31  ;;  %v7672_v61 = vld [vmem:[#allocation11 + $0x258] sm:$0xf0]  ;;  %v7744_v60 = vld [vmem:[#allocation11 + $0x2e8] sm:$0xf0] }
 0x2ea   : > { %v7811_v56 = vor.u32 %v9278_v33, %v7808_v34 }
 0x2eb   : > { %4741 = vmatpush.bf16.msra.mxu1 %v7483_v38  ;;  %4767 = vmatpush.bf16.msra.mxu3 %v7611_v17  ;;  %v7512_v38 = vld [vmem:[#allocation11 + $0x118] sm:$0xf0]  ;;  %v2878_v10 = vmul.f32 %v2862_v39, %v10936_v52  ;;  %v2847_v30 = vmul.f32 0.044715, %v10942_v13  ;;  %v9262_v39 = vld [vmem:[#allocation11 + $0x2e4] sm:$0xf] }
 0x2ec   : > { %v7688_v17 = vld [vmem:[#allocation11 + $0x278] sm:$0xf0] }
 0x2ed   : > { %4730 = vmatpush.bf16.msra.mxu0 %v7403_v23  ;;  %4756 = vmatpush.bf16.msra.mxu2 %v7531_v49  ;;  %v7515_v23 = vor.u32 %v9204_v3, %v7512_v38  ;;  %v7691_v11 = vor.u32 %v9248_v25, %v7688_v17  ;;  %v2863_v41 = vmul.f32 %v2847_v30, %v10942_v13  ;;  %v2814_v9 = vpop.f32.mrf.mxu3  ;;  %v9242_v38 = vld [vmem:[#allocation11 + $0x244] sm:$0xf]  ;;  %v7736_v25 = vld [vmem:[#allocation11 + $0x2d8] sm:$0xf0] }
 0x2ee   : > { %v7739_v36 = vor.u32 %v9260_v6, %v7736_v25  ;;  %v7792_v6 = vld [vmem:[#allocation11 + $0x348] sm:$0xf0] }
 0x2ef   : > { %4742 = vmatpush.bf16.msra.mxu1 %v7475_v29  ;;  %4768 = vmatpush.bf16.msra.mxu3 %v7603_v15  ;;  %v2894_v29 = vadd.f32 %v2878_v10, %v10936_v52  ;;  %v9246_v15 = vld [vmem:[#allocation11 + $0x264] sm:$0xf]  ;;  %v2879_v48 = vmul.f32 %v2863_v41, %v10942_v13  ;;  %v2830_v10 = vmul.f32 0.5, %v10936_v52  ;;  %v7728_v52 = vld [vmem:[#allocation11 + $0x2c8] sm:$0xf0] }
 0x2f0   : > { %v7683_v50 = vor.u32 %v9246_v15, %v7680_v37 }
 0x2f1   : > { %4731 = vmatpush.bf16.msra.mxu0 %v7395_v43  ;;  %4757 = vmatpush.bf16.msra.mxu2 %v7523_v59  ;;  %v2910_v49 = vmul.f32 0.7978846, %v2894_v29  ;;  %v7579_v43 = vor.u32 %v9220_v27, %v7576_v28  ;;  %v2895_v57 = vadd.f32 %v2879_v48, %v10942_v13  ;;  %v9244_v59 = vld [vmem:[#allocation11 + $0x254] sm:$0xf]  ;;  %v7656_v28 = vld [vmem:[#allocation11 + $0x238] sm:$0xf0] }
 0x2f2   : > { %v7675_v3 = vor.u32 %v9244_v59, %v7672_v61  ;;  %v9240_v27 = vld [vmem:[#allocation11 + $0x234] sm:$0xf]  ;;  %v9258_v29 = vld [vmem:[#allocation11 + $0x2c4] sm:$0xf]  ;;  %v7800_v48 = vld [vmem:[#allocation11 + $0x358] sm:$0xf0] }
 0x2f3   : > { %4743 = vmatpush.bf16.msra.mxu1 %v7467_v47  ;;  %4769 = vmatpush.bf16.msra.mxu3 %v7595_v58  ;;  %v7568_v47 = vld [vmem:[#allocation11 + $0x188] sm:$0xf0]  ;;  %9720 = vtanh.f32 %v2910_v49  ;;  %v7755_v58 = vor.u32 %v9264_v42, %v7752_v54  ;;  %v7659_v15 = vor.u32 %v9240_v27, %v7656_v28  ;;  %v7880_v49 = vld [vmem:[#allocation11 + $0x3f8] sm:$0xf0]  ;;  %v7731_v41 = vor.u32 %v9258_v29, %v7728_v52  ;;  %v9238_v42 = vld [vmem:[#allocation11 + $0x224] sm:$0xf] }
 0x2f4   : > { %v7571_v31 = vor.u32 %v9218_v46, %v7568_v47  ;;  %v9256_v54 = vld [vmem:[#allocation11 + $0x2b4] sm:$0xf]  ;;  %v7720_v46 = vld [vmem:[#allocation11 + $0x2b8] sm:$0xf0]  ;;  %v9294_v59 = vld [vmem:[#allocation11 + $0x3e4] sm:$0xf] }
 0x2f5   : > { %4732 = vmatpush.bf16.msra.mxu0 %v7387_v1  ;;  %4758 = vmatpush.bf16.msra.mxu2 %v7515_v23  ;;  %v2911_v1 = vmul.f32 0.7978846, %v2895_v57  ;;  %v9276_v47 = vld [vmem:[#allocation11 + $0x354] sm:$0xf]  ;;  %v7872_v61 = vld [vmem:[#allocation11 + $0x3e8] sm:$0xf0] }
 0x2f6   : > { %v9312_v27 = vld [vmem:[#allocation11 + $0x474] sm:$0xf]  ;;  %v7944_v29 = vld [vmem:[#allocation11 + $0x478] sm:$0xf0] }
 0x2f7   : > { %4744 = vmatpush.bf16.msra.mxu1 %v7459_v7  ;;  %4770 = vmatpush.bf16.msra.mxu3 %v7587_v53  ;;  %9722 = vtanh.f32 %v2911_v1  ;;  %v7747_v7 = vor.u32 %v9262_v39, %v7744_v60  ;;  %v7667_v53 = vor.u32 %v9242_v38, %v7664_v26  ;;  %v7723_v39 = vor.u32 %v9256_v54, %v7720_v46  ;;  %v9236_v1 = vld [vmem:[#allocation11 + $0x214] sm:$0xf]  ;;  %v9254_v38 = vld [vmem:[#allocation11 + $0x2a4] sm:$0xf]  ;;  %v7704_v52 = vld [vmem:[#allocation11 + $0x298] sm:$0xf0] }
 0x2f8   : > { %v7803_v60 = vor.u32 %v9276_v47, %v7800_v48  ;;  %v9274_v26 = vld [vmem:[#allocation11 + $0x344] sm:$0xf]  ;;  %v7696_v46 = vld [vmem:[#allocation11 + $0x288] sm:$0xf0] }
 0x2f9   : > { %4733 = vmatpush.bf16.msra.mxu0 %v7379_v40  ;;  %4759 = vmatpush.bf16.msra.mxu2 %v7507_v44  ;;  %v9721_v4 = vpop.eup %9720  ;;  %v4527_v30 = vpop.f32.mrf.mxu0  ;;  %v9270_v47 = vld [vmem:[#allocation11 + $0x324] sm:$0xf] }
 0x2fa   : > { %v2942_v17 = vadd.f32 1.0, %v9721_v4 }
 0x2fb   : > { %4745 = vmatpush.bf16.msra.mxu1 %v7451_v63  ;;  %4771 = vmatpush.bf16.msra.mxu3 %v7579_v43  ;;  %v2831_v63 = vmul.f32 0.5, %v10942_v13  ;;  %v7648_v43 = vld [vmem:[#allocation11 + $0x228] sm:$0xf0]  ;;  %v7883_v13 = vor.u32 %v9296_v5, %v7880_v49  ;;  %v9290_v5 = vld [vmem:[#allocation11 + $0x3c4] sm:$0xf] }
 0x2fc   : > { %4734 = vmatmul.bf16.vlgmr.msra.gmra.mxu0 %v10825_v20  ;;  %v9280_v20 = vld [vmem:[#allocation11 + $0x374] sm:$0xf]  ;;  %v2958_v24 = vmul.f32 %v2942_v17, %v2830_v10  ;;  %v7875_v10 = vor.u32 %v9294_v59, %v7872_v61  ;;  %v7856_v49 = vld [vmem:[#allocation11 + $0x3c8] sm:$0xf0]  ;;  %v7848_v61 = vld [vmem:[#allocation11 + $0x3b8] sm:$0xf0] }
 0x2fd   : > { %4778 = vmatpush.bf16.msrb.mxu0 %v7691_v11  ;;  %v7819_v23 = vor.u32 %v9280_v20, %v7816_v19  ;;  %v9723_v11 = vpop.eup %9722  ;;  %v9292_v20 = vld [vmem:[#allocation11 + $0x3d4] sm:$0xf]  ;;  %v7864_v19 = vld [vmem:[#allocation11 + $0x3d8] sm:$0xf0]  ;;  %v7859_v48 = vor.u32 %v9290_v5, %v7856_v49  ;;  %v7984_v5 = vld [vmem:[#allocation11 + $0x4c8] sm:$0xf0] }
 0x2fe   : > { %v10954_v40 = vpack.c.bf16 %v2958_v24, %v2958_v24  ;;  %v2943_v37 = vadd.f32 1.0, %v9723_v11  ;;  %v7795_v24 = vor.u32 %v9274_v26, %v7792_v6  ;;  %v7867_v34 = vor.u32 %v9292_v20, %v7864_v19  ;;  %v9272_v11 = vld [vmem:[#allocation11 + $0x334] sm:$0xf]  ;;  %v8000_v26 = vld [vmem:[#allocation11 + $0x4e8] sm:$0xf0] }
 0x2ff   : > { %4746 = vmatpush.bf16.msra.mxu1 %v7443_v55  ;;  %4772 = vmatpush.bf16.msra.mxu3 %v7571_v31  ;;  %v4553_v55 = vpop.f32.mrf.mxu2  ;;  %v9288_v59 = vld [vmem:[#allocation11 + $0x3b4] sm:$0xf]  ;;  %v9306_v19 = vld [vmem:[#allocation11 + $0x444] sm:$0xf] }
 0x300   : > { %4708 = vmatmul.bf16.vlgmr.msrb.gmra.mxu2 %v10954_v40  ;;  %v2959_v44 = vmul.f32 %v2943_v37, %v2831_v63 }
 0x301   : > { %4779 = vmatpush.bf16.msrb.mxu0 %v7683_v50  ;;  %4804 = vmatpush.bf16.msrb.mxu2 %v7819_v23  ;;  %v4540_v50 = vpop.f32.mrf.mxu1  ;;  %v4529_v4 = vpop.f32.mrf.mxu0  ;;  %v7632_v23 = vld [vmem:[#allocation11 + $0x208] sm:$0xf0] }
 0x302   : > { %4747 = vmatmul.bf16.vlgmr.msra.gmra.mxu1 %v10840_v8  ;;  %v3234_v8 = vperm.slane %v10952_v22, 0  ;;  %v10959_v57 = vpack.c.bf16 %v2959_v44, %v2959_v44  ;;  %v9250_v44 = vld [vmem:[#allocation11 + $0x284] sm:$0xf]  ;;  %v7768_v4 = vld [vmem:[#allocation11 + $0x318] sm:$0xf0] }
 0x303   : > { %4791 = vmatpush.bf16.msrb.mxu1 %v7755_v58  ;;  %v7651_v58 = vor.u32 %v9238_v42, %v7648_v43  ;;  %v9310_v42 = vld [vmem:[#allocation11 + $0x464] sm:$0xf]  ;;  %v7936_v43 = vld [vmem:[#allocation11 + $0x468] sm:$0xf0] }
 0x304   : > { %v4528_v9 = vadd.f32 %v4527_v30, %v3234_v8  ;;  %4721 = vmatmul.bf16.vlgmr.msrb.gmra.mxu3 %v10959_v57  ;;  %v9252_v30 = vld [vmem:[#allocation11 + $0x294] sm:$0xf]  ;;  %v7784_v8 = vld [vmem:[#allocation11 + $0x338] sm:$0xf0] }
 0x305   : > { %4780 = vmatpush.bf16.msrb.mxu0 %v7675_v3  ;;  %4805 = vmatpush.bf16.msrb.mxu2 %v7811_v56  ;;  %v7640_v3 = vld [vmem:[#allocation11 + $0x218] sm:$0xf0]  ;;  %v4566_v28 = vpop.f32.mrf.mxu3  ;;  %v7707_v56 = vor.u32 %v9252_v30, %v7704_v52  ;;  %v7787_v54 = vor.u32 %v9272_v11, %v7784_v8  ;;  %v9284_v52 = vld [vmem:[#allocation11 + $0x394] sm:$0xf] }
 0x306   : > { %v4541_v31 = vadd.f32 %v4540_v50, %v4528_v9  ;;  %4817 = vmatpush.bf16.msrb.mxu3 %v7883_v13  ;;  %v7643_v17 = vor.u32 %v9236_v1, %v7640_v3  ;;  %v7776_v9 = vld [vmem:[#allocation11 + $0x328] sm:$0xf0]  ;;  %v9328_v13 = vld [vmem:[#allocation11 + $0x4f4] sm:$0xf]  ;;  %v8008_v50 = vld [vmem:[#allocation11 + $0x4f8] sm:$0xf0] }
 0x307   : > { %4792 = vmatpush.bf16.msrb.mxu1 %v7747_v7  ;;  %v7712_v7 = vld [vmem:[#allocation11 + $0x2a8] sm:$0xf0]  ;;  %v9308_v1 = vld [vmem:[#allocation11 + $0x454] sm:$0xf]  ;;  %v7928_v3 = vld [vmem:[#allocation11 + $0x458] sm:$0xf0] }
 0x308   : > { %v4554_v25 = vadd.f32 %v4553_v55, %v4541_v31  ;;  %v7939_v55 = vor.u32 %v9310_v42, %v7936_v43  ;;  %v7931_v6 = vor.u32 %v9308_v1, %v7928_v3  ;;  %v9300_v1 = vld [vmem:[#allocation11 + $0x414] sm:$0xf] }
 0x309   : > { %4781 = vmatpush.bf16.msrb.mxu0 %v7667_v53  ;;  %4806 = vmatpush.bf16.msrb.mxu2 %v7803_v60  ;;  %v7715_v53 = vor.u32 %v9254_v38, %v7712_v7  ;;  %v4542_v63 = vpop.f32.mrf.mxu1  ;;  %v8011_v60 = vor.u32 %v9328_v13, %v8008_v50  ;;  %v9268_v38 = vld [vmem:[#allocation11 + $0x314] sm:$0xf]  ;;  %v9326_v7 = vld [vmem:[#allocation11 + $0x4e4] sm:$0xf]  ;;  %v8136_v13 = vld [vmem:[#allocation11 + $0x5f8] sm:$0xf0] }
 0x30a   : > { %v10962_v33 = vadd.f32 %v4566_v28, %v4554_v25  ;;  %4818 = vmatpush.bf16.msrb.mxu3 %v7875_v10  ;;  %v9286_v25 = vld [vmem:[#allocation11 + $0x3a4] sm:$0xf]  ;;  %v7840_v10 = vld [vmem:[#allocation11 + $0x3a8] sm:$0xf0]  ;;  %v8003_v20 = vor.u32 %v9326_v7, %v8000_v26  ;;  %v9344_v28 = vld [vmem:[#allocation11 + $0x574] sm:$0xf] }
 0x30b   : > { %4793 = vmatpush.bf16.msrb.mxu1 %v7739_v36  ;;  %v9234_v36 = vld [vmem:[#allocation11 + $0x204] sm:$0xf]  ;;  %v9304_v63 = vld [vmem:[#allocation11 + $0x434] sm:$0xf]  ;;  %v7896_v7 = vld [vmem:[#allocation11 + $0x418] sm:$0xf0] }
 0x30c   : > { %v7635_v37 = vor.u32 %v9234_v36, %v7632_v23  ;;  %v9324_v36 = vld [vmem:[#allocation11 + $0x4d4] sm:$0xf]  ;;  %v7992_v23 = vld [vmem:[#allocation11 + $0x4d8] sm:$0xf0]  ;;  %v9358_v26 = vld [vmem:[#allocation11 + $0x5e4] sm:$0xf] }
 0x30d   : > { %4782 = vmatpush.bf16.msrb.mxu0 %v7659_v15  ;;  %v4555_v15 = vpop.f32.mrf.mxu2  ;;  %4807 = vmatpush.bf16.msrb.mxu2 %v7795_v24  ;;  %v4568_v31 = vpop.f32.mrf.mxu3  ;;  %v9266_v24 = vld [vmem:[#allocation11 + $0x304] sm:$0xf]  ;;  %v7995_v8 = vor.u32 %v9324_v36, %v7992_v23  ;;  %v7888_v36 = vld [vmem:[#allocation11 + $0x408] sm:$0xf0] }
 0x30e   : > { %4819 = vmatpush.bf16.msrb.mxu3 %v7867_v34  ;;  %v7832_v34 = vld [vmem:[#allocation11 + $0x398] sm:$0xf0] }
 0x30f   : > { %4794 = vmatpush.bf16.msrb.mxu1 %v7731_v41  ;;  %v7947_v41 = vor.u32 %v9312_v27, %v7944_v29  ;;  %v7843_v27 = vor.u32 %v9286_v25, %v7840_v10  ;;  %v8072_v29 = vld [vmem:[#allocation11 + $0x578] sm:$0xf0]  ;;  %v9318_v25 = vld [vmem:[#allocation11 + $0x4a4] sm:$0xf]  ;;  %v7968_v10 = vld [vmem:[#allocation11 + $0x4a8] sm:$0xf0] }
 0x310   : > { %4760 = vmatmul.bf16.vlgmr.msra.gmra.mxu2 %v10828_v45  ;;  %v7851_v45 = vor.u32 %v9288_v59, %v7848_v61  ;;  %v7912_v15 = vld [vmem:[#allocation11 + $0x438] sm:$0xf0]  ;;  %v9340_v61 = vld [vmem:[#allocation11 + $0x554] sm:$0xf]  ;;  %v7971_v23 = vor.u32 %v9318_v25, %v7968_v10  ;;  %v9350_v25 = vld [vmem:[#allocation11 + $0x5a4] sm:$0xf] }
 0x311   : > { %4783 = vmatpush.bf16.msrb.mxu0 %v7651_v58  ;;  %v7699_v58 = vor.u32 %v9250_v44, %v7696_v46  ;;  %4808 = vmatpush.bf16.msrb.mxu2 %v7787_v54  ;;  %v7915_v43 = vor.u32 %v9304_v63, %v7912_v15  ;;  %v9282_v54 = vld [vmem:[#allocation11 + $0x384] sm:$0xf]  ;;  %v7824_v44 = vld [vmem:[#allocation11 + $0x388] sm:$0xf0]  ;;  %v8056_v31 = vld [vmem:[#allocation11 + $0x558] sm:$0xf0] }
 0x312   : > { %4820 = vmatpush.bf16.msrb.mxu3 %v7859_v48  ;;  %v9302_v46 = vld [vmem:[#allocation11 + $0x424] sm:$0xf]  ;;  %v7904_v48 = vld [vmem:[#allocation11 + $0x428] sm:$0xf0]  ;;  %v7827_v59 = vor.u32 %v9282_v54, %v7824_v44  ;;  %v9336_v63 = vld [vmem:[#allocation11 + $0x534] sm:$0xf] }
 0x313   : > { %4795 = vmatpush.bf16.msrb.mxu1 %v7723_v39  ;;  %v7779_v39 = vor.u32 %v9270_v47, %v7776_v9  ;;  %v9360_v9 = vld [vmem:[#allocation11 + $0x5f4] sm:$0xf]  ;;  %v8040_v15 = vld [vmem:[#allocation11 + $0x538] sm:$0xf0]  ;;  %v8192_v54 = vld [vmem:[#allocation11 + $0x668] sm:$0xf0] }
 0x314   : > { %4773 = vmatmul.bf16.vlgmr.msra.gmra.mxu3 %v10843_v18  ;;  %v8075_v18 = vor.u32 %v9344_v28, %v8072_v29  ;;  %v8120_v28 = vld [vmem:[#allocation11 + $0x5d8] sm:$0xf0]  ;;  %v9376_v29 = vld [vmem:[#allocation11 + $0x674] sm:$0xf]  ;;  %v8043_v44 = vor.u32 %v9336_v63, %v8040_v15  ;;  %v8096_v10 = vld [vmem:[#allocation11 + $0x5a8] sm:$0xf0] }
 0x315   : > { %4784 = vmatpush.bf16.msrb.mxu0 %v7643_v17  ;;  %4809 = vmatpush.bf16.msrb.mxu2 %v7779_v39  ;;  %v7771_v17 = vor.u32 %v9268_v38, %v7768_v4  ;;  %v7907_v39 = vor.u32 %v9302_v46, %v7904_v48  ;;  %v9314_v46 = vld [vmem:[#allocation11 + $0x484] sm:$0xf] }
 0x316   : > { %4821 = vmatpush.bf16.msrb.mxu3 %v7851_v45  ;;  %v8128_v45 = vld [vmem:[#allocation11 + $0x5e8] sm:$0xf0]  ;;  %v9334_v48 = vld [vmem:[#allocation11 + $0x524] sm:$0xf] }
 0x317   : > { %4796 = vmatpush.bf16.msrb.mxu1 %v7715_v53  ;;  %v7920_v53 = vld [vmem:[#allocation11 + $0x448] sm:$0xf0]  ;;  %v9386_v15 = vld [vmem:[#allocation11 + $0x6c4] sm:$0xf] }
 0x318   : > { %v7923_v30 = vor.u32 %v9306_v19, %v7920_v53  ;;  %v9338_v19 = vld [vmem:[#allocation11 + $0x544] sm:$0xf]  ;;  %v8048_v53 = vld [vmem:[#allocation11 + $0x548] sm:$0xf0] }
 0x319   : > { %4785 = vmatpush.bf16.msrb.mxu0 %v7635_v37  ;;  %4810 = vmatpush.bf16.msrb.mxu2 %v7771_v17  ;;  %v9322_v37 = vld [vmem:[#allocation11 + $0x4c4] sm:$0xf]  ;;  %v4579_v49 = vpop.f32.mrf.mxu0 }
 0x31a   : > { %4822 = vmatpush.bf16.msrb.mxu3 %v7843_v27  ;;  %v4580_v42 = vadd.f32 %v4579_v49, %v10962_v33  ;;  %v7987_v47 = vor.u32 %v9322_v37, %v7984_v5  ;;  %v9356_v27 = vld [vmem:[#allocation11 + $0x5d4] sm:$0xf] }
 0x31b   : > { %4797 = vmatpush.bf16.msrb.mxu1 %v7707_v56  ;;  %v8064_v56 = vld [vmem:[#allocation11 + $0x568] sm:$0xf0]  ;;  %v8123_v49 = vor.u32 %v9356_v27, %v8120_v28  ;;  %v8328_v27 = vld [vmem:[#allocation11 + $0x778] sm:$0xf0] }
 0x31c   : > { %4786 = vmatmul.bf16.vlgmr.msrb.gmra.mxu0 %v10866_v14  ;;  %v7760_v14 = vld [vmem:[#allocation11 + $0x308] sm:$0xf0] }
 0x31d   : > { %4830 = vmatpush.bf16.msra.mxu0 %v7947_v41  ;;  %v7763_v11 = vor.u32 %v9266_v24, %v7760_v14  ;;  %v7835_v41 = vor.u32 %v9284_v52, %v7832_v34  ;;  %v8131_v24 = vor.u32 %v9358_v26, %v8128_v45  ;;  %v9298_v14 = vld [vmem:[#allocation11 + $0x404] sm:$0xf]  ;;  %v8200_v52 = vld [vmem:[#allocation11 + $0x678] sm:$0xf0]  ;;  %v9316_v34 = vld [vmem:[#allocation11 + $0x494] sm:$0xf] }
 0x31e   : > { %v7891_v5 = vor.u32 %v9298_v14, %v7888_v36  ;;  %v8256_v26 = vld [vmem:[#allocation11 + $0x6e8] sm:$0xf0]  ;;  %v9388_v14 = vld [vmem:[#allocation11 + $0x6d4] sm:$0xf]  ;;  %v8099_v36 = vor.u32 %v9350_v25, %v8096_v10  ;;  %v9362_v25 = vld [vmem:[#allocation11 + $0x604] sm:$0xf] }
 0x31f   : > { %4798 = vmatpush.bf16.msrb.mxu1 %v7699_v58  ;;  %4811 = vmatpush.bf16.msrb.mxu2 %v7763_v11  ;;  %v7976_v58 = vld [vmem:[#allocation11 + $0x4b8] sm:$0xf0]  ;;  %v4592_v33 = vpop.f32.mrf.mxu1  ;;  %v4605_v38 = vpop.f32.mrf.mxu2 }
 0x320   : > { %4823 = vmatpush.bf16.msrb.mxu3 %v7835_v41  ;;  %v4593_v3 = vadd.f32 %v4592_v33, %v4580_v42  ;;  %v7960_v11 = vld [vmem:[#allocation11 + $0x498] sm:$0xf0]  ;;  %v9354_v41 = vld [vmem:[#allocation11 + $0x5c4] sm:$0xf] }
 0x321   : > { %4831 = vmatpush.bf16.msra.mxu0 %v7939_v55  ;;  %v9320_v55 = vld [vmem:[#allocation11 + $0x4b4] sm:$0xf]  ;;  %v7963_v42 = vor.u32 %v9316_v34, %v7960_v11 }
 0x322   : > { %4799 = vmatmul.bf16.vlgmr.msrb.gmra.mxu1 %v10878_v51  ;;  %v9342_v51 = vld [vmem:[#allocation11 + $0x564] sm:$0xf]  ;;  %4812 = vmatmul.bf16.vlgmr.msrb.gmra.mxu2 %v10870_v62  ;;  %v7979_v4 = vor.u32 %v9320_v55, %v7976_v58  ;;  %v4606_v17 = vadd.f32 %v4605_v38, %v4593_v3  ;;  %v7899_v62 = vor.u32 %v9300_v1, %v7896_v7  ;;  %v8184_v1 = vld [vmem:[#allocation11 + $0x658] sm:$0xf0]  ;;  %v9332_v3 = vld [vmem:[#allocation11 + $0x514] sm:$0xf] }
 0x323   : > { %4843 = vmatpush.bf16.msra.mxu1 %v8011_v60  ;;  %4856 = vmatpush.bf16.msra.mxu2 %v8075_v18  ;;  %v8067_v50 = vor.u32 %v9342_v51, %v8064_v56  ;;  %v8139_v60 = vor.u32 %v9360_v9, %v8136_v13  ;;  %v8203_v56 = vor.u32 %v9376_v29, %v8200_v52  ;;  %v8032_v9 = vld [vmem:[#allocation11 + $0x528] sm:$0xf0]  ;;  %v9392_v13 = vld [vmem:[#allocation11 + $0x6f4] sm:$0xf]  ;;  %v9390_v7 = vld [vmem:[#allocation11 + $0x6e4] sm:$0xf] }
 0x324   : > { %4824 = vmatpush.bf16.msrb.mxu3 %v7827_v59  ;;  %v8035_v33 = vor.u32 %v9334_v48, %v8032_v9  ;;  %v9348_v29 = vld [vmem:[#allocation11 + $0x594] sm:$0xf] }
 0x325   : > { %4832 = vmatpush.bf16.msra.mxu0 %v7931_v6  ;;  %v8059_v6 = vor.u32 %v9340_v61, %v8056_v31  ;;  %v9352_v61 = vld [vmem:[#allocation11 + $0x5b4] sm:$0xf]  ;;  %v8104_v31 = vld [vmem:[#allocation11 + $0x5b8] sm:$0xf0] }
 0x326   : > { %v8107_v45 = vor.u32 %v9352_v61, %v8104_v31  ;;  %v9368_v11 = vld [vmem:[#allocation11 + $0x634] sm:$0xf] }
 0x327   : > { %4844 = vmatpush.bf16.msra.mxu1 %v8003_v20  ;;  %4857 = vmatpush.bf16.msra.mxu2 %v8067_v50  ;;  %v4581_v20 = vpop.f32.mrf.mxu0  ;;  %v4594_v37 = vpop.f32.mrf.mxu1  ;;  %v8264_v50 = vld [vmem:[#allocation11 + $0x6f8] sm:$0xf0]  ;;  %v9384_v9 = vld [vmem:[#allocation11 + $0x6b4] sm:$0xf] }
 0x328   : > { %4869 = vmatpush.bf16.msra.mxu3 %v8139_v60  ;;  %v4607_v51 = vpop.f32.mrf.mxu2  ;;  %v9372_v60 = vld [vmem:[#allocation11 + $0x654] sm:$0xf]  ;;  %v8259_v20 = vor.u32 %v9390_v7, %v8256_v26  ;;  %v8240_v37 = vld [vmem:[#allocation11 + $0x6c8] sm:$0xf0]  ;;  %v9402_v26 = vld [vmem:[#allocation11 + $0x744] sm:$0xf] }
 0x329   : > { %4833 = vmatpush.bf16.msra.mxu0 %v7923_v30  ;;  %4825 = vmatmul.bf16.vlgmr.msrb.gmra.mxu3 %v10880_v32  ;;  %v8051_v30 = vor.u32 %v9338_v19, %v8048_v53  ;;  %v8112_v32 = vld [vmem:[#allocation11 + $0x5c8] sm:$0xf0]  ;;  %v9370_v19 = vld [vmem:[#allocation11 + $0x644] sm:$0xf]  ;;  %v9364_v31 = vld [vmem:[#allocation11 + $0x614] sm:$0xf] }
 0x32a   : > { %v8115_v55 = vor.u32 %v9354_v41, %v8112_v32  ;;  %v8176_v53 = vld [vmem:[#allocation11 + $0x648] sm:$0xf0] }
 0x32b   : > { %4845 = vmatpush.bf16.msra.mxu1 %v7995_v8  ;;  %4858 = vmatpush.bf16.msra.mxu2 %v8059_v6  ;;  %v4618_v8 = vpop.f32.mrf.mxu3  ;;  %v8187_v6 = vor.u32 %v9372_v60, %v8184_v1  ;;  %v8179_v28 = vor.u32 %v9370_v19, %v8176_v53  ;;  %v8320_v41 = vld [vmem:[#allocation11 + $0x768] sm:$0xf0]  ;;  %v9422_v60 = vld [vmem:[#allocation11 + $0x7e4] sm:$0xf]  ;;  %v8376_v19 = vld [vmem:[#allocation11 + $0x7d8] sm:$0xf0] }
 0x32c   : > { %v10971_v18 = vadd.f32 %v4618_v8, %v4606_v17  ;;  %4870 = vmatpush.bf16.msra.mxu3 %v8131_v24  ;;  %v8016_v24 = vld [vmem:[#allocation11 + $0x508] sm:$0xf0]  ;;  %v8168_v8 = vld [vmem:[#allocation11 + $0x638] sm:$0xf0] }
 0x32d   : > { %4834 = vmatpush.bf16.msra.mxu0 %v7915_v43  ;;  %v9374_v43 = vld [vmem:[#allocation11 + $0x664] sm:$0xf]  ;;  %v8080_v32 = vld [vmem:[#allocation11 + $0x588] sm:$0xf0] }
 0x32e   : > { %v8195_v58 = vor.u32 %v9374_v43, %v8192_v54  ;;  %v9366_v43 = vld [vmem:[#allocation11 + $0x624] sm:$0xf]  ;;  %v8243_v54 = vor.u32 %v9386_v15, %v8240_v37  ;;  %v8384_v1 = vld [vmem:[#allocation11 + $0x7e8] sm:$0xf0] }
 0x32f   : > { %4846 = vmatpush.bf16.msra.mxu1 %v7987_v47  ;;  %4859 = vmatpush.bf16.msra.mxu2 %v8051_v30  ;;  %v7952_v47 = vld [vmem:[#allocation11 + $0x488] sm:$0xf0]  ;;  %v8088_v30 = vld [vmem:[#allocation11 + $0x598] sm:$0xf0] }
 0x330   : > { %4871 = vmatpush.bf16.msra.mxu3 %v8123_v49  ;;  %v7955_v59 = vor.u32 %v9314_v46, %v7952_v47  ;;  %v8091_v49 = vor.u32 %v9348_v29, %v8088_v30  ;;  %v9424_v46 = vld [vmem:[#allocation11 + $0x7f4] sm:$0xf]  ;;  %v8392_v47 = vld [vmem:[#allocation11 + $0x7f8] sm:$0xf0]  ;;  %v9418_v30 = vld [vmem:[#allocation11 + $0x7c4] sm:$0xf] }
 0x331   : > { %4835 = vmatpush.bf16.msra.mxu0 %v7907_v39  ;;  %v8267_v39 = vor.u32 %v9392_v13, %v8264_v50  ;;  %v8232_v13 = vld [vmem:[#allocation11 + $0x6b8] sm:$0xf0]  ;;  %v8395_v61 = vor.u32 %v9424_v46, %v8392_v47  ;;  %v9414_v46 = vld [vmem:[#allocation11 + $0x7a4] sm:$0xf]  ;;  %v8352_v47 = vld [vmem:[#allocation11 + $0x7a8] sm:$0xf0] }
 0x333   : > { %4847 = vmatpush.bf16.msra.mxu1 %v7979_v4  ;;  %4860 = vmatpush.bf16.msra.mxu2 %v8043_v44  ;;  %v4620_v38 = vpop.f32.mrf.mxu3  ;;  %v8024_v4 = vld [vmem:[#allocation11 + $0x518] sm:$0xf0]  ;;  %v8160_v44 = vld [vmem:[#allocation11 + $0x628] sm:$0xf0] }
 0x334   : > { %4872 = vmatpush.bf16.msra.mxu3 %v8115_v55  ;;  %v8027_v17 = vor.u32 %v9332_v3, %v8024_v4  ;;  %v9404_v55 = vld [vmem:[#allocation11 + $0x754] sm:$0xf]  ;;  %v9382_v38 = vld [vmem:[#allocation11 + $0x6a4] sm:$0xf]  ;;  %v8224_v4 = vld [vmem:[#allocation11 + $0x6a8] sm:$0xf0] }
 0x335   : > { %4836 = vmatpush.bf16.msra.mxu0 %v7899_v62  ;;  %v9330_v62 = vld [vmem:[#allocation11 + $0x504] sm:$0xf]  ;;  %v8227_v10 = vor.u32 %v9382_v38, %v8224_v4  ;;  %v8336_v38 = vld [vmem:[#allocation11 + $0x788] sm:$0xf0] }
 0x336   : > { %v8019_v52 = vor.u32 %v9330_v62, %v8016_v24  ;;  %v9380_v62 = vld [vmem:[#allocation11 + $0x694] sm:$0xf]  ;;  %v8216_v24 = vld [vmem:[#allocation11 + $0x698] sm:$0xf0] }
 0x337   : > { %4848 = vmatpush.bf16.msra.mxu1 %v7971_v23  ;;  %4861 = vmatpush.bf16.msra.mxu2 %v8035_v33  ;;  %v9408_v23 = vld [vmem:[#allocation11 + $0x774] sm:$0xf]  ;;  %v8235_v33 = vor.u32 %v9384_v9, %v8232_v13  ;;  %v8219_v29 = vor.u32 %v9380_v62, %v8216_v24  ;;  %v10993_v9 = vld [vmem:[#allocation5 + $0xd0] sm:$0xff]  ;;  %v8272_v13 = vld [vmem:[#allocation11 + $0x708] sm:$0xf0] }
 0x338   : > { %4873 = vmatpush.bf16.msra.mxu3 %v8107_v45  ;;  %v8331_v63 = vor.u32 %v9408_v23, %v8328_v27  ;;  %v8304_v45 = vld [vmem:[#allocation11 + $0x748] sm:$0xf0]  ;;  %v11051_v24 = vld [vmem:[#allocation5 + $0xc8] sm:$0xff] }
 0x339   : > { %4837 = vmatpush.bf16.msra.mxu0 %v7891_v5  ;;  %v4631_v5 = vpop.f32.mrf.mxu0  ;;  %v8307_v53 = vor.u32 %v9402_v26, %v8304_v45  ;;  %v11012_v4 = vld [vmem:[#allocation5 + $0xa0] sm:$0xff]  ;;  %v11018_v26 = vld [vmem:[#allocation5 + $0xf8] sm:$0xff]  ;;  %v11021_v45 = vld [vmem:[#allocation5 + $0x90] sm:$0xff] }
 0x33a   : > { %v10976_v51 = vadd.f32 %v4631_v5, %v10971_v18  ;;  %v8312_v18 = vld [vmem:[#allocation11 + $0x758] sm:$0xf0]  ;;  %v9416_v5 = vld [vmem:[#allocation11 + $0x7b4] sm:$0xf]  ;;  %v11048_v62 = vld [vmem:[#allocation5 + $0x1f8] sm:$0xff] }
 0x33b   : > { %4849 = vmatpush.bf16.msra.mxu1 %v7963_v42  ;;  %4862 = vmatpush.bf16.msra.mxu2 %v8027_v17  ;;  %v9346_v42 = vld [vmem:[#allocation11 + $0x584] sm:$0xf]  ;;  %v8315_v3 = vor.u32 %v9404_v55, %v8312_v18  ;;  %v8144_v17 = vld [vmem:[#allocation11 + $0x608] sm:$0xf0]  ;;  %v8355_v55 = vor.u32 %v9414_v46, %v8352_v47  ;;  %v9412_v18 = vld [vmem:[#allocation11 + $0x794] sm:$0xf] }
 0x33c   : > { %4838 = vmatmul.bf16.vlgmr.msra.gmra.mxu0 %v10901_v16  ;;  %v8248_v16 = vld [vmem:[#allocation11 + $0x6d8] sm:$0xf0]  ;;  %4874 = vmatpush.bf16.msra.mxu3 %v8099_v36  ;;  %v8083_v50 = vor.u32 %v9346_v42, %v8080_v32  ;;  %v8147_v23 = vor.u32 %v9362_v25, %v8144_v17  ;;  %v9396_v42 = vld [vmem:[#allocation11 + $0x714] sm:$0xf] }
 0x33d   : > { %4882 = vmatpush.bf16.msrb.mxu0 %v8203_v56  ;;  %v8251_v34 = vor.u32 %v9388_v14, %v8248_v16  ;;  %v8171_v56 = vor.u32 %v9368_v11, %v8168_v8  ;;  %v9400_v14 = vld [vmem:[#allocation11 + $0x734] sm:$0xf]  ;;  %v8296_v16 = vld [vmem:[#allocation11 + $0x738] sm:$0xf0]  ;;  %v8208_v11 = vld [vmem:[#allocation11 + $0x688] sm:$0xf0] }
 0x33e   : > { %v9398_v8 = vld [vmem:[#allocation11 + $0x724] sm:$0xf]  ;;  %v8280_v32 = vld [vmem:[#allocation11 + $0x718] sm:$0xf0]  ;;  %v11028_v25 = vld [vmem:[#allocation5 + $0x80] sm:$0xff] }
 0x33f   : > { %4850 = vmatpush.bf16.msra.mxu1 %v7955_v59  ;;  %4863 = vmatpush.bf16.msra.mxu2 %v8019_v52  ;;  %v8163_v59 = vor.u32 %v9366_v43, %v8160_v44  ;;  %v8368_v52 = vld [vmem:[#allocation11 + $0x7c8] sm:$0xf0]  ;;  %v11123_v47 = vld [vmem:[#allocation5 + $0x68] sm:$0xff] }
 0x340   : > { %4875 = vmatpush.bf16.msra.mxu3 %v8091_v49  ;;  %v8371_v15 = vor.u32 %v9418_v30, %v8368_v52  ;;  %v8360_v49 = vld [vmem:[#allocation11 + $0x7b8] sm:$0xf0]  ;;  %v11034_v17 = vld [vmem:[#allocation5 + $0x1a0] sm:$0xff]  ;;  %v11076_v30 = vld [vmem:[#allocation5 + $0x1d8] sm:$0xff] }
 0x341   : > { %4883 = vmatpush.bf16.msrb.mxu0 %v8195_v58  ;;  %v10979_v58 = vpop.f32.mrf.mxu1  ;;  %v4633_v7 = vpop.f32.mrf.mxu0  ;;  %v8363_v43 = vor.u32 %v9416_v5, %v8360_v49  ;;  %v11079_v52 = vld [vmem:[#allocation5 + $0x30] sm:$0xff]  ;;  %v11099_v5 = vld [vmem:[#allocation5 + $0x88] sm:$0xff]  ;;  %v11102_v49 = vld [vmem:[#allocation5 + $0x1b8] sm:$0xff] }
 0x342   : > { %4851 = vmatmul.bf16.vlgmr.msra.gmra.mxu1 %v10905_v21  ;;  %v9406_v21 = vld [vmem:[#allocation11 + $0x764] sm:$0xf]  ;;  %4864 = vmatmul.bf16.vlgmr.msra.gmra.mxu2 %v10908_v35  ;;  %v11015_v7 = vld [vmem:[#allocation5 + $0x1c0] sm:$0xff] }
 0x343   : > { %4895 = vmatpush.bf16.msrb.mxu1 %v8267_v39  ;;  %4908 = vmatpush.bf16.msrb.mxu2 %v8331_v63  ;;  %v8323_v48 = vor.u32 %v9406_v21, %v8320_v41  ;;  %v8152_v39 = vld [vmem:[#allocation11 + $0x618] sm:$0xf0]  ;;  %v8288_v63 = vld [vmem:[#allocation11 + $0x728] sm:$0xf0] }
 0x344   : > { %4876 = vmatpush.bf16.msra.mxu3 %v8083_v50  ;;  %v8155_v35 = vor.u32 %v9364_v31, %v8152_v39  ;;  %v10984_v21 = vld [vmem:[#allocation5 + $0xf0] sm:$0xff]  ;;  %v8291_v41 = vor.u32 %v9398_v8, %v8288_v63  ;;  %v11003_v31 = vld [vmem:[#allocation5 + $0x1e0] sm:$0xff]  ;;  %v11090_v8 = vld [vmem:[#allocation5 + $0x1c8] sm:$0xff] }
 0x345   : > { %4884 = vmatpush.bf16.msrb.mxu0 %v8187_v6  ;;  %v8387_v6 = vor.u32 %v9422_v60, %v8384_v1  ;;  %v10996_v50 = vld [vmem:[#allocation5 + $0x1f0] sm:$0xff]  ;;  %v11120_v46 = vld [vmem:[#allocation5 + $0x140] sm:$0xff] }
 0x346   : > { %v11006_v60 = vld [vmem:[#allocation5 + $0xb0] sm:$0xff] }
 0x347   : > { %4896 = vmatpush.bf16.msrb.mxu1 %v8259_v20  ;;  %4909 = vmatpush.bf16.msrb.mxu2 %v8323_v48  ;;  %v9420_v20 = vld [vmem:[#allocation11 + $0x7d4] sm:$0xf]  ;;  %v8283_v48 = vor.u32 %v9396_v42, %v8280_v32  ;;  %v11009_v1 = vld [vmem:[#allocation5 + $0x1d0] sm:$0xff]  ;;  %v11111_v32 = vld [vmem:[#allocation5 + $0x78] sm:$0xff] }
 0x348   : > { %4921 = vmatpush.bf16.msrb.mxu3 %v8395_v61  ;;  %v8379_v27 = vor.u32 %v9420_v20, %v8376_v19  ;;  %v11000_v61 = vld [vmem:[#allocation5 + $0xc0] sm:$0xff]  ;;  %v11037_v20 = vld [vmem:[#allocation5 + $0x70] sm:$0xff]  ;;  %v11040_v19 = vld [vmem:[#allocation5 + $0xd8] sm:$0xff] }
 0x349   : > { %4885 = vmatpush.bf16.msrb.mxu0 %v8179_v28  ;;  %4877 = vmatmul.bf16.vlgmr.msra.gmra.mxu3 %v10913_v0  ;;  %v4646_v36 = vpop.f32.mrf.mxu1  ;;  %v10982_v28 = vpop.f32.mrf.mxu2  ;;  %v9378_v0 = vld [vmem:[#allocation11 + $0x684] sm:$0xf] }
 0x34a   : > { %v8211_v37 = vor.u32 %v9378_v0, %v8208_v11  ;;  %v11061_v36 = vld [vmem:[#allocation5 + $0xb8] sm:$0xff]  ;;  %v11108_v42 = vld [vmem:[#allocation5 + $0x150] sm:$0xff] }
 0x34b   : > { %4897 = vmatpush.bf16.msrb.mxu1 %v8251_v34  ;;  %4910 = vmatpush.bf16.msrb.mxu2 %v8315_v3  ;;  %v8299_v34 = vor.u32 %v9400_v14, %v8296_v16  ;;  %v9410_v3 = vld [vmem:[#allocation11 + $0x784] sm:$0xf] }
 0x34c   : > { %4922 = vmatpush.bf16.msrb.mxu3 %v8387_v6  ;;  %v11024_v6 = vld [vmem:[#allocation5 + $0x1b0] sm:$0xff]  ;;  %v11087_v11 = vld [vmem:[#allocation5 + $0x98] sm:$0xff] }
 0x34d   : > { %4886 = vmatpush.bf16.msrb.mxu0 %v8171_v56  ;;  %v10988_v56 = vpop.f32.mrf.mxu3  ;;  %v11054_v14 = vld [vmem:[#allocation5 + $0x190] sm:$0xff] }
 0x34e   : > { %v11058_v16 = vld [vmem:[#allocation5 + $0x50] sm:$0xff] }
 0x34f   : > { %4898 = vmatpush.bf16.msrb.mxu1 %v8243_v54  ;;  %4911 = vmatpush.bf16.msrb.mxu2 %v8307_v53  ;;  %v10990_v54 = vld [vmem:[#allocation5 + $0xe0] sm:$0xff] }
 0x350   : > { %4923 = vmatpush.bf16.msrb.mxu3 %v8379_v27  ;;  %v11045_v53 = vld [vmem:[#allocation5 + $0x60] sm:$0xff] }
 0x351   : > { %4887 = vmatpush.bf16.msrb.mxu0 %v8163_v59  ;;  %v4659_v44 = vpop.f32.mrf.mxu2  ;;  %v8344_v59 = vld [vmem:[#allocation11 + $0x798] sm:$0xf0]  ;;  %v11067_v27 = vld [vmem:[#allocation5 + $0x40] sm:$0xff] }
 0x352   : > { %v11117_v44 = vld [vmem:[#allocation5] sm:$0xff] }
 0x353   : > { %4899 = vmatpush.bf16.msrb.mxu1 %v8235_v33  ;;  %4912 = vmatpush.bf16.msrb.mxu2 %v8299_v34  ;;  %v11082_v34 = vld [vmem:[#allocation5 + $0x170] sm:$0xff] }
 0x354   : > { %4924 = vmatpush.bf16.msrb.mxu3 %v8371_v15  ;;  %v11093_v15 = vld [vmem:[#allocation5 + $0x20] sm:$0xff] }
 0x355   : > { %4888 = vmatpush.bf16.msrb.mxu0 %v8155_v35  ;;  %v4672_v39 = vpop.f32.mrf.mxu3  ;;  %v8339_v35 = vor.u32 %v9410_v3, %v8336_v38  ;;  %v11156_v3 = vld [vmem:[#allocation5 + $0x168] sm:$0xff] }
 0x356   : > { %v11149_v39 = vld [vmem:[#allocation5 + $0x110] sm:$0xff] }
 0x357   : > { %4900 = vmatpush.bf16.msrb.mxu1 %v8227_v10  ;;  %4913 = vmatpush.bf16.msrb.mxu2 %v8291_v41  ;;  %v11031_v10 = vld [vmem:[#allocation5 + $0xe8] sm:$0xff]  ;;  %v11105_v41 = vld [vmem:[#allocation5 + $0x10] sm:$0xff]  ;;  %11385 = vst [vmem:[#allocation24_spill] sm:$0xff] %v11149_v39 }
 0x358   : > { %4925 = vmatpush.bf16.msrb.mxu3 %v8363_v43  ;;  %v11114_v43 = vld [vmem:[#allocation5 + $0x1a8] sm:$0xff] }
 0x359   : > { %4889 = vmatpush.bf16.msrb.mxu0 %v8147_v23  ;;  %v11064_v23 = vld [vmem:[#allocation5 + $0x1e8] sm:$0xff] }
 0x35b   : > { %4901 = vmatpush.bf16.msrb.mxu1 %v8219_v29  ;;  %4914 = vmatpush.bf16.msrb.mxu2 %v8283_v48  ;;  %v11070_v29 = vld [vmem:[#allocation5 + $0x180] sm:$0xff]  ;;  %v11126_v48 = vld [vmem:[#allocation5 + $0x198] sm:$0xff] }
 0x35c   : > { %4890 = vmatmul.bf16.vlgmr.msrb.gmra.mxu0 %v10930_v2  ;;  %v9394_v2 = vld [vmem:[#allocation11 + $0x704] sm:$0xf]  ;;  %4926 = vmatpush.bf16.msrb.mxu3 %v8355_v55 }
 0x35d   : > { %4936 = vmatpush.msra.mxu0 %v10984_v21  ;;  %v8275_v33 = vor.u32 %v9394_v2, %v8272_v13  ;;  %v11129_v2 = vld [vmem:[#allocation5 + $0x130] sm:$0xff]  ;;  %v11133_v55 = vld [vmem:[#allocation5 + $0x58] sm:$0xff] }
 0x35f   : > { %4937 = vmatpush.msra.mxu0 %v10990_v54  ;;  %4902 = vmatpush.bf16.msrb.mxu1 %v8211_v37  ;;  %v11096_v37 = vld [vmem:[#allocation5 + $0x160] sm:$0xff] }
 0x360   : > { %4915 = vmatpush.bf16.msrb.mxu2 %v8275_v33  ;;  %v11143_v33 = vld [vmem:[#allocation5 + $0x48] sm:$0xff] }
 0x361   : > { %4938 = vmatpush.msra.mxu0 %v10993_v9 }
 0x362   : > { %4903 = vmatmul.bf16.vlgmr.msrb.gmra.mxu1 %v10934_v12  ;;  %v8347_v12 = vor.u32 %v9412_v18, %v8344_v59  ;;  %v11136_v18 = vld [vmem:[#allocation5 + $0x188] sm:$0xff]  ;;  %v11139_v59 = vld [vmem:[#allocation5 + $0x120] sm:$0xff] }
 0x363   : > { %4956 = vmatpush.msra.mxu1 %v10996_v50  ;;  %4939 = vmatpush.msra.mxu0 %v11000_v61  ;;  %v11085_v0 = vpop.f32.mrf.mxu1 }
 0x364   : > { %4976 = vmatpush.msra.mxu2 %v11018_v26  ;;  %4927 = vmatpush.bf16.msrb.mxu3 %v8347_v12  ;;  %v11153_v12 = vld [vmem:[#allocation5 + $0x38] sm:$0xff] }
 0x365   : > { %4957 = vmatpush.msra.mxu1 %v11003_v31  ;;  %4940 = vmatpush.msra.mxu0 %v11006_v60 }
 0x366   : > { %4916 = vmatmul.bf16.vlgmr.msrb.gmra.mxu2 %v10954_v40  ;;  %v11043_v40 = vpop.f32.mrf.mxu0 }
 0x367   : > { %4958 = vmatpush.msra.mxu1 %v11009_v1  ;;  %4941 = vmatpush.msra.mxu0 %v11012_v4 }
 0x368   : > { %4977 = vmatpush.msra.mxu2 %v11031_v10  ;;  %4928 = vmatpush.bf16.msrb.mxu3 %v8339_v35  ;;  %v11160_v35 = vld [vmem:[#allocation5 + $0x100] sm:$0xff] }
 0x369   : > { %4959 = vmatpush.msra.mxu1 %v11015_v7  ;;  %4942 = vmatpush.msra.mxu0 %v11021_v45  ;;  %11386 = vst [vmem:[#allocation25_spill] sm:$0xff] %v11160_v35 }
 0x36a   : > { %4978 = vmatpush.msra.mxu2 %v11040_v19 }
 0x36b   : > { %4960 = vmatpush.msra.mxu1 %v11024_v6  ;;  %4943 = vmatpush.msra.mxu0 %v11028_v25  ;;  %v4698_v13 = vpop.f32.mrf.mxu1 }
 0x36c   : > { %4996 = vmatpush.msra.mxu3 %v11048_v62  ;;  %4979 = vmatpush.msra.mxu2 %v11051_v24  ;;  %v11175_v13 = vld [vmem:[#allocation5 + $0x148] sm:$0xff] }
 0x36d   : > { %4961 = vmatpush.msra.mxu1 %v11034_v17  ;;  %4944 = vmatpush.msra.mxu0 %v11037_v20 }
 0x36e   : > { %4929 = vmatmul.bf16.vlgmr.msrb.gmra.mxu3 %v10959_v57  ;;  %4980 = vmatpush.msra.mxu2 %v11061_v36  ;;  %v11073_v57 = vld [vmem:[#allocation5 + $0xa8] sm:$0xff]  ;;  %v4685_v63 = vpop.f32.mrf.mxu0 }
 0x36f   : > { %4945 = vmatpush.msra.mxu0 %v11045_v53  ;;  %4962 = vmatpush.msra.mxu1 %v11054_v14  ;;  %v11164_v63 = vld [vmem:[#allocation5 + $0x28] sm:$0xff] }
 0x370   : > { %4997 = vmatpush.msra.mxu3 %v11064_v23  ;;  %4981 = vmatpush.msra.mxu2 %v11073_v57 }
 0x371   : > { %4946 = vmatpush.msra.mxu0 %v11058_v16  ;;  %4963 = vmatpush.msra.mxu1 %v11070_v29 }
 0x372   : > { %4998 = vmatpush.msra.mxu3 %v11076_v30  ;;  %4982 = vmatpush.msra.mxu2 %v11087_v11 }
 0x373   : > { %4947 = vmatpush.msra.mxu0 %v11067_v27  ;;  %4964 = vmatpush.msra.mxu1 %v11082_v34 }
 0x374   : > { %4999 = vmatpush.msra.mxu3 %v11090_v8  ;;  %4983 = vmatpush.msra.mxu2 %v11099_v5 }
 0x375   : > { %4948 = vmatpush.msra.mxu0 %v11079_v52  ;;  %4965 = vmatpush.msra.mxu1 %v11096_v37 }
 0x376   : > { %5000 = vmatpush.msra.mxu3 %v11102_v49  ;;  %4984 = vmatpush.msra.mxu2 %v11111_v32 }
 0x377   : > { %4949 = vmatpush.msra.mxu0 %v11093_v15  ;;  %4966 = vmatpush.msra.mxu1 %v11108_v42 }
 0x378   : > { %5001 = vmatpush.msra.mxu3 %v11114_v43  ;;  %4985 = vmatpush.msra.mxu2 %v11123_v47 }
 0x379   : > { %4950 = vmatpush.msra.mxu0 %v11105_v41  ;;  %4967 = vmatpush.msra.mxu1 %v11120_v46  ;;  %v4735_v38 = vpop.f32.mrf.mxu0 }
 0x37a   : > { %5002 = vmatpush.msra.mxu3 %v11126_v48  ;;  %4986 = vmatpush.msra.mxu2 %v11133_v55 }
 0x37b   : > { %4951 = vmatpush.msra.mxu0 %v11117_v44  ;;  %4968 = vmatpush.msra.mxu1 %v11129_v2 }
 0x37c   : > { %5003 = vmatpush.msra.mxu3 %v11136_v18  ;;  %4987 = vmatpush.msra.mxu2 %v11143_v33 }
 0x37d   : > { %5020 = vmatpush.msrb.mxu0 %v10984_v21  ;;  %4969 = vmatpush.msra.mxu1 %v11139_v59  ;;  %v11146_v21 = vld [vmem:[#allocation5 + $0x178] sm:$0xff] }
 0x37e   : > { %5004 = vmatpush.msra.mxu3 %v11146_v21  ;;  %4988 = vmatpush.msra.mxu2 %v11153_v12 }
 0x37f   : > { %5021 = vmatpush.msrb.mxu0 %v10990_v54  ;;  %4970 = vmatpush.msra.mxu1 %v11149_v39  ;;  %v3235_v54 = vperm.slane %v10952_v22, 1  ;;  %v11172_v22 = vld [vmem:[#allocation5 + $0x18] sm:$0xff]  ;;  %v11180_v39 = vld [vmem:[#allocation5 + $0x8] sm:$0xff] }
 0x380   : > { %5005 = vmatpush.msra.mxu3 %v11156_v3  ;;  %4989 = vmatpush.msra.mxu2 %v11164_v63 }
 0x381   : > { %5022 = vmatpush.msrb.mxu0 %v10993_v9  ;;  %4971 = vmatpush.msra.mxu1 %v11160_v35  ;;  %v11167_v9 = vld [vmem:[#allocation5 + $0x158] sm:$0xff]  ;;  %v4748_v35 = vpop.f32.mrf.mxu1 }
 0x382   : > { %5006 = vmatpush.msra.mxu3 %v11167_v9  ;;  %4990 = vmatpush.msra.mxu2 %v11172_v22 }
 0x383   : > { %5023 = vmatpush.msrb.mxu0 %v11000_v61  ;;  %5040 = vmatpush.msrb.mxu1 %v10996_v50  ;;  %v4736_v61 = vadd.f32 %v4735_v38, %v3235_v54  ;;  %v11183_v50 = vld [vmem:[#allocation5 + $0x138] sm:$0xff]  ;;  %v11190_v54 = vld [vmem:[#allocation5 + $0x128] sm:$0xff] }
 0x384   : > { %5007 = vmatpush.msra.mxu3 %v11175_v13  ;;  %4991 = vmatpush.msra.mxu2 %v11180_v39 }
 0x385   : > { %5024 = vmatpush.msrb.mxu0 %v11006_v60  ;;  %5041 = vmatpush.msrb.mxu1 %v11003_v31  ;;  %v11186_v60 = vadd.f32 %v4748_v35, %v4736_v61  ;;  %v4737_v31 = vpop.f32.mrf.mxu0  ;;  %v9802_v61 = vld [vmem:[%s10386_s2 + $0x8] sm:$0xff] }
 0x386   : > { %5008 = vmatpush.msra.mxu3 %v11183_v50  ;;  %5060 = vmatpush.msrb.mxu2 %v11018_v26  ;;  %v11204_v26 = vld [vmem:[#allocation5 + $0x108] sm:$0xff]  ;;  %v9456_v31 = vld [vmem:[#allocation14 + $0xec] sm:$0xf0] }
 0x387   : > { %5025 = vmatpush.msrb.mxu0 %v11012_v4  ;;  %5042 = vmatpush.msrb.mxu1 %v11009_v1  ;;  %v11196_v4 = vld [vmem:[#allocation5 + $0x118] sm:$0xff]  ;;  %v4645_v1 = vadd.f32 %v10979_v58, %v10976_v51  ;;  %v4709_v58 = vpop.f32.mrf.mxu2 }
 0x388   : > { %5009 = vmatpush.msra.mxu3 %v11190_v54  ;;  %5061 = vmatpush.msrb.mxu2 %v11031_v10 }
 0x389   : > { %5026 = vmatpush.msrb.mxu0 %v11021_v45  ;;  %5043 = vmatpush.msrb.mxu1 %v11015_v7  ;;  %v4658_v7 = vadd.f32 %v10982_v28, %v4645_v1  ;;  %v4750_v45 = vpop.f32.mrf.mxu1 }
 0x38a   : > { %5010 = vmatpush.msra.mxu3 %v11196_v4  ;;  %5062 = vmatpush.msrb.mxu2 %v11040_v19  ;;  %v9452_v45 = vld [vmem:[#allocation14 + $0xcc] sm:$0xf0] }
 0x38b   : > { %5027 = vmatpush.msrb.mxu0 %v11028_v25  ;;  %5044 = vmatpush.msrb.mxu1 %v11024_v6  ;;  %v4671_v51 = vadd.f32 %v10988_v56, %v4658_v7  ;;  %v4722_v25 = vpop.f32.mrf.mxu3  ;;  %v8494_v7 = vld [vmem:[#allocation14 + $0xc0] sm:$0xf] }
 0x38c   : > { %5011 = vmatpush.msra.mxu3 %v11204_v26  ;;  %5063 = vmatpush.msrb.mxu2 %v11051_v24  ;;  %v11387_v24 = vld [vmem:[#allocation24_spill] sm:$0xff] }
 0x38d   : > { %5028 = vmatpush.msrb.mxu0 %v11037_v20  ;;  %5045 = vmatpush.msrb.mxu1 %v11034_v17  ;;  %v4684_v28 = vadd.f32 %v11043_v40, %v4671_v51  ;;  %v9801_v20 = vld [vmem:[%s10386_s2] sm:$0xff]  ;;  %s6172_s2 = scalar_lea.hbm %s11391_s30, %s9554_s25 }
 0x38e   : > { %5080 = vmatpush.msrb.mxu3 %v11048_v62  ;;  %5064 = vmatpush.msrb.mxu2 %v11061_v36  ;;  %s6176_s27 = sshll.u32 %s6172_s2, 4  ;;  %s6177_s27 = int_to_ptr.hbm [resolvable:$true] %s6176_s27 }
 0x38f   : > { %5029 = vmatpush.msrb.mxu0 %v11045_v53  ;;  %5046 = vmatpush.msrb.mxu1 %v11054_v14  ;;  %v4697_v56 = vadd.f32 %v11085_v0, %v4684_v28  ;;  %v4711_v17 = vpop.f32.mrf.mxu2  ;;  %v8496_v28 = vld [vmem:[#allocation14 + $0xd0] sm:$0xf0]  ;;  %s10087_s28 = sshra.s32 %s6177_s27, 4  ;;  %s10088_s28 = int_to_ptr.hbm [resolvable:$true] %s10087_s28 }
 0x390   : > { %5081 = vmatpush.msrb.mxu3 %v11064_v23  ;;  %5065 = vmatpush.msrb.mxu2 %v11073_v57  ;;  %v8640_v17 = vld [vmem:[#allocation14 + $0x1f0] sm:$0xf0]  ;;  %s10089_s4 = scalar_lea.hbm %s10088_s28, 16  ;;  %p10094_p12 = scmp.lt.s32.totalorder %s10088_s28, %s11391_s30 }
 0x391   : > { %5030 = vmatpush.msrb.mxu0 %v11058_v16  ;;  %5047 = vmatpush.msrb.mxu1 %v11070_v29  ;;  %v4710_v6 = vadd.f32 %v4709_v58, %v4697_v56  ;;  %v11388_v16 = vld [vmem:[#allocation25_spill] sm:$0xff]  ;;  %v9450_v58 = vld [vmem:[#allocation14 + $0xc4] sm:$0xf]  ;;  %v8638_v56 = vld [vmem:[#allocation14 + $0x1e0] sm:$0xf]  ;;  %p10090_p1 = scmp.ne.s32.totalorder %s10088_s28, %s10089_s4  ;;  %p10095_p7 = scmp.lt.s32.totalorder %s10093_s18, %s10089_s4 }
 0x392   : > { %5082 = vmatpush.msrb.mxu3 %v11076_v30  ;;  %5066 = vmatpush.msrb.mxu2 %v11087_v11 }
 0x393   : > { %5031 = vmatpush.msrb.mxu0 %v11067_v27  ;;  %5048 = vmatpush.msrb.mxu1 %v11082_v34  ;;  %v4723_v10 = vadd.f32 %v4722_v25, %v4710_v6  ;;  %v4724_v53 = vpop.f32.mrf.mxu3  ;;  %v8495_v6 = vor.u32 %v9452_v45, %v8494_v7  ;;  %v9488_v25 = vld [vmem:[#allocation14 + $0x1ec] sm:$0xf0]  ;;  %v8432_v45 = vld [vmem:[#allocation14 + $0x50] sm:$0xf0]  ;;  %p10091_p3 = pnand %p10090_p1, %p10349_p4  ;;  %p10096_p8 = por %p10095_p7, %p10094_p12 }
 0x394   : > { %5083 = vmatpush.msrb.mxu3 %v11090_v8  ;;  %5067 = vmatpush.msrb.mxu2 %v11099_v5 }
 0x395   : > { %5032 = vmatpush.msrb.mxu0 %v11079_v52  ;;  %5049 = vmatpush.msrb.mxu1 %v11096_v37  ;;  %v11239_v19 = vadd.f32 %v9801_v20, %v4723_v10  ;;  %v9486_v10 = vld [vmem:[#allocation14 + $0x1e4] sm:$0xf]  ;;  %v8499_v20 = vor.u32 %v9450_v58, %v8496_v28  ;;  %v8574_v58 = vld [vmem:[#allocation14 + $0x160] sm:$0xf]  ;;  %v9472_v28 = vld [vmem:[#allocation14 + $0x16c] sm:$0xf0]  ;;  %p10092_p5 = pneg %p10091_p3 }
 0x396   : > { %5084 = vmatpush.msrb.mxu3 %v11102_v49  ;;  %5068 = vmatpush.msrb.mxu2 %v11111_v32  ;;  %v8643_v53 = vor.u32 %v9486_v10, %v8640_v17  ;;  %v8414_v17 = vld [vmem:[#allocation14 + $0x20] sm:$0xf] }
 0x397   : > { %5033 = vmatpush.msrb.mxu0 %v11093_v15  ;;  %5050 = vmatpush.msrb.mxu1 %v11108_v42  ;;  %v4761_v62 = vpop.f32.mrf.mxu2  ;;  %p10097_p9 = pnand %p10096_p8, %p10092_p5 }
 0x398   : > { %5085 = vmatpush.msrb.mxu3 %v11114_v43  ;;  %5069 = vmatpush.msrb.mxu2 %v11123_v47  ;;  %v4762_v49 = vadd.f32 %v4761_v62, %v11186_v60  ;;  %v8478_v62 = vld [vmem:[#allocation14 + $0xa0] sm:$0xf] }
 0x399   : > { %5034 = vmatpush.msrb.mxu0 %v11105_v41  ;;  %5051 = vmatpush.msrb.mxu1 %v11120_v46  ;;  %v4787_v40 = vpop.f32.mrf.mxu0 }
 0x39a   : > { %5086 = vmatpush.msrb.mxu3 %v11126_v48  ;;  %5070 = vmatpush.msrb.mxu2 %v11133_v55 }
 0x39b   : > { %5035 = vmatpush.msrb.mxu0 %v11117_v44  ;;  %4992 = vmatmul.f32.vlgmr.msra.gmra.mxu2 %v11239_v19  ;;  %v4774_v23 = vpop.f32.mrf.mxu3 }
 0x39c   : > { %5087 = vmatpush.msrb.mxu3 %v11136_v18  ;;  %4952 = vmatmul.f32.vlgmr.msra.gmra.mxu0 %v11239_v19  ;;  %v4775_v41 = vadd.f32 %v4774_v23, %v4762_v49  ;;  %v9484_v23 = vld [vmem:[#allocation14 + $0x1cc] sm:$0xf0] }
 0x39d   : > { %5071 = vmatpush.msrb.mxu2 %v11143_v33  ;;  %5052 = vmatpush.msrb.mxu1 %v11129_v2 }
 0x39e   : > { %5088 = vmatpush.msrb.mxu3 %v11146_v21  ;;  %v4788_v32 = vadd.f32 %v4787_v40, %v4775_v41  ;;  %v8639_v40 = vor.u32 %v9488_v25, %v8638_v56  ;;  %v9470_v56 = vld [vmem:[#allocation14 + $0x164] sm:$0xf]  ;;  %v8576_v25 = vld [vmem:[#allocation14 + $0x170] sm:$0xf0] }
 0x39f   : > { %5072 = vmatpush.msrb.mxu2 %v11153_v12  ;;  %5053 = vmatpush.msrb.mxu1 %v11139_v59  ;;  %v4800_v14 = vpop.f32.mrf.mxu1  ;;  %v4763_v27 = vpop.f32.mrf.mxu2  ;;  %v8579_v10 = vor.u32 %v9470_v56, %v8576_v25  ;;  %v9483_v56 = vld [vmem:[#allocation14 + $0x1cc] sm:$0xf]  ;;  %v8632_v25 = vld [vmem:[#allocation14 + $0x1d8] sm:$0xf0] }
 0x3a0   : > { %5089 = vmatpush.msrb.mxu3 %v11156_v3  ;;  %v4801_v46 = vadd.f32 %v4800_v14, %v4788_v32  ;;  %v9446_v14 = vld [vmem:[#allocation14 + $0xa4] sm:$0xf] }
 0x3a1   : > { %5073 = vmatpush.msrb.mxu2 %v11164_v63  ;;  %5054 = vmatpush.msrb.mxu1 %v11387_v24  ;;  %v4789_v36 = vpop.f32.mrf.mxu0  ;;  %v9448_v24 = vld [vmem:[#allocation14 + $0xac] sm:$0xf0] }
 0x3a2   : > { %5090 = vmatpush.msrb.mxu3 %v11167_v9  ;;  %v8622_v36 = vld [vmem:[#allocation14 + $0x1c0] sm:$0xf] }
 0x3a3   : > { %5074 = vmatpush.msrb.mxu2 %v11172_v22  ;;  %5055 = vmatpush.msrb.mxu1 %v11388_v16  ;;  %v4776_v57 = vpop.f32.mrf.mxu3  ;;  %v8480_v16 = vld [vmem:[#allocation14 + $0xb0] sm:$0xf0]  ;;  %v8623_v27 = vor.u32 %v9484_v23, %v8622_v36  ;;  %v9466_v36 = vld [vmem:[#allocation14 + $0x144] sm:$0xf] }
 0x3a4   : > { %5091 = vmatpush.msrb.mxu3 %v11175_v13  ;;  %v8624_v57 = vld [vmem:[#allocation14 + $0x1d0] sm:$0xf0] }
 0x3a5   : > { %5075 = vmatpush.msrb.mxu2 %v11180_v39 }
 0x3a6   : > { %5092 = vmatpush.msrb.mxu3 %v11183_v50 }
 0x3a7   : > { %v4802_v29 = vpop.f32.mrf.mxu1  ;;  %v4813_v30 = vpop.f32.mrf.mxu2 }
 0x3a8   : > { %5093 = vmatpush.msrb.mxu3 %v11190_v54  ;;  %v4814_v47 = vadd.f32 %v4813_v30, %v4801_v46  ;;  %v8510_v54 = vld [vmem:[#allocation14 + $0xe0] sm:$0xf]  ;;  %v9482_v29 = vld [vmem:[#allocation14 + $0x1c4] sm:$0xf]  ;;  %v8479_v30 = vor.u32 %v9448_v24, %v8478_v62  ;;  %v8416_v62 = vld [vmem:[#allocation14 + $0x30] sm:$0xf0] }
 0x3a9   : > { %v8511_v1 = vor.u32 %v9456_v31, %v8510_v54 }
 0x3aa   : > { %5094 = vmatpush.msrb.mxu3 %v11196_v4  ;;  %v9454_v4 = vld [vmem:[#allocation14 + $0xe4] sm:$0xf] }
 0x3ab   : > { %5518 = vmatpush.bf16.msra.mxu0 %v8511_v1  ;;  %v9436_v1 = vld [vmem:[#allocation14 + $0x4c] sm:$0xf0] }
 0x3ac   : > { %5095 = vmatpush.msrb.mxu3 %v11204_v26  ;;  %v4826_v52 = vpop.f32.mrf.mxu3  ;;  %v8512_v26 = vld [vmem:[#allocation14 + $0xf0] sm:$0xf0] }
 0x3ad   : > { %v4827_v55 = vadd.f32 %v4826_v52, %v4814_v47  ;;  %v8515_v51 = vor.u32 %v9454_v4, %v8512_v26  ;;  %v8627_v52 = vor.u32 %v9482_v29, %v8624_v57  ;;  %v8430_v4 = vld [vmem:[#allocation14 + $0x40] sm:$0xf]  ;;  %v9434_v26 = vld [vmem:[#allocation14 + $0x44] sm:$0xf] }
 0x3ae   : > { %v8431_v7 = vor.u32 %v9436_v1, %v8430_v4  ;;  %v8398_v57 = vld [vmem:[#allocation14] sm:$0xf]  ;;  %v8486_v4 = vld [vmem:[#allocation14 + $0xa8] sm:$0xf]  ;;  %v9449_v1 = vld [vmem:[#allocation14 + $0xb4] sm:$0xf0] }
 0x3af   : > { %v4815_v34 = vpop.f32.mrf.mxu2  ;;  %5544 = vmatpush.bf16.msra.mxu2 %v8515_v51  ;;  %5519 = vmatpush.bf16.msra.mxu0 %v8495_v6  ;;  %v8435_v51 = vor.u32 %v9434_v26, %v8432_v45  ;;  %v8575_v6 = vor.u32 %v9472_v28, %v8574_v58  ;;  %v9447_v26 = vld [vmem:[#allocation14 + $0xac] sm:$0xf]  ;;  %v8488_v45 = vld [vmem:[#allocation14 + $0xb8] sm:$0xf0]  ;;  %v8630_v58 = vld [vmem:[#allocation14 + $0x1c8] sm:$0xf] }
 0x3b0   : > { %v8483_v34 = vor.u32 %v9446_v14, %v8480_v16  ;;  %v8558_v14 = vld [vmem:[#allocation14 + $0x140] sm:$0xf]  ;;  %v9468_v16 = vld [vmem:[#allocation14 + $0x14c] sm:$0xf0]  ;;  %v9485_v28 = vld [vmem:[#allocation14 + $0x1d4] sm:$0xf0] }
 0x3b1   : > { %v8559_v23 = vor.u32 %v9468_v16, %v8558_v14  ;;  %v8614_v14 = vld [vmem:[#allocation14 + $0x1a8] sm:$0xf]  ;;  %v9481_v16 = vld [vmem:[#allocation14 + $0x1b4] sm:$0xf0] }
 0x3b3   : > { %5545 = vmatpush.bf16.msra.mxu2 %v8499_v20  ;;  %5520 = vmatpush.bf16.msra.mxu0 %v8479_v30  ;;  %v9432_v20 = vld [vmem:[#allocation14 + $0x2c] sm:$0xf0] }
 0x3b4   : > { %v4828_v11 = vpop.f32.mrf.mxu3  ;;  %v9428_v30 = vld [vmem:[#allocation14 + $0xc] sm:$0xf0] }
 0x3b5   : > { %v9444_v11 = vld [vmem:[#allocation14 + $0x8c] sm:$0xf0] }
 0x3b7   : > { %5546 = vmatpush.bf16.msra.mxu2 %v8483_v34  ;;  %v8399_v34 = vor.u32 %v9428_v30, %v8398_v57  ;;  %v8454_v57 = vld [vmem:[#allocation14 + $0x68] sm:$0xf]  ;;  %v9441_v30 = vld [vmem:[#allocation14 + $0x74] sm:$0xf0] }
 0x3b9   : > { %v4839_v0 = vpop.f32.mrf.mxu0 }
 0x3ba   : > { %v4840_v59 = vadd.f32 %v4839_v0, %v4827_v55  ;;  %v8462_v0 = vld [vmem:[#allocation14 + $0x80] sm:$0xf] }
 0x3bb   : > { %v8606_v55 = vld [vmem:[#allocation14 + $0x1a0] sm:$0xf] }
 0x3bf   : > { %v4852_v8 = vpop.f32.mrf.mxu1 }
 0x3c0   : > { %v4853_v33 = vadd.f32 %v4852_v8, %v4840_v59  ;;  %v9442_v8 = vld [vmem:[#allocation14 + $0x84] sm:$0xf] }
 0x3c1   : > { %v4841_v15 = vpop.f32.mrf.mxu0  ;;  %v9478_v59 = vld [vmem:[#allocation14 + $0x1a4] sm:$0xf] }
 0x3c2   : > { %v8464_v15 = vld [vmem:[#allocation14 + $0x90] sm:$0xf0] }
 0x3c5   : > { %v4865_v5 = vpop.f32.mrf.mxu2 }
 0x3c6   : > { %v4866_v39 = vadd.f32 %v4865_v5, %v4853_v33  ;;  %v8467_v5 = vor.u32 %v9442_v8, %v8464_v15  ;;  %v9457_v8 = vld [vmem:[#allocation14 + $0xf4] sm:$0xf0] }
 0x3c7   : > { %v4854_v37 = vpop.f32.mrf.mxu1 }
 0x3c8   : > { %v8463_v37 = vor.u32 %v9444_v11, %v8462_v0  ;;  %5547 = vmatpush.bf16.msra.mxu2 %v8467_v5  ;;  %v8400_v0 = vld [vmem:[#allocation14 + $0x10] sm:$0xf0]  ;;  %v8518_v11 = vld [vmem:[#allocation14 + $0xe8] sm:$0xf]  ;;  %v9455_v5 = vld [vmem:[#allocation14 + $0xec] sm:$0xf] }
 0x3ca   : > { %5521 = vmatpush.bf16.msra.mxu0 %v8463_v37  ;;  %v8519_v37 = vor.u32 %v9457_v8, %v8518_v11  ;;  %v8456_v11 = vld [vmem:[#allocation14 + $0x78] sm:$0xf0] }
 0x3cc   : > { %v4878_v42 = vpop.f32.mrf.mxu3 }
 0x3cd   : > { %v4867_v43 = vpop.f32.mrf.mxu2  ;;  %v4879_v12 = vadd.f32 %v4878_v42, %v4866_v39  ;;  %v8446_v39 = vld [vmem:[#allocation14 + $0x60] sm:$0xf] }
 0x3d4   : > { %v4880_v48 = vpop.f32.mrf.mxu3 }
 0x3d9   : > { %v4891_v44 = vpop.f32.mrf.mxu0 }
 0x3da   : > { %v4892_v38 = vadd.f32 %v4891_v44, %v4879_v12  ;;  %v9440_v12 = vld [vmem:[#allocation14 + $0x6c] sm:$0xf0] }
 0x3df   : > { %v4904_v2 = vpop.f32.mrf.mxu1 }
 0x3e0   : > { %v4905_v35 = vadd.f32 %v4904_v2, %v4892_v38  ;;  %v8447_v38 = vor.u32 %v9440_v12, %v8446_v39  ;;  %v8526_v39 = vld [vmem:[#allocation14 + $0x100] sm:$0xf]  ;;  %v9460_v12 = vld [vmem:[#allocation14 + $0x10c] sm:$0xf0] }
 0x3e1   : > { %v4893_v18 = vpop.f32.mrf.mxu0 }
 0x3e2   : > { %v9480_v18 = vld [vmem:[#allocation14 + $0x1ac] sm:$0xf0]  ;;  %5522 = vmatpush.bf16.msra.mxu0 %v8447_v38  ;;  %v8527_v38 = vor.u32 %v9460_v12, %v8526_v39 }
 0x3e3   : > { %v8607_v33 = vor.u32 %v9480_v18, %v8606_v55  ;;  %v8502_v55 = vld [vmem:[#allocation14 + $0xc8] sm:$0xf]  ;;  %v9453_v18 = vld [vmem:[#allocation14 + $0xd4] sm:$0xf0] }
 0x3e6   : > { %5523 = vmatpush.bf16.msra.mxu0 %v8431_v7  ;;  %v8487_v7 = vor.u32 %v9449_v1, %v8486_v4  ;;  %v8566_v4 = vld [vmem:[#allocation14 + $0x148] sm:$0xf]  ;;  %v9469_v1 = vld [vmem:[#allocation14 + $0x154] sm:$0xf0] }
 0x3e7   : > { %v4906_v21 = vpop.f32.mrf.mxu1 }
 0x3e8   : > { %v8608_v21 = vld [vmem:[#allocation14 + $0x1b0] sm:$0xf0] }
 0x3e9   : > { %v4917_v3 = vpop.f32.mrf.mxu2 }
 0x3ea   : > { %v4918_v63 = vadd.f32 %v4917_v3, %v4905_v35  ;;  %v8611_v3 = vor.u32 %v9478_v59, %v8608_v21  ;;  %v9438_v35 = vld [vmem:[#allocation14 + $0x64] sm:$0xf]  ;;  %v9451_v59 = vld [vmem:[#allocation14 + $0xcc] sm:$0xf]  ;;  %v8504_v21 = vld [vmem:[#allocation14 + $0xd8] sm:$0xf0] }
 0x3f1   : > { %v4930_v9 = vpop.f32.mrf.mxu3  ;;  %v4919_v13 = vpop.f32.mrf.mxu2 }
 0x3f2   : > { %v4931_v22 = vadd.f32 %v4930_v9, %v4918_v63  ;;  %v8448_v63 = vld [vmem:[#allocation14 + $0x70] sm:$0xf0]  ;;  %v8590_v9 = vld [vmem:[#allocation14 + $0x180] sm:$0xf]  ;;  %v9476_v13 = vld [vmem:[#allocation14 + $0x18c] sm:$0xf0] }
 0x3f3   : > { %v8591_v54 = vor.u32 %v9476_v13, %v8590_v9  ;;  %v8646_v9 = vld [vmem:[#allocation14 + $0x1e8] sm:$0xf]  ;;  %v9489_v13 = vld [vmem:[#allocation14 + $0x1f4] sm:$0xf0] }
 0x3f4   : > { %v11266_v50 = vadd.f32 %v9802_v61, %v4931_v22  ;;  %v8451_v22 = vor.u32 %v9438_v35, %v8448_v63  ;;  %v9474_v61 = vld [vmem:[#allocation14 + $0x184] sm:$0xf]  ;;  %v8528_v63 = vld [vmem:[#allocation14 + $0x110] sm:$0xf0] }
 0x3f5   : > { %v9458_v35 = vld [vmem:[#allocation14 + $0x104] sm:$0xf] }
 0x3f6   : > { %4972 = vmatmul.f32.vlgmr.msra.gmra.mxu1 %v11266_v50  ;;  %5012 = vmatmul.f32.vlgmr.msra.gmra.mxu3 %v11266_v50 }
 0x3f7   : > { %5531 = vmatpush.bf16.msra.mxu1 %v8639_v40  ;;  %5557 = vmatpush.bf16.msra.mxu3 %v8643_v53  ;;  %v9430_v40 = vld [vmem:[#allocation14 + $0x24] sm:$0xf]  ;;  %v8415_v53 = vor.u32 %v9432_v20, %v8414_v17  ;;  %v8470_v17 = vld [vmem:[#allocation14 + $0x88] sm:$0xf]  ;;  %v9445_v20 = vld [vmem:[#allocation14 + $0x94] sm:$0xf0] }
 0x3f8   : > { %5548 = vmatpush.bf16.msra.mxu2 %v8451_v22  ;;  %v8419_v24 = vor.u32 %v9430_v40, %v8416_v62  ;;  %v8531_v22 = vor.u32 %v9458_v35, %v8528_v63  ;;  %v9443_v40 = vld [vmem:[#allocation14 + $0x8c] sm:$0xf]  ;;  %v8472_v62 = vld [vmem:[#allocation14 + $0x98] sm:$0xf0]  ;;  %v8422_v35 = vld [vmem:[#allocation14 + $0x28] sm:$0xf] }
 0x3f9   : > { %v4932_v60 = vpop.f32.mrf.mxu3  ;;  %5524 = vmatpush.bf16.msra.mxu0 %v8415_v53  ;;  %v8471_v53 = vor.u32 %v9445_v20, %v8470_v17  ;;  %v9433_v63 = vld [vmem:[#allocation14 + $0x34] sm:$0xf0]  ;;  %v9463_v20 = vld [vmem:[#allocation14 + $0x12c] sm:$0xf] }
 0x3fa   : > { %v8592_v60 = vld [vmem:[#allocation14 + $0x190] sm:$0xf0]  ;;  %v9465_v17 = vld [vmem:[#allocation14 + $0x134] sm:$0xf0] }
 0x3fb   : > { %5532 = vmatpush.bf16.msra.mxu1 %v8623_v27  ;;  %5558 = vmatpush.bf16.msra.mxu3 %v8627_v52  ;;  %v8595_v31 = vor.u32 %v9474_v61, %v8592_v60  ;;  %v8560_v27 = vld [vmem:[#allocation14 + $0x150] sm:$0xf0]  ;;  %v9426_v52 = vld [vmem:[#allocation14 + $0x4] sm:$0xf]  ;;  %v9487_v61 = vld [vmem:[#allocation14 + $0x1ec] sm:$0xf] }
 0x3fc   : > { %5549 = vmatpush.bf16.msra.mxu2 %v8435_v51  ;;  %v8563_v29 = vor.u32 %v9466_v36, %v8560_v27  ;;  %v8403_v15 = vor.u32 %v9426_v52, %v8400_v0  ;;  %v8648_v60 = vld [vmem:[#allocation14 + $0x1f8] sm:$0xf0]  ;;  %v8491_v51 = vor.u32 %v9447_v26, %v8488_v45  ;;  %v9479_v36 = vld [vmem:[#allocation14 + $0x1ac] sm:$0xf]  ;;  %v8455_v0 = vor.u32 %v9441_v30, %v8454_v57  ;;  %v8406_v45 = vld [vmem:[#allocation14 + $0x8] sm:$0xf] }
 0x3fd   : > { %5525 = vmatpush.bf16.msra.mxu0 %v8399_v34  ;;  %v8616_v27 = vld [vmem:[#allocation14 + $0x1b8] sm:$0xf0]  ;;  %v9439_v52 = vld [vmem:[#allocation14 + $0x6c] sm:$0xf] }
 0x3fe   : > { %v8459_v8 = vor.u32 %v9439_v52, %v8456_v11  ;;  %v9467_v26 = vld [vmem:[#allocation14 + $0x14c] sm:$0xf]  ;;  %v8536_v30 = vld [vmem:[#allocation14 + $0x118] sm:$0xf0] }
 0x3ff   : > { %5533 = vmatpush.bf16.msra.mxu1 %v8607_v33  ;;  %5559 = vmatpush.bf16.msra.mxu3 %v8611_v3  ;;  %v8503_v33 = vor.u32 %v9453_v18, %v8502_v55  ;;  %v8507_v3 = vor.u32 %v9451_v59, %v8504_v21  ;;  %v8440_v55 = vld [vmem:[#allocation14 + $0x58] sm:$0xf0]  ;;  %v8582_v59 = vld [vmem:[#allocation14 + $0x168] sm:$0xf]  ;;  %v9471_v21 = vld [vmem:[#allocation14 + $0x16c] sm:$0xf] }
 0x400   : > { %5550 = vmatpush.bf16.msra.mxu2 %v8419_v24  ;;  %v8475_v24 = vor.u32 %v9443_v40, %v8472_v62  ;;  %v8552_v40 = vld [vmem:[#allocation14 + $0x138] sm:$0xf0] }
 0x403   : > { %5534 = vmatpush.bf16.msra.mxu1 %v8591_v54  ;;  %5560 = vmatpush.bf16.msra.mxu3 %v8595_v31  ;;  %v8647_v54 = vor.u32 %v9489_v13, %v8646_v9  ;;  %v8651_v31 = vor.u32 %v9487_v61, %v8648_v60  ;;  %v8423_v61 = vor.u32 %v9433_v63, %v8422_v35  ;;  %v9431_v60 = vld [vmem:[#allocation14 + $0x2c] sm:$0xf]  ;;  %v8694_v35 = vld [vmem:[#allocation16 + $0x50] sm:$0xf] }
 0x404   : > { %5551 = vmatpush.bf16.msra.mxu2 %v8403_v15  ;;  %v8598_v15 = vld [vmem:[#allocation14 + $0x188] sm:$0xf] }
 0x407   : > { %5535 = vmatpush.bf16.msra.mxu1 %v8575_v6  ;;  %5561 = vmatpush.bf16.msra.mxu3 %v8579_v10  ;;  %v8631_v6 = vor.u32 %v9485_v28, %v8630_v58  ;;  %v8635_v10 = vor.u32 %v9483_v56, %v8632_v25  ;;  %v8567_v58 = vor.u32 %v9469_v1, %v8566_v4  ;;  %v9427_v56 = vld [vmem:[#allocation14 + $0xc] sm:$0xf]  ;;  %v8550_v25 = vld [vmem:[#allocation14 + $0x128] sm:$0xf]  ;;  %v8758_v4 = vld [vmem:[#allocation16 + $0xd0] sm:$0xf] }
 0x408   : > { %v9517_v1 = vld [vmem:[#allocation16 + $0xd4] sm:$0xf0] }
 0x40b   : > { %5536 = vmatpush.bf16.msra.mxu1 %v8559_v23  ;;  %5562 = vmatpush.bf16.msra.mxu3 %v8563_v29  ;;  %v8615_v23 = vor.u32 %v9481_v16, %v8614_v14  ;;  %v8619_v29 = vor.u32 %v9479_v36, %v8616_v27  ;;  %v8551_v14 = vor.u32 %v9465_v17, %v8550_v25  ;;  %v9461_v27 = vld [vmem:[#allocation14 + $0x114] sm:$0xf0]  ;;  %v9515_v25 = vld [vmem:[#allocation16 + $0xc4] sm:$0xf0]  ;;  %v8670_v17 = vld [vmem:[#allocation16 + $0x20] sm:$0xf] }
 0x40c   : > { %v8555_v16 = vor.u32 %v9463_v20, %v8552_v40  ;;  %v9495_v20 = vld [vmem:[#allocation16 + $0x24] sm:$0xf0] }
 0x40d   : > { %v8671_v40 = vor.u32 %v9495_v20, %v8670_v17  ;;  %v9518_v20 = vld [vmem:[#allocation16 + $0xe4] sm:$0xf] }
 0x419   : > { %v4953_v49 = vpop.f32.mrf.mxu0 }
 0x41e   : > { %v4993_v44 = vpop.f32.mrf.mxu2 }
 0x473   : > { %v4973_v41 = vpop.f32.mrf.mxu1 }
 0x474   : > { %v4974_v42 = vadd.f32 %v4973_v41, %v4953_v49  ;;  %v8520_v49 = vld [vmem:[#allocation14 + $0xf8] sm:$0xf0]  ;;  %v8542_v41 = vld [vmem:[#allocation14 + $0x120] sm:$0xf] }
 0x476   : > { %v11271_v32 = vsub.f32 %v11239_v19, %v4974_v42  ;;  %v8523_v42 = vor.u32 %v9455_v5, %v8520_v49  ;;  %v9475_v5 = vld [vmem:[#allocation14 + $0x18c] sm:$0xf] }
 0x478   : > { %v5018_v43 = vmul.f32 %v11271_v32, %v11271_v32 }
 0x479   : > { %v5013_v46 = vpop.f32.mrf.mxu3 }
 0x47a   : > { %v5014_v47 = vadd.f32 %v5013_v46, %v4993_v44  ;;  %5036 = vmatmul.f32.vlgmr.msrb.gmra.mxu0 %v5018_v43  ;;  %5076 = vmatmul.f32.vlgmr.msrb.gmra.mxu2 %v5018_v43  ;;  %v9464_v43 = vld [vmem:[#allocation14 + $0x12c] sm:$0xf0]  ;;  %v9462_v44 = vld [vmem:[#allocation14 + $0x124] sm:$0xf]  ;;  %v8544_v46 = vld [vmem:[#allocation14 + $0x130] sm:$0xf0] }
 0x47b   : > { %5570 = vmatpush.bf16.msrb.mxu0 %v8519_v37  ;;  %5596 = vmatpush.bf16.msrb.mxu2 %v8523_v42  ;;  %v9477_v37 = vld [vmem:[#allocation14 + $0x194] sm:$0xf0]  ;;  %v8438_v42 = vld [vmem:[#allocation14 + $0x48] sm:$0xf] }
 0x47c   : > { %v11276_v48 = vsub.f32 %v11266_v50, %v5014_v47  ;;  %v8543_v47 = vor.u32 %v9464_v43, %v8542_v41  ;;  %v8599_v49 = vor.u32 %v9477_v37, %v8598_v15  ;;  %v8600_v41 = vld [vmem:[#allocation14 + $0x198] sm:$0xf0]  ;;  %v9437_v43 = vld [vmem:[#allocation14 + $0x54] sm:$0xf0] }
 0x47e   : > { %v5019_v2 = vmul.f32 %v11276_v48, %v11276_v48  ;;  %5537 = vmatpush.bf16.msra.mxu1 %v8543_v47  ;;  %v8439_v47 = vor.u32 %v9437_v43, %v8438_v42  ;;  %v9505_v42 = vld [vmem:[#allocation16 + $0x74] sm:$0xf0] }
 0x47f   : > { %5571 = vmatpush.bf16.msrb.mxu0 %v8503_v33  ;;  %5597 = vmatpush.bf16.msrb.mxu2 %v8507_v3  ;;  %v9473_v33 = vld [vmem:[#allocation14 + $0x174] sm:$0xf0] }
 0x480   : > { %5056 = vmatmul.f32.vlgmr.msrb.gmra.mxu1 %v5019_v2  ;;  %5096 = vmatmul.f32.vlgmr.msrb.gmra.mxu3 %v5019_v2  ;;  %v8547_v2 = vor.u32 %v9462_v44, %v8544_v46  ;;  %v8603_v46 = vor.u32 %v9475_v5, %v8600_v41  ;;  %v8583_v3 = vor.u32 %v9473_v33, %v8582_v59  ;;  %v8710_v41 = vld [vmem:[#allocation16 + $0x70] sm:$0xf]  ;;  %v9503_v59 = vld [vmem:[#allocation16 + $0x64] sm:$0xf0] }
 0x482   : > { %5563 = vmatpush.bf16.msra.mxu3 %v8547_v2  ;;  %5538 = vmatpush.bf16.msra.mxu1 %v8527_v38  ;;  %v9435_v2 = vld [vmem:[#allocation14 + $0x4c] sm:$0xf]  ;;  %v8584_v38 = vld [vmem:[#allocation14 + $0x178] sm:$0xf0] }
 0x483   : > { %5572 = vmatpush.bf16.msrb.mxu0 %v8487_v7  ;;  %5598 = vmatpush.bf16.msrb.mxu2 %v8491_v51  ;;  %v8443_v18 = vor.u32 %v9435_v2, %v8440_v55  ;;  %v8587_v13 = vor.u32 %v9471_v21, %v8584_v38  ;;  %v8568_v7 = vld [vmem:[#allocation14 + $0x158] sm:$0xf0]  ;;  %v9429_v51 = vld [vmem:[#allocation14 + $0x14] sm:$0xf0]  ;;  %v8711_v2 = vor.u32 %v9505_v42, %v8710_v41  ;;  %v8774_v21 = vld [vmem:[#allocation16 + $0xf0] sm:$0xf] }
 0x484   : > { %v8571_v28 = vor.u32 %v9467_v26, %v8568_v7  ;;  %v8678_v26 = vld [vmem:[#allocation16 + $0x30] sm:$0xf]  ;;  %v8759_v7 = vor.u32 %v9517_v1, %v8758_v4  ;;  %v8654_v42 = vld [vmem:[#allocation16] sm:$0xf]  ;;  %v9520_v4 = vld [vmem:[#allocation16 + $0xf4] sm:$0xf] }
 0x485   : > { %v8776_v1 = vld [vmem:[#allocation16 + $0xf8] sm:$0xf0] }
 0x486   : > { %5564 = vmatpush.bf16.msra.mxu3 %v8531_v22  ;;  %5583 = vmatpush.bf16.msrb.mxu1 %v8647_v54  ;;  %v8424_v54 = vld [vmem:[#allocation14 + $0x38] sm:$0xf0] }
 0x487   : > { %5573 = vmatpush.bf16.msrb.mxu0 %v8471_v53  ;;  %5599 = vmatpush.bf16.msrb.mxu2 %v8475_v24 }
 0x48a   : > { %5609 = vmatpush.bf16.msrb.mxu3 %v8651_v31  ;;  %5584 = vmatpush.bf16.msrb.mxu1 %v8631_v6  ;;  %v8427_v31 = vor.u32 %v9431_v60, %v8424_v54  ;;  %v8408_v6 = vld [vmem:[#allocation14 + $0x18] sm:$0xf0]  ;;  %v8686_v54 = vld [vmem:[#allocation16 + $0x40] sm:$0xf] }
 0x48b   : > { %5574 = vmatpush.bf16.msrb.mxu0 %v8455_v0  ;;  %5600 = vmatpush.bf16.msrb.mxu2 %v8459_v8  ;;  %v8411_v62 = vor.u32 %v9427_v56, %v8408_v6  ;;  %v8750_v6 = vld [vmem:[#allocation16 + $0xc0] sm:$0xf] }
 0x48e   : > { %5610 = vmatpush.bf16.msrb.mxu3 %v8635_v10  ;;  %5585 = vmatpush.bf16.msrb.mxu1 %v8615_v23  ;;  %v8407_v10 = vor.u32 %v9429_v51, %v8406_v45  ;;  %v8534_v23 = vld [vmem:[#allocation14 + $0x108] sm:$0xf]  ;;  %v9497_v45 = vld [vmem:[#allocation16 + $0x34] sm:$0xf0]  ;;  %v8838_v51 = vld [vmem:[#allocation16 + $0x170] sm:$0xf] }
 0x48f   : > { %5575 = vmatpush.bf16.msrb.mxu0 %v8439_v47  ;;  %5601 = vmatpush.bf16.msrb.mxu2 %v8443_v18  ;;  %v8702_v18 = vld [vmem:[#allocation16 + $0x60] sm:$0xf] }
 0x492   : > { %5611 = vmatpush.bf16.msrb.mxu3 %v8619_v29  ;;  %5586 = vmatpush.bf16.msrb.mxu1 %v8599_v49  ;;  %v9459_v29 = vld [vmem:[#allocation14 + $0x10c] sm:$0xf] }
 0x493   : > { %5576 = vmatpush.bf16.msrb.mxu0 %v8423_v61  ;;  %5602 = vmatpush.bf16.msrb.mxu2 %v8427_v31  ;;  %v8539_v0 = vor.u32 %v9459_v29, %v8536_v30  ;;  %v9493_v30 = vld [vmem:[#allocation16 + $0x14] sm:$0xf0] }
 0x496   : > { %5612 = vmatpush.bf16.msrb.mxu3 %v8603_v46  ;;  %5587 = vmatpush.bf16.msrb.mxu1 %v8583_v3  ;;  %v8703_v3 = vor.u32 %v9503_v59, %v8702_v18 }
 0x497   : > { %5577 = vmatpush.bf16.msrb.mxu0 %v8407_v10  ;;  %5603 = vmatpush.bf16.msrb.mxu2 %v8411_v62  ;;  %v8751_v10 = vor.u32 %v9515_v25, %v8750_v6  ;;  %v9535_v62 = vld [vmem:[#allocation16 + $0x164] sm:$0xf0]  ;;  %v8870_v25 = vld [vmem:[#allocation16 + $0x1b0] sm:$0xf] }
 0x49a   : > { %5613 = vmatpush.bf16.msrb.mxu3 %v8587_v13  ;;  %5588 = vmatpush.bf16.msrb.mxu1 %v8567_v58  ;;  %v9519_v13 = vld [vmem:[#allocation16 + $0xe4] sm:$0xf0]  ;;  %v9537_v58 = vld [vmem:[#allocation16 + $0x174] sm:$0xf0] }
 0x49b   : > { %v8839_v56 = vor.u32 %v9537_v58, %v8838_v51  ;;  %v9527_v51 = vld [vmem:[#allocation16 + $0x124] sm:$0xf0] }
 0x49e   : > { %5614 = vmatpush.bf16.msrb.mxu3 %v8571_v28  ;;  %5589 = vmatpush.bf16.msrb.mxu1 %v8551_v14  ;;  %v8679_v28 = vor.u32 %v9497_v45, %v8678_v26  ;;  %v8742_v14 = vld [vmem:[#allocation16 + $0xb0] sm:$0xf]  ;;  %v8798_v45 = vld [vmem:[#allocation16 + $0x120] sm:$0xf] }
 0x49f   : > { %v8799_v58 = vor.u32 %v9527_v51, %v8798_v45 }
 0x4a2   : > { %5615 = vmatpush.bf16.msrb.mxu3 %v8555_v16  ;;  %v9513_v16 = vld [vmem:[#allocation16 + $0xb4] sm:$0xf0] }
 0x4a6   : > { %5616 = vmatpush.bf16.msrb.mxu3 %v8539_v0  ;;  %v9533_v0 = vld [vmem:[#allocation16 + $0x154] sm:$0xf0] }
 0x4f7   : > { %v5037_v34 = vpop.f32.mrf.mxu0 }
 0x4f8   : > { %v5038_v44 = vadd.f32 1e-05, %v5037_v34  ;;  %v8535_v34 = vor.u32 %v9461_v27, %v8534_v23  ;;  %v8743_v23 = vor.u32 %v9513_v16, %v8742_v14  ;;  %v9553_v27 = vld [vmem:[#allocation16 + $0x1f4] sm:$0xf0]  ;;  %v11285_v14 = vld [vmem:[%s11389_s14] sm:$0xf] }
 0x4fa   : > { %5590 = vmatpush.bf16.msrb.mxu1 %v8535_v34 }
 0x4fd   : > { %v5057_v39 = vpop.f32.mrf.mxu1  ;;  %v5077_v12 = vpop.f32.mrf.mxu2 }
 0x4fe   : > { %v5058_v9 = vadd.f32 %v5057_v39, %v5038_v44  ;;  %v5078_v22 = vadd.f32 1e-05, %v5077_v12  ;;  %v9521_v39 = vld [vmem:[#allocation16 + $0xf4] sm:$0xf0] }
 0x4ff   : > { %v8775_v63 = vor.u32 %v9521_v39, %v8774_v21  ;;  %v9509_v21 = vld [vmem:[#allocation16 + $0x94] sm:$0xf0] }
 0x500   : > { %9724 = vrsqrt.f32 %v5058_v9  ;;  %vm5106_vm7 = vweird.f32 %v5058_v9 }
 0x503   : > { %v5097_v53 = vpop.f32.mrf.mxu3 }
 0x504   : > { %v5098_v24 = vadd.f32 %v5097_v53, %v5078_v22  ;;  %v8766_v22 = vld [vmem:[#allocation16 + $0xe0] sm:$0xf] }
 0x505   : > { %v8767_v60 = vor.u32 %v9519_v13, %v8766_v22  ;;  %v8830_v53 = vld [vmem:[#allocation16 + $0x160] sm:$0xf]  ;;  %v8704_v22 = vld [vmem:[#allocation16 + $0x68] sm:$0xf0] }
 0x506   : > { %v9725_v36 = vpop.eup %9724  ;;  %9726 = vrsqrt.f32 %v5098_v24  ;;  %vm5116_vm10 = vweird.f32 %v5098_v24 }
 0x507   : > { %v5101_v57 = vmul.f32 %v9725_v36, %v5058_v9  ;;  %vm5107_vm6 = vweird.f32 %v9725_v36 }
 0x508   : > { %vm5108_vm8 = vmor %vm5106_vm7, %vm5107_vm6 }
 0x509   : > { %v5102_v52 = vmul.f32 %v9725_v36, %v5101_v57  ;;  %v8662_v57 = vld [vmem:[#allocation16 + $0x10] sm:$0xf] }
 0x50a   : > { %v8663_v34 = vor.u32 %v9493_v30, %v8662_v57  ;;  %v9543_v57 = vld [vmem:[#allocation16 + $0x1a4] sm:$0xf0] }
 0x50b   : > { %v5103_v11 = vmul.f32 0.5, %v5102_v52  ;;  %v8822_v52 = vld [vmem:[#allocation16 + $0x150] sm:$0xf] }
 0x50c   : > { %v9727_v8 = vpop.eup %9726 }
 0x50d   : > { %v5104_v15 = vsub.f32 1.5, %v5103_v11  ;;  %v5111_v37 = vmul.f32 %v9727_v8, %v5098_v24  ;;  %vm5117_vm9 = vweird.f32 %v9727_v8  ;;  %v8831_v24 = vor.u32 %v9535_v62, %v8830_v53  ;;  %v8790_v62 = vld [vmem:[#allocation16 + $0x110] sm:$0xf] }
 0x50e   : > { %vm5118_vm11 = vmor %vm5116_vm10, %vm5117_vm9  ;;  %v8823_v11 = vor.u32 %v9533_v0, %v8822_v52  ;;  %v9516_v52 = vld [vmem:[#allocation16 + $0xd4] sm:$0xf]  ;;  %v5190_v0 = vperm.slane %v11285_v14, 0 }
 0x50f   : > { %v5105_v5 = vmul.f32 %v9725_v36, %v5104_v15  ;;  %v5112_v49 = vmul.f32 %v9727_v8, %v5111_v37  ;;  %v9511_v15 = vld [vmem:[#allocation16 + $0xa4] sm:$0xf0]  ;;  %v8894_v37 = vld [vmem:[#allocation16 + $0x1e0] sm:$0xf] }
 0x511   : > { %v5109_v43 = vsel %vm5108_vm8, %v9725_v36, %v5105_v5  ;;  %v5113_v44 = vmul.f32 0.5, %v5112_v49  ;;  %v8902_v36 = vld [vmem:[#allocation16 + $0x1f0] sm:$0xf]  ;;  %v9551_v49 = vld [vmem:[#allocation16 + $0x1e4] sm:$0xf0] }
 0x512   : > { %v5120_v46 = vmul.f32 %v5109_v43, %v11271_v32  ;;  %v9501_v32 = vld [vmem:[#allocation16 + $0x54] sm:$0xf0]  ;;  %v8903_v29 = vor.u32 %v9553_v27, %v8902_v36  ;;  %v8895_v41 = vor.u32 %v9551_v49, %v8894_v37  ;;  %v9491_v43 = vld [vmem:[#allocation16 + $0x4] sm:$0xf0]  ;;  %v9498_v36 = vld [vmem:[#allocation16 + $0x44] sm:$0xf] }
 0x513   : > { %v5114_v47 = vsub.f32 1.5, %v5113_v44  ;;  %v8695_v61 = vor.u32 %v9501_v32, %v8694_v35  ;;  %v8814_v44 = vld [vmem:[#allocation16 + $0x140] sm:$0xf]  ;;  %v8806_v35 = vld [vmem:[#allocation16 + $0x130] sm:$0xf] }
 0x514   : > { %v5122_v55 = vpack.c.bf16 %v5120_v46, %v5120_v46  ;;  %v8655_v46 = vor.u32 %v9491_v43, %v8654_v42  ;;  %v9529_v32 = vld [vmem:[#allocation16 + $0x134] sm:$0xf0]  ;;  %v9523_v37 = vld [vmem:[#allocation16 + $0x104] sm:$0xf0]  ;;  %v9496_v49 = vld [vmem:[#allocation16 + $0x34] sm:$0xf] }
 0x515   : > { %v5115_v33 = vmul.f32 %v9727_v8, %v5114_v47  ;;  %v9531_v47 = vld [vmem:[#allocation16 + $0x144] sm:$0xf0]  ;;  %v9536_v42 = vld [vmem:[#allocation16 + $0x174] sm:$0xf] }
 0x516   : > { %5526 = vmatmul.bf16.vlgmr.msra.gmra.mxu0 %v5122_v55  ;;  %5552 = vmatmul.bf16.vlgmr.msra.gmra.mxu2 %v5122_v55  ;;  %v8815_v18 = vor.u32 %v9531_v47, %v8814_v44  ;;  %v8840_v44 = vld [vmem:[#allocation16 + $0x178] sm:$0xf0]  ;;  %v9541_v47 = vld [vmem:[#allocation16 + $0x194] sm:$0xf0] }
 0x517   : > { %v5119_v12 = vsel %vm5118_vm11, %v9727_v8, %v5115_v33  ;;  %6052 = vmatpush.bf16.msra.mxu0 %v8711_v2  ;;  %6078 = vmatpush.bf16.msra.mxu2 %v8839_v56  ;;  %v8734_v8 = vld [vmem:[#allocation16 + $0xa0] sm:$0xf]  ;;  %v9504_v2 = vld [vmem:[#allocation16 + $0x74] sm:$0xf]  ;;  %v8726_v33 = vld [vmem:[#allocation16 + $0x90] sm:$0xf] }
 0x518   : > { %v5121_v38 = vmul.f32 %v5119_v12, %v11276_v48  ;;  %v9499_v48 = vld [vmem:[#allocation16 + $0x44] sm:$0xf0]  ;;  %v8735_v5 = vor.u32 %v9511_v15, %v8734_v8  ;;  %v8727_v39 = vor.u32 %v9509_v21, %v8726_v33  ;;  %v8886_v12 = vld [vmem:[#allocation16 + $0x1d0] sm:$0xf]  ;;  %v8696_v56 = vld [vmem:[#allocation16 + $0x58] sm:$0xf0] }
 0x519   : > { %v8687_v31 = vor.u32 %v9499_v48, %v8686_v54  ;;  %v8878_v54 = vld [vmem:[#allocation16 + $0x1c0] sm:$0xf]  ;;  %v5191_v33 = vperm.slane %v11285_v14, 1 }
 0x51a   : > { %v5123_v9 = vpack.c.bf16 %v5121_v38, %v5121_v38  ;;  %v8782_v15 = vld [vmem:[#allocation16 + $0x100] sm:$0xf] }
 0x51b   : > { %6053 = vmatpush.bf16.msra.mxu0 %v8703_v3  ;;  %6079 = vmatpush.bf16.msra.mxu2 %v8831_v24  ;;  %v9549_v3 = vld [vmem:[#allocation16 + $0x1d4] sm:$0xf0] }
 0x51c   : > { %5539 = vmatmul.bf16.vlgmr.msra.gmra.mxu1 %v5123_v9  ;;  %5565 = vmatmul.bf16.vlgmr.msra.gmra.mxu3 %v5123_v9  ;;  %v8887_v38 = vor.u32 %v9549_v3, %v8886_v12  ;;  %v9525_v24 = vld [vmem:[#allocation16 + $0x114] sm:$0xf0]  ;;  %v9494_v12 = vld [vmem:[#allocation16 + $0x24] sm:$0xf]  ;;  %v8672_v3 = vld [vmem:[#allocation16 + $0x28] sm:$0xf0] }
 0x51d   : > { %6065 = vmatpush.bf16.msra.mxu1 %v8775_v63  ;;  %6091 = vmatpush.bf16.msra.mxu3 %v8903_v29  ;;  %v8807_v63 = vor.u32 %v9529_v32, %v8806_v35  ;;  %v8791_v16 = vor.u32 %v9525_v24, %v8790_v62  ;;  %v8862_v29 = vld [vmem:[#allocation16 + $0x1a0] sm:$0xf]  ;;  %v9550_v62 = vld [vmem:[#allocation16 + $0x1e4] sm:$0xf] }
 0x51e   : > { %v8863_v30 = vor.u32 %v9543_v57, %v8862_v29 }
 0x51f   : > { %6054 = vmatpush.bf16.msra.mxu0 %v8695_v61  ;;  %6080 = vmatpush.bf16.msra.mxu2 %v8823_v11  ;;  %v8718_v61 = vld [vmem:[#allocation16 + $0x80] sm:$0xf] }
 0x521   : > { %6066 = vmatpush.bf16.msra.mxu1 %v8767_v60  ;;  %6092 = vmatpush.bf16.msra.mxu3 %v8895_v41  ;;  %v9507_v60 = vld [vmem:[#allocation16 + $0x84] sm:$0xf0]  ;;  %v8680_v41 = vld [vmem:[#allocation16 + $0x38] sm:$0xf0] }
 0x522   : > { %v8719_v48 = vor.u32 %v9507_v60, %v8718_v61  ;;  %v8683_v43 = vor.u32 %v9496_v49, %v8680_v41  ;;  %v9548_v49 = vld [vmem:[#allocation16 + $0x1d4] sm:$0xf]  ;;  %v8888_v41 = vld [vmem:[#allocation16 + $0x1d8] sm:$0xf0] }
 0x523   : > { %6055 = vmatpush.bf16.msra.mxu0 %v8687_v31  ;;  %6081 = vmatpush.bf16.msra.mxu2 %v8815_v18  ;;  %v9547_v31 = vld [vmem:[#allocation16 + $0x1c4] sm:$0xf0]  ;;  %v9514_v18 = vld [vmem:[#allocation16 + $0xc4] sm:$0xf] }
 0x524   : > { %v8879_v26 = vor.u32 %v9547_v31, %v8878_v54  ;;  %v8744_v31 = vld [vmem:[#allocation16 + $0xb8] sm:$0xf0] }
 0x525   : > { %6067 = vmatpush.bf16.msra.mxu1 %v8759_v7  ;;  %6093 = vmatpush.bf16.msra.mxu3 %v8887_v38  ;;  %v8779_v7 = vor.u32 %v9520_v4, %v8776_v1  ;;  %v9534_v38 = vld [vmem:[#allocation16 + $0x164] sm:$0xf]  ;;  %v9552_v4 = vld [vmem:[#allocation16 + $0x1f4] sm:$0xf] }
 0x526   : > { %5578 = vmatmul.bf16.vlgmr.msrb.gmra.mxu0 %v5122_v55  ;;  %5604 = vmatmul.bf16.vlgmr.msrb.gmra.mxu2 %v5122_v55  ;;  %v8712_v55 = vld [vmem:[#allocation16 + $0x78] sm:$0xf0] }
 0x527   : > { %6056 = vmatpush.bf16.msra.mxu0 %v8679_v28  ;;  %v8715_v59 = vor.u32 %v9504_v2, %v8712_v55  ;;  %6082 = vmatpush.bf16.msra.mxu2 %v8807_v63  ;;  %v9500_v28 = vld [vmem:[#allocation16 + $0x54] sm:$0xf]  ;;  %v8843_v2 = vor.u32 %v9536_v42, %v8840_v44  ;;  %v8675_v63 = vor.u32 %v9494_v12, %v8672_v3  ;;  %v5192_v44 = vperm.slane %v11285_v14, 2  ;;  %v8720_v12 = vld [vmem:[#allocation16 + $0x88] sm:$0xf0] }
 0x528   : > { %v8699_v6 = vor.u32 %v9500_v28, %v8696_v56  ;;  %v8664_v28 = vld [vmem:[#allocation16 + $0x18] sm:$0xf0]  ;;  %v9532_v56 = vld [vmem:[#allocation16 + $0x154] sm:$0xf]  ;;  %v9546_v3 = vld [vmem:[#allocation16 + $0x1c4] sm:$0xf] }
 0x529   : > { %6068 = vmatpush.bf16.msra.mxu1 %v8751_v10  ;;  %6094 = vmatpush.bf16.msra.mxu3 %v8879_v26  ;;  %v9545_v10 = vld [vmem:[#allocation16 + $0x1b4] sm:$0xf0] }
 0x52a   : > { %v8871_v17 = vor.u32 %v9545_v10, %v8870_v25 }
 0x52b   : > { %6057 = vmatpush.bf16.msra.mxu0 %v8671_v40  ;;  %v8768_v40 = vld [vmem:[#allocation16 + $0xe8] sm:$0xf0]  ;;  %6083 = vmatpush.bf16.msra.mxu2 %v8799_v58  ;;  %v9492_v58 = vld [vmem:[#allocation16 + $0x14] sm:$0xf] }
 0x52c   : > { %5591 = vmatmul.bf16.vlgmr.msrb.gmra.mxu1 %v5123_v9  ;;  %5617 = vmatmul.bf16.vlgmr.msrb.gmra.mxu3 %v5123_v9  ;;  %v9502_v9 = vld [vmem:[#allocation16 + $0x64] sm:$0xf]  ;;  %v8771_v53 = vor.u32 %v9518_v20, %v8768_v40 }
 0x52d   : > { %6069 = vmatpush.bf16.msra.mxu1 %v8743_v23  ;;  %v8707_v13 = vor.u32 %v9502_v9, %v8704_v22  ;;  %v8688_v23 = vld [vmem:[#allocation16 + $0x48] sm:$0xf0]  ;;  %6095 = vmatpush.bf16.msra.mxu3 %v8871_v17  ;;  %v8846_v22 = vld [vmem:[#allocation16 + $0x180] sm:$0xf]  ;;  %v8667_v17 = vor.u32 %v9492_v58, %v8664_v28  ;;  %v9510_v40 = vld [vmem:[#allocation16 + $0xa4] sm:$0xf] }
 0x52e   : > { %v8691_v27 = vor.u32 %v9498_v36, %v8688_v23  ;;  %v8832_v9 = vld [vmem:[#allocation16 + $0x168] sm:$0xf0]  ;;  %v9490_v23 = vld [vmem:[#allocation16 + $0x4] sm:$0xf]  ;;  %v5193_v58 = vperm.slane %v11285_v14, 3 }
 0x52f   : > { %6058 = vmatpush.bf16.msra.mxu0 %v8663_v34  ;;  %v8760_v34 = vld [vmem:[#allocation16 + $0xd8] sm:$0xf0]  ;;  %6084 = vmatpush.bf16.msra.mxu2 %v8791_v16  ;;  %v8835_v60 = vor.u32 %v9534_v38, %v8832_v9  ;;  %v8896_v36 = vld [vmem:[#allocation16 + $0x1e8] sm:$0xf0] }
 0x530   : > { %v8763_v8 = vor.u32 %v9516_v52, %v8760_v34  ;;  %v9530_v52 = vld [vmem:[#allocation16 + $0x144] sm:$0xf]  ;;  %v8816_v34 = vld [vmem:[#allocation16 + $0x148] sm:$0xf0] }
 0x531   : > { %6070 = vmatpush.bf16.msra.mxu1 %v8735_v5  ;;  %v8783_v5 = vor.u32 %v9523_v37, %v8782_v15  ;;  %6096 = vmatpush.bf16.msra.mxu3 %v8863_v30  ;;  %v8899_v30 = vor.u32 %v9550_v62, %v8896_v36  ;;  %v8819_v37 = vor.u32 %v9530_v52, %v8816_v34  ;;  %v8856_v52 = vld [vmem:[#allocation16 + $0x198] sm:$0xf0] }
 0x533   : > { %6059 = vmatpush.bf16.msra.mxu0 %v8655_v46  ;;  %v8854_v46 = vld [vmem:[#allocation16 + $0x190] sm:$0xf]  ;;  %6085 = vmatpush.bf16.msra.mxu2 %v8783_v5  ;;  %v8728_v5 = vld [vmem:[#allocation16 + $0x98] sm:$0xf0] }
 0x534   : > { %v8855_v55 = vor.u32 %v9541_v47, %v8854_v46 }
 0x535   : > { %6071 = vmatpush.bf16.msra.mxu1 %v8727_v39 }
 0x536   : > { %6097 = vmatpush.bf16.msra.mxu3 %v8855_v55  ;;  %v9528_v55 = vld [vmem:[#allocation16 + $0x134] sm:$0xf] }
 0x537   : > { %6104 = vmatpush.bf16.msrb.mxu0 %v8715_v59  ;;  %v8752_v59 = vld [vmem:[#allocation16 + $0xc8] sm:$0xf0]  ;;  %6130 = vmatpush.bf16.msrb.mxu2 %v8843_v2  ;;  %v8891_v2 = vor.u32 %v9548_v49, %v8888_v41 }
 0x538   : > { %v8755_v21 = vor.u32 %v9514_v18, %v8752_v59  ;;  %v8808_v18 = vld [vmem:[#allocation16 + $0x138] sm:$0xf0]  ;;  %v9506_v59 = vld [vmem:[#allocation16 + $0x84] sm:$0xf] }
 0x539   : > { %6072 = vmatpush.bf16.msra.mxu1 %v8719_v48  ;;  %v9512_v48 = vld [vmem:[#allocation16 + $0xb4] sm:$0xf]  ;;  %v8723_v38 = vor.u32 %v9506_v59, %v8720_v12 }
 0x53a   : > { %v8747_v26 = vor.u32 %v9512_v48, %v8744_v31 }
 0x53b   : > { %6105 = vmatpush.bf16.msrb.mxu0 %v8707_v13  ;;  %v9539_v13 = vld [vmem:[#allocation16 + $0x184] sm:$0xf0]  ;;  %6131 = vmatpush.bf16.msrb.mxu2 %v8835_v60 }
 0x53c   : > { %v8847_v54 = vor.u32 %v9539_v13, %v8846_v22 }
 0x53d   : > { %6117 = vmatpush.bf16.msrb.mxu1 %v8779_v7  ;;  %v8904_v7 = vld [vmem:[#allocation16 + $0x1f8] sm:$0xf0] }
 0x53e   : > { %v8907_v51 = vor.u32 %v9552_v4, %v8904_v7  ;;  %6098 = vmatpush.bf16.msra.mxu3 %v8847_v54  ;;  %v9524_v7 = vld [vmem:[#allocation16 + $0x114] sm:$0xf] }
 0x53f   : > { %6106 = vmatpush.bf16.msrb.mxu0 %v8699_v6  ;;  %v8824_v6 = vld [vmem:[#allocation16 + $0x158] sm:$0xf0] }
 0x540   : > { %v8827_v20 = vor.u32 %v9532_v56, %v8824_v6  ;;  %v8792_v56 = vld [vmem:[#allocation16 + $0x118] sm:$0xf0] }
 0x541   : > { %6118 = vmatpush.bf16.msrb.mxu1 %v8771_v53  ;;  %v8736_v53 = vld [vmem:[#allocation16 + $0xa8] sm:$0xf0] }
 0x542   : > { %6143 = vmatpush.bf16.msrb.mxu3 %v8907_v51  ;;  %v8739_v16 = vor.u32 %v9510_v40, %v8736_v53  ;;  %6132 = vmatpush.bf16.msrb.mxu2 %v8827_v20  ;;  %v8795_v40 = vor.u32 %v9524_v7, %v8792_v56 }
 0x543   : > { %6107 = vmatpush.bf16.msrb.mxu0 %v8691_v27  ;;  %v8656_v27 = vld [vmem:[#allocation16 + $0x8] sm:$0xf0] }
 0x544   : > { %v8659_v15 = vor.u32 %v9490_v23, %v8656_v27 }
 0x545   : > { %6119 = vmatpush.bf16.msrb.mxu1 %v8763_v8 }
 0x546   : > { %6144 = vmatpush.bf16.msrb.mxu3 %v8899_v30  ;;  %6133 = vmatpush.bf16.msrb.mxu2 %v8819_v37  ;;  %v9540_v30 = vld [vmem:[#allocation16 + $0x194] sm:$0xf] }
 0x547   : > { %6108 = vmatpush.bf16.msrb.mxu0 %v8683_v43  ;;  %v8859_v41 = vor.u32 %v9540_v30, %v8856_v52 }
 0x549   : > { %6120 = vmatpush.bf16.msrb.mxu1 %v8755_v21 }
 0x54a   : > { %6145 = vmatpush.bf16.msrb.mxu3 %v8891_v2 }
 0x54b   : > { %6109 = vmatpush.bf16.msrb.mxu0 %v8675_v63  ;;  %v8800_v63 = vld [vmem:[#allocation16 + $0x128] sm:$0xf0] }
 0x54d   : > { %6121 = vmatpush.bf16.msrb.mxu1 %v8747_v26  ;;  %v8872_v26 = vld [vmem:[#allocation16 + $0x1b8] sm:$0xf0] }
 0x54f   : > { %6110 = vmatpush.bf16.msrb.mxu0 %v8667_v17 }
 0x551   : > { %6122 = vmatpush.bf16.msrb.mxu1 %v8739_v16  ;;  %v8784_v16 = vld [vmem:[#allocation16 + $0x108] sm:$0xf0] }
 0x553   : > { %6111 = vmatpush.bf16.msrb.mxu0 %v8659_v15 }
 0x593   : > { %v5527_v11 = vpop.f32.mrf.mxu0 }
 0x594   : > { %v5528_v39 = vadd.f32 %v5527_v11, %v5190_v0  ;;  %v9508_v0 = vld [vmem:[#allocation16 + $0x94] sm:$0xf] }
 0x595   : > { %v8731_v46 = vor.u32 %v9508_v0, %v8728_v5 }
 0x597   : > { %6123 = vmatpush.bf16.msrb.mxu1 %v8731_v46  ;;  %v8848_v46 = vld [vmem:[#allocation16 + $0x188] sm:$0xf0] }
 0x599   : > { %v5540_v35 = vpop.f32.mrf.mxu1  ;;  %v5553_v32 = vpop.f32.mrf.mxu2 }
 0x59a   : > { %v11289_v61 = vadd.f32 %v5540_v35, %v5528_v39  ;;  %v5554_v10 = vadd.f32 %v5553_v32, %v5191_v33  ;;  %v8811_v39 = vor.u32 %v9528_v55, %v8808_v18  ;;  %v8880_v35 = vld [vmem:[#allocation16 + $0x1c8] sm:$0xf0]  ;;  %v9526_v32 = vld [vmem:[#allocation16 + $0x124] sm:$0xf] }
 0x59b   : > { %v5529_v1 = vpop.f32.mrf.mxu0  ;;  %v8883_v22 = vor.u32 %v9546_v3, %v8880_v35  ;;  %v8803_v48 = vor.u32 %v9526_v32, %v8800_v63  ;;  %6124 = vmatpush.bf16.msrb.mxu1 %v8723_v38 }
 0x59c   : > { %v5626_v45 = vmul.f32 0.044715, %v11289_v61  ;;  %6134 = vmatpush.bf16.msrb.mxu2 %v8811_v39  ;;  %v9544_v1 = vld [vmem:[#allocation16 + $0x1b4] sm:$0xf]  ;;  %v5622_v53 = vmul.f32 0.5, %v11289_v61 }
 0x59d   : > { %6146 = vmatpush.bf16.msrb.mxu3 %v8883_v22  ;;  %v8875_v28 = vor.u32 %v9544_v1, %v8872_v26  ;;  %v5726_v1 = vld [vmem:[%s11390_s9] sm:$0x3] }
 0x59e   : > { %v5630_v25 = vmul.f32 %v5626_v45, %v11289_v61  ;;  %v5728_v7 = vperm.slane %v5726_v1, 0 }
 0x59f   : > { %v5566_v24 = vpop.f32.mrf.mxu3 }
 0x5a0   : > { %v5634_v29 = vmul.f32 %v5630_v25, %v11289_v61  ;;  %v11294_v57 = vadd.f32 %v5566_v24, %v5554_v10  ;;  %v9542_v25 = vld [vmem:[#allocation16 + $0x1a4] sm:$0xf]  ;;  %v8864_v10 = vld [vmem:[#allocation16 + $0x1a8] sm:$0xf0]  ;;  %6135 = vmatpush.bf16.msrb.mxu2 %v8803_v48 }
 0x5a1   : > { %v5542_v11 = vpop.f32.mrf.mxu1  ;;  %v5555_v8 = vpop.f32.mrf.mxu2  ;;  %v9522_v24 = vld [vmem:[#allocation16 + $0x104] sm:$0xf]  ;;  %6147 = vmatpush.bf16.msrb.mxu3 %v8875_v28  ;;  %v8867_v14 = vor.u32 %v9542_v25, %v8864_v10 }
 0x5a2   : > { %v5638_v42 = vadd.f32 %v5634_v29, %v11289_v61  ;;  %v5627_v43 = vmul.f32 0.044715, %v11294_v57  ;;  %v8787_v11 = vor.u32 %v9522_v24, %v8784_v16 }
 0x5a3   : > { %v5579_v47 = vpop.f32.mrf.mxu0 }
 0x5a4   : > { %v5642_v33 = vmul.f32 0.7978846, %v5638_v42  ;;  %v5631_v21 = vmul.f32 %v5627_v43, %v11294_v57  ;;  %v5580_v54 = vadd.f32 %v5579_v47, %v5192_v44  ;;  %6136 = vmatpush.bf16.msrb.mxu2 %v8795_v40  ;;  %v5623_v42 = vmul.f32 0.5, %v11294_v57  ;;  %v9538_v44 = vld [vmem:[#allocation16 + $0x184] sm:$0xf] }
 0x5a5   : > { %6148 = vmatpush.bf16.msrb.mxu3 %v8867_v14  ;;  %v8851_v59 = vor.u32 %v9538_v44, %v8848_v46 }
 0x5a6   : > { %9728 = vtanh.f32 %v5642_v33  ;;  %v5635_v9 = vmul.f32 %v5631_v21, %v11294_v57 }
 0x5a7   : > { %v5568_v13 = vpop.f32.mrf.mxu3 }
 0x5a8   : > { %v5639_v60 = vadd.f32 %v5635_v9, %v11294_v57  ;;  %6137 = vmatpush.bf16.msrb.mxu2 %v8787_v11 }
 0x5a9   : > { %v5592_v31 = vpop.f32.mrf.mxu1  ;;  %v5605_v4 = vpop.f32.mrf.mxu2  ;;  %6149 = vmatpush.bf16.msrb.mxu3 %v8859_v41 }
 0x5aa   : > { %v5643_v45 = vmul.f32 0.7978846, %v5639_v60  ;;  %v5593_v51 = vadd.f32 %v5592_v31, %v5580_v54  ;;  %v5606_v23 = vadd.f32 %v5605_v4, %v5193_v58 }
 0x5ab   : > { %v5581_v6 = vpop.f32.mrf.mxu0 }
 0x5ac   : > { %v9729_v17 = vpop.eup %9728  ;;  %9730 = vtanh.f32 %v5643_v45  ;;  %v5628_v20 = vmul.f32 0.044715, %v5593_v51  ;;  %v5624_v57 = vmul.f32 0.5, %v5593_v51 }
 0x5ad   : > { %v5650_v62 = vadd.f32 1.0, %v9729_v17  ;;  %6150 = vmatpush.bf16.msrb.mxu3 %v8851_v59 }
 0x5ae   : > { %v5632_v36 = vmul.f32 %v5628_v20, %v5593_v51 }
 0x5af   : > { %v5618_v27 = vpop.f32.mrf.mxu3  ;;  %v5654_v29 = vmul.f32 %v5650_v62, %v5622_v53  ;;  %v5729_v53 = vperm.slane %v5726_v1, 1 }
 0x5b0   : > { %v5636_v34 = vmul.f32 %v5632_v36, %v5593_v51  ;;  %v5619_v0 = vadd.f32 %v5618_v27, %v5606_v23 }
 0x5b1   : > { %v5594_v8 = vpop.f32.mrf.mxu1  ;;  %v5607_v15 = vpop.f32.mrf.mxu2  ;;  %v5658_v37 = vpack.c.bf16 %v5654_v29, %v5654_v29 }
 0x5b2   : > { %v9731_v5 = vpop.eup %9730  ;;  %v5640_v61 = vadd.f32 %v5636_v34, %v5593_v51  ;;  %v5629_v49 = vmul.f32 0.044715, %v5619_v0  ;;  %v5625_v9 = vmul.f32 0.5, %v5619_v0 }
 0x5b3   : > { %6060 = vmatmul.bf16.vlgmr.msra.gmra.mxu0 %v5658_v37  ;;  %v5651_v43 = vadd.f32 1.0, %v9731_v5 }
 0x5b4   : > { %v5644_v47 = vmul.f32 0.7978846, %v5640_v61  ;;  %v5633_v2 = vmul.f32 %v5629_v49, %v5619_v0 }
 0x5b5   : > { %v5655_v55 = vmul.f32 %v5651_v43, %v5623_v42 }
 0x5b6   : > { %9732 = vtanh.f32 %v5644_v47  ;;  %v5637_v18 = vmul.f32 %v5633_v2, %v5619_v0 }
 0x5b7   : > { %v5620_v33 = vpop.f32.mrf.mxu3  ;;  %v5659_v21 = vpack.c.bf16 %v5655_v55, %v5655_v55 }
 0x5b8   : > { %v5641_v39 = vadd.f32 %v5637_v18, %v5619_v0 }
 0x5b9   : > { %6073 = vmatmul.bf16.vlgmr.msra.gmra.mxu1 %v5659_v21 }
 0x5ba   : > { %v5645_v12 = vmul.f32 0.7978846, %v5641_v39 }
 0x5bc   : > { %v9733_v3 = vpop.eup %9732  ;;  %9734 = vtanh.f32 %v5645_v12 }
 0x5bd   : > { %v5652_v38 = vadd.f32 1.0, %v9733_v3 }
 0x5bf   : > { %v5656_v35 = vmul.f32 %v5652_v38, %v5624_v57 }
 0x5c1   : > { %v5660_v32 = vpack.c.bf16 %v5656_v35, %v5656_v35 }
 0x5c2   : > { %v9735_v63 = vpop.eup %9734 }
 0x5c3   : > { %6086 = vmatmul.bf16.vlgmr.msra.gmra.mxu2 %v5660_v32  ;;  %6112 = vmatmul.bf16.vlgmr.msrb.gmra.mxu0 %v5658_v37  ;;  %v5653_v22 = vadd.f32 1.0, %v9735_v63 }
 0x5c5   : > { %v5657_v13 = vmul.f32 %v5653_v22, %v5625_v9 }
 0x5c7   : > { %v5661_v60 = vpack.c.bf16 %v5657_v13, %v5657_v13 }
 0x5c9   : > { %6099 = vmatmul.bf16.vlgmr.msra.gmra.mxu3 %v5661_v60  ;;  %6125 = vmatmul.bf16.vlgmr.msrb.gmra.mxu1 %v5659_v21 }
 0x5d3   : > { %6138 = vmatmul.bf16.vlgmr.msrb.gmra.mxu2 %v5660_v32 }
 0x5d9   : > { %6151 = vmatmul.bf16.vlgmr.msrb.gmra.mxu3 %v5661_v60 }
 0x630   : > { %v6061_v54 = vpop.f32.mrf.mxu0 }
 0x631   : > { %v6062_v58 = vadd.f32 %v6061_v54, %v5728_v7 }
 0x636   : > { %v6074_v48 = vpop.f32.mrf.mxu1 }
 0x637   : > { %v6075_v56 = vadd.f32 %v6074_v48, %v6062_v58 }
 0x638   : > { %v6063_v31 = vpop.f32.mrf.mxu0 }
 0x63e   : > { %v6076_v4 = vpop.f32.mrf.mxu1 }
 0x640   : > { %v6113_v26 = vpop.f32.mrf.mxu0 }
 0x641   : > { %v6114_v16 = vadd.f32 %v6113_v26, %v5729_v53 }
 0x646   : > { %v6087_v45 = vpop.f32.mrf.mxu2  ;;  %v6126_v51 = vpop.f32.mrf.mxu1 }
 0x647   : > { %v6088_v6 = vadd.f32 %v6087_v45, %v6075_v56  ;;  %v6127_v36 = vadd.f32 %v6126_v51, %v6114_v16 }
 0x648   : > { %v6115_v28 = vpop.f32.mrf.mxu0 }
 0x64c   : > { %v6100_v25 = vpop.f32.mrf.mxu3 }
 0x64d   : > { %v6101_v10 = vadd.f32 %v6100_v25, %v6088_v6 }
 0x64e   : > { %v6089_v17 = vpop.f32.mrf.mxu2  ;;  %v6128_v20 = vpop.f32.mrf.mxu1 }
 0x64f   : > { %v6156_v40 = vadd.f32 %v6101_v10, %v11239_v19 }
 0x651   : > { %6158 = vst [vmem:[%s557_s20] sm:$0xff] %v6156_v40 }
 0x654   : > { %v6102_v62 = vpop.f32.mrf.mxu3 }
 0x656   : > { %v6139_v24 = vpop.f32.mrf.mxu2 }
 0x657   : > { %v6140_v23 = vadd.f32 %v6139_v24, %v6127_v36 }
 0x65c   : > { %v6152_v14 = vpop.f32.mrf.mxu3 }
 0x65d   : > { %v6153_v19 = vadd.f32 %v6152_v14, %v6140_v23 }
 0x65e   : > { %v6141_v27 = vpop.f32.mrf.mxu2 }
 0x65f   : > { %v6157_v29 = vadd.f32 %v6153_v19, %v11266_v50 }
 0x661   : > { %6159 = vst [vmem:[%s557_s20 + $0x8] sm:$0xff] %v6157_v29 }
 0x662   : > { %10100 = shalt.err (!%p10097_p9)
}
 0x663   : > { %9589 = dma.vmem_to_hbm [thread:$0]  (%p10349_p4), %s6175_s29, 256, %s6177_s27, %s6161_s19  }
 0x664   : > { %v6154_v50 = vpop.f32.mrf.mxu3 }
 0x665 PF: > { %s6188_s13 = sand.u32 1, %s10143_s21   ;;  %p11392_p10 = scmp.ge.s32.totalorder %s10155_s24, 2 }
 0x666   : > { %s6189_s20 = scalar_lea.sflag [#allocation4], %s6188_s13 }
 0x667   : > { %p9621_p13 = pnand %p11392_p10, %p10353_p6 }
 0x669   : > { %p9622_p11 = pneg %p9621_p13 }
 0x66b   : > { %10138 = dma.done.wait (%p9622_p11), %s6189_s20, 256  }
 0x66c   : > { %10140 = vsyncadd (%p9622_p11), %s6189_s20, 4294967040  ;;  %p29_p0 = scmp.ge.s32.totalorder %s10323_s15, 4   ;;  %s11393_s21 = smov %s10147_s22 }
 0x66d   : > { %s11394_s22 = smov %s10151_s23  ;;  %s11395_s23 = smov %s10334_s12 }
 0x66e   : > { %s11396_s24 = smov %s10323_s15  ;;  %31 = sbr.rel (!%p29_p0) target bundleno = 17 (0x11), region = 145 }
 0x673   :  { %6195 = vsyncpa [#allocation3], 1 }
 0x674   :  { %6197 = vsyncpa [#allocation3 + $0x1], 1 }
 0x675   :  { %6198 = vsyncpa [#allocation6], 1 }
 0x676   :  { %6199 = vsyncpa [#allocation9], 1 }
 0x677   :  { %6200 = vsyncpa [#allocation12], 1 }
 0x678   :  { %6201 = vsyncpa [#allocation15], 1 }
 0x679   :  { %6202 = vsyncpa [#allocation4], 1 }
 0x67a   :  { %6204 = vsyncpa [#allocation4 + $0x1], 1 }

</bundles_post_ra>
